<compile_context>
chip_gen: v7x
topology: tpu7x:2x2x1
jax: 0.10.0
libtpu: 0.0.40
codegen_flags: <defaults>
</compile_context>

<pallas_src>
import functools

import jax
import jax.numpy as jnp
from jax import lax
from jax.experimental import pallas as pl
from jax.experimental.pallas import tpu as pltpu

NEG_SLOPE = 0.01      # nn.LeakyReLU(0.01)
BN_EPS = 1e-5         # nn.BatchNorm2d default eps
LANE = 128            # TPU lane width
TM_MAX = 512          # max rows per M tile
MIN_TM = 128          # don't split tiles below this just for core parallelism


# ----------------------------------------------------------------------------
# Small helpers
# ----------------------------------------------------------------------------
def _round_up(v, m):
    return ((v + m - 1) // m) * m


def _cdiv(a, b):
    return (a + b - 1) // b


def _pad_to(a, shape):
    pads = tuple((0, s - d) for d, s in zip(a.shape, shape))
    if any(p[1] for p in pads):
        a = jnp.pad(a, pads)
    return a


def _row(v, cols, pad_value):
    v = jnp.asarray(v, jnp.float32).reshape(1, -1)
    c = v.shape[1]
    if c < cols:
        v = jnp.pad(v, ((0, 0), (0, cols - c)), constant_values=pad_value)
    return v


def _tiling(M):
    """Balanced M tiling: returns (Mp, tm)."""
    n_tiles = _cdiv(M, TM_MAX)
    if n_tiles < 2 and M >= 2 * MIN_TM:
        n_tiles = 2                  # >= 2 grid steps -> both v7x TCs get work
    tm = _round_up(_cdiv(M, n_tiles), 8)
    Mp = _round_up(M, tm)
    return Mp, tm


# ----------------------------------------------------------------------------
# Pallas kernels
# ----------------------------------------------------------------------------
def _conv_kernel(x_ref, w_ref, t_ref, o_ref, *, act):
    """out = act(x @ W_scaled + shift); BN scale is pre-folded into W columns."""
    y = jnp.dot(x_ref[...], w_ref[...], preferred_element_type=jnp.float32)
    y = y + t_ref[...]
    if act == "leaky":
        y = jnp.maximum(y, NEG_SLOPE * y)
    elif act == "relu":
        y = jnp.maximum(y, 0.0)
    o_ref[...] = y.astype(o_ref.dtype)


def _block_dot(cat_ref, w_ref, n_branch):
    acc = jnp.dot(cat_ref[0], w_ref[0], preferred_element_type=jnp.float32)
    for b in range(1, n_branch):
        acc = acc + jnp.dot(cat_ref[b], w_ref[b],
                            preferred_element_type=jnp.float32)
    return acc


def _residual_kernel(cat_ref, wl_ref, res_ref, s_ref, t_ref, o_ref, *, n_branch):
    """out = relu((last_conv1(cat) + residual) * bn0_scale + shift')."""
    acc = _block_dot(cat_ref, wl_ref, n_branch)
    y = (acc + res_ref[...].astype(jnp.float32)) * s_ref[...] + t_ref[...]
    o_ref[...] = jnp.maximum(y, 0.0).astype(o_ref.dtype)


def _residual_dsconv_kernel(cat_ref, wl_ref, xs_ref, wd_ref, td_ref,
                            s_ref, t_ref, o_ref, *, n_branch):
    """Same, but the shortcut 1x1 conv+BN+LeakyReLU is computed in-kernel."""
    acc = _block_dot(cat_ref, wl_ref, n_branch)
    sc = jnp.dot(xs_ref[...], wd_ref[...], preferred_element_type=jnp.float32)
    sc = sc + td_ref[...]
    sc = jnp.maximum(sc, NEG_SLOPE * sc)
    y = (acc + sc) * s_ref[...] + t_ref[...]
    o_ref[...] = jnp.maximum(y, 0.0).astype(o_ref.dtype)


# ----------------------------------------------------------------------------
# Gridded pallas_call wrappers (lane-dense, bf16 in / bf16 out, f32 accumulate)
# ----------------------------------------------------------------------------
def conv_matmul(x3, w3, t3, *, act):
    """act(x @ W + t) over a (branch, M-tile) grid.

    x3: (B, M, K)          (cast to bf16, M/K zero-padded here if needed)
    w3: (B, Kp, Np) bf16   (BN scale folded, K/N pre-padded to lane multiples)
    t3: (B, 1, Np) f32
    returns (B, M, Np) bf16; pad channel lanes are exactly zero.
    """
    B, M, K = x3.shape
    Bw, Kp, Np = w3.shape
    assert B == Bw and Kp >= K
    Mp, tm = _tiling(M)
    xp = _pad_to(x3.astype(jnp.bfloat16), (B, Mp, Kp))
    out = pl.pallas_call(
        functools.partial(_conv_kernel, act=act),
        out_shape=jax.ShapeDtypeStruct((B, Mp, Np), jnp.bfloat16),
        grid=(B, Mp // tm),
        in_specs=[pl.BlockSpec((None, tm, Kp), lambda b, i: (b, i, 0)),
                  pl.BlockSpec((None, Kp, Np), lambda b, i: (b, 0, 0)),
                  pl.BlockSpec((None, 1, Np), lambda b, i: (b, 0, 0))],
        out_specs=pl.BlockSpec((None, tm, Np), lambda b, i: (b, i, 0)),
        compiler_params=pltpu.CompilerParams(
            dimension_semantics=("parallel", "parallel")),
        cost_estimate=pl.CostEstimate(
            flops=2 * B * Mp * Kp * Np, transcendentals=0,
            bytes_accessed=2 * B * (Mp * Kp + Kp * Np + Mp * Np)),
    )(xp, w3, t3)
    if Mp != M:
        out = out[:, :M]
    return out


def residual_epilogue(cat3, wlast, s_row, t_row, *, res2d=None,
                      xs2d=None, wd=None, td=None):
    """relu((last_conv1(cat) + shortcut) * bn0_scale + shift'), fully fused.

    cat3:  (nb, M, Kb) bf16 branch-stacked activations (lane padded).
    wlast: (nb, Kb, Np) bf16 block rows of the last_conv1 weight.
    Shortcut: either `res2d` (M, Np) bf16 (identity / maxpool path) or
              `xs2d` (M, Kd) + `wd` (Kd, Np) bf16 + `td` (1, Np) f32 for the
              1x1 downsample conv+BN+LeakyReLU computed inside the kernel.
    """
    nb, M, Kb = cat3.shape
    Np = wlast.shape[-1]
    Mp, tm = _tiling(M)
    catp = _pad_to(cat3, (nb, Mp, Kb))
    in_specs = [pl.BlockSpec((nb, tm, Kb), lambda i: (0, i, 0)),
                pl.BlockSpec((nb, Kb, Np), lambda i: (0, 0, 0))]
    args = [catp, wlast]
    if xs2d is not None:
        Kd = wd.shape[0]
        kernel = functools.partial(_residual_dsconv_kernel, n_branch=nb)
        in_specs += [pl.BlockSpec((tm, Kd), lambda i: (i, 0)),
                     pl.BlockSpec((Kd, Np), lambda i: (0, 0)),
                     pl.BlockSpec((1, Np), lambda i: (0, 0))]
        args += [_pad_to(xs2d.astype(jnp.bfloat16), (Mp, Kd)), wd, td]
        flops = 2 * Mp * Np * (nb * Kb + Kd)
    else:
        kernel = functools.partial(_residual_kernel, n_branch=nb)
        in_specs += [pl.BlockSpec((tm, Np), lambda i: (i, 0))]
        args += [_pad_to(res2d.astype(jnp.bfloat16), (Mp, Np))]
        flops = 2 * Mp * Np * nb * Kb
    in_specs += [pl.BlockSpec((1, Np), lambda i: (0, 0)),
                 pl.BlockSpec((1, Np), lambda i: (0, 0))]
    args += [s_row, t_row]
    out = pl.pallas_call(
        kernel,
        out_shape=jax.ShapeDtypeStruct((Mp, Np), jnp.bfloat16),
        grid=(Mp // tm,),
        in_specs=in_specs,
        out_specs=pl.BlockSpec((tm, Np), lambda i: (i, 0)),
        compiler_params=pltpu.CompilerParams(
            dimension_semantics=("parallel",)),
        cost_estimate=pl.CostEstimate(
            flops=flops, transcendentals=0,
            bytes_accessed=2 * (nb * Mp * Kb + nb * Kb * Np + 2 * Mp * Np)),
    )(*args)
    if Mp != M:
        out = out[:M]
    return out


# ----------------------------------------------------------------------------
# Plain-JAX glue: im2col, weight flattening
# ----------------------------------------------------------------------------
def im2col(x, k, stride, padding, dilation):
    """x: NHWC -> (N*Ho*Wo, k*k*C); K ordered as (kh, kw, C)."""
    N, H, W, C = x.shape
    xp = jnp.pad(x, ((0, 0), (padding, padding), (padding, padding), (0, 0)))
    Ho = (H + 2 * padding - dilation * (k - 1) - 1) // stride + 1
    Wo = (W + 2 * padding - dilation * (k - 1) - 1) // stride + 1
    cols = []
    for i in range(k):
        for j in range(k):
            r0 = i * dilation
            c0 = j * dilation
            cols.append(xp[:, r0:r0 + stride * (Ho - 1) + 1:stride,
                              c0:c0 + stride * (Wo - 1) + 1:stride, :])
    p = jnp.stack(cols, axis=3)                      # (N, Ho, Wo, k*k, C)
    return p.reshape(N * Ho * Wo, k * k * C), (N, Ho, Wo)


def weight_matrix(w_oihw):
    """OIHW conv weight -> (kh*kw*Cin, Cout) matrix (matches im2col K order)."""
    Cout, Cin, kh, kw = w_oihw.shape
    return jnp.transpose(w_oihw, (2, 3, 1, 0)).reshape(kh * kw * Cin, Cout)


# ----------------------------------------------------------------------------
# Parameter initialization (deterministic, synthetic, mirrors the nn.Module)
# ----------------------------------------------------------------------------
def init_conv_bn(key, cin, cout, k, use_bn=True):
    kw_, kb, kg, kbeta, km, kv = jax.random.split(key, 6)
    fan_in = cin * k * k
    w = jax.random.normal(kw_, (cout, cin, k, k), jnp.float32) * (2.0 / fan_in) ** 0.5
    p = {"w": w, "k": k,
         "gamma": None, "beta": None, "mean": None, "var": None, "bias": None}
    if use_bn:
        p["gamma"] = 1.0 + 0.1 * jax.random.normal(kg, (cout,), jnp.float32)
        p["beta"] = 0.1 * jax.random.normal(kbeta, (cout,), jnp.float32)
        p["mean"] = 0.1 * jax.random.normal(km, (cout,), jnp.float32)
        p["var"] = 1.0 + jax.random.uniform(kv, (cout,), jnp.float32)
    else:
        p["bias"] = 0.1 * jax.random.normal(kb, (cout,), jnp.float32)
    return p


def init_bn(key, c):
    kg, kb, km, kv = jax.random.split(key, 4)
    return {"gamma": 1.0 + 0.1 * jax.random.normal(kg, (c,), jnp.float32),
            "beta": 0.1 * jax.random.normal(kb, (c,), jnp.float32),
            "mean": 0.1 * jax.random.normal(km, (c,), jnp.float32),
            "var": 1.0 + jax.random.uniform(kv, (c,), jnp.float32)}


def init_gdc(key, cin, cout, stride, dilations):
    """GroupedDilatedConvV2 (list-dilations branch) parameters."""
    n = len(dilations)
    oc = cin // n
    keys = jax.random.split(key, 2 * n + 3)
    branches = []
    for i in range(n):
        branches.append({"c1": init_conv_bn(keys[2 * i], cin, oc, 1),
                         "c3": init_conv_bn(keys[2 * i + 1], oc, oc, 3)})
    last = init_conv_bn(keys[2 * n], oc * n, cout, 1, use_bn=False)  # bias only
    bn0 = init_bn(keys[2 * n + 1], cout)
    if stride == 1 and cin == cout:
        ds_kind, ds = "identity", None
    elif stride == 2 and cin == cout:
        ds_kind, ds = "maxpool", None            # MaxPool2d(1, 2) == subsample
    else:
        ds_kind, ds = "conv", init_conv_bn(keys[2 * n + 2], cin, cout, 1)
    return {"branches": branches, "last": last, "bn0": bn0, "stride": stride,
            "dilations": list(dilations), "ds_kind": ds_kind, "ds": ds}


def init_encoder(key, in_ch):
    ks = jax.random.split(key, 5)
    return {"stem": init_conv_bn(ks[0], in_ch, 2 * in_ch, 7),
            "g1": init_gdc(ks[1], 2 * in_ch, 4 * in_ch, stride=2, dilations=[6, 12, 18]),
            "g2": init_gdc(ks[2], 4 * in_ch, 4 * in_ch, stride=2, dilations=[1, 6, 12]),
            "g3": init_gdc(ks[3], 4 * in_ch, 4 * in_ch, stride=2, dilations=[1, 6, 12]),
            "g4": init_gdc(ks[4], 4 * in_ch, 4 * in_ch, stride=1, dilations=[1, 6, 12])}


# ----------------------------------------------------------------------------
# One-time preparation: pad + fold BN + concat branch weights (outside trace)
# ----------------------------------------------------------------------------
def _bn_affine(p, cout):
    if p["gamma"] is not None:
        s = p["gamma"] * lax.rsqrt(p["var"] + BN_EPS)
        t = p["beta"] - p["mean"] * s
    else:                                  # no BN -> plain conv bias
        s = jnp.ones((cout,), jnp.float32)
        t = p["bias"]
    return s, t


def _prep_conv(p):
    """conv(+BN) -> scale-folded bf16 weight (Kp,Np) and f32 shift row (1,Np)."""
    cout = p["w"].shape[0]
    s, t = _bn_affine(p, cout)
    w2d = weight_matrix(p["w"]) * s[None, :]
    Kp = _round_up(w2d.shape[0], LANE)
    Np = _round_up(cout, LANE)
    return _pad_to(w2d, (Kp, Np)).astype(jnp.bfloat16), _row(t, Np, 0.0)


def prep_gdc(raw):
    nb = len(raw["dilations"])
    cin = raw["branches"][0]["c1"]["w"].shape[1]
    oc = raw["branches"][0]["c1"]["w"].shape[0]
    cout = raw["last"]["w"].shape[0]
    cin_p = _round_up(cin, LANE)
    oc_p = _round_up(oc, LANE)
    np1 = _round_up(nb * oc, LANE)
    np_out = _round_up(cout, LANE)
    kp3 = _round_up(9 * oc, LANE)

    # (a) all-branch fused 1x1 conv+BN+LeakyReLU (columns = branch concat).
    w1c, t1c = [], []
    for b in raw["branches"]:
        s, t = _bn_affine(b["c1"], oc)
        w1c.append(weight_matrix(b["c1"]["w"]) * s[None, :])
        t1c.append(t)
    w1 = _pad_to(jnp.concatenate(w1c, axis=1), (cin_p, np1)).astype(jnp.bfloat16)
    t1 = _row(jnp.concatenate(t1c), np1, 0.0)

    # (b) branch-stacked dilated 3x3 conv+BN+LeakyReLU weights.
    w3s, t3s = [], []
    for b in raw["branches"]:
        s, t = _bn_affine(b["c3"], oc)
        w3s.append(_pad_to(weight_matrix(b["c3"]["w"]) * s[None, :],
                           (kp3, oc_p)).astype(jnp.bfloat16))
        t3s.append(_row(t, oc_p, 0.0))
    w3 = jnp.stack(w3s)                              # (nb, kp3, oc_p)
    t3 = jnp.stack(t3s)                              # (nb, 1, oc_p)

    # (c) last_conv1 (1x1, bias, no BN/act) as block rows matching the
    #     branch-stacked (nb, M, oc_p) layout of the cat tensor.
    wl2d = weight_matrix(raw["last"]["w"])           # (nb*oc, cout)
    wlast = jnp.stack([_pad_to(wl2d[b * oc:(b + 1) * oc], (oc_p, np_out))
                       for b in range(nb)]).astype(jnp.bfloat16)

    # (d) bn0 affine; last_conv1 bias folded into the shift.
    s0 = raw["bn0"]["gamma"] * lax.rsqrt(raw["bn0"]["var"] + BN_EPS)
    t0 = raw["bn0"]["beta"] - raw["bn0"]["mean"] * s0
    prep = {"n_branch": nb, "oc": oc, "stride": raw["stride"],
            "dils": list(raw["dilations"]), "ds_kind": raw["ds_kind"],
            "w1": w1[None], "t1": t1[None], "w3": w3, "t3": t3,
            "wlast": wlast,
            "s0": _row(s0, np_out, 1.0),
            "t0": _row(raw["last"]["bias"] * s0 + t0, np_out, 0.0)}

    # (e) downsample 1x1 conv+BN+LeakyReLU (only when it exists).
    if raw["ds_kind"] == "conv":
        sd, td = _bn_affine(raw["ds"], cout)
        prep["wd"] = _pad_to(weight_matrix(raw["ds"]["w"]) * sd[None, :],
                             (cin_p, np_out)).astype(jnp.bfloat16)
        prep["td"] = _row(td, np_out, 0.0)
    return prep


def prepare_encoder(raw, in_channels):
    w, t = _prep_conv(raw["stem"])
    prep = {"stem": {"w": w[None], "t": t[None]}, "out_c": 4 * in_channels}
    for name in ("g1", "g2", "g3", "g4"):
        prep[name] = prep_gdc(raw[name])
    return prep


# ----------------------------------------------------------------------------
# Forward passes
# ----------------------------------------------------------------------------
def apply_gdc(x, p):
    """GroupedDilatedConvV2 forward. x: (N,H,W,Cin_p) bf16, pad lanes zero."""
    N, H, W, Cp = x.shape
    stride, oc = p["stride"], p["oc"]

    # (1) all branch 1x1 conv+BN+LeakyReLU share the input -> one matmul kernel.
    y1 = conv_matmul(x.reshape(1, N * H * W, Cp), p["w1"], p["t1"], act="leaky")
    y1 = y1.reshape(N, H, W, -1)         # branch i at columns [i*oc, (i+1)*oc)

    # (2) three dilated 3x3 conv+BN+LeakyReLU -> ONE kernel over a branch axis.
    # TODO(synk): replace this JAX-side im2col with an in-kernel kh*kw
    #             tap-reduction grid axis to avoid the 9x patch-matrix HBM cost.
    patches = []
    for i, d in enumerate(p["dils"]):
        pb, (_, Ho, Wo) = im2col(y1[..., i * oc:(i + 1) * oc], 3, stride, d, d)
        patches.append(pb)
    x3 = jnp.stack(patches)                                 # (nb, M, 9*oc) bf16
    cat = conv_matmul(x3, p["w3"], p["t3"], act="leaky")    # (nb, M, oc_p) bf16
    M = N * Ho * Wo

    # (3)+(4) fused epilogue: last_conv1 + shortcut + add + bn0 + ReLU.
    if p["ds_kind"] == "conv":
        xs = x[:, ::stride, ::stride, :] if stride > 1 else x
        out = residual_epilogue(cat, p["wlast"], p["s0"], p["t0"],
                                xs2d=xs.reshape(M, Cp), wd=p["wd"], td=p["td"])
    else:
        sc = x if p["ds_kind"] == "identity" else x[:, ::stride, ::stride, :]
        out = residual_epilogue(cat, p["wlast"], p["s0"], p["t0"],
                                res2d=sc.reshape(M, -1))
    return out.reshape(N, Ho, Wo, -1)


def apply_encoder(x_nchw, prep):
    """Encoder_V2 forward. Input NCHW f32, output NCHW f32 (eval-mode BN)."""
    x = jnp.transpose(x_nchw, (0, 2, 3, 1)).astype(jnp.bfloat16)   # NHWC bf16
    x2d, (N, Ho, Wo) = im2col(x, 7, 2, 3, 1)            # 7x7 stride-2 stem
    y = conv_matmul(x2d[None], prep["stem"]["w"], prep["stem"]["t"], act="leaky")
    x = y.reshape(N, Ho, Wo, -1)                        # lane-padded bf16 NHWC
    for name in ("g1", "g2", "g3", "g4"):
        x = apply_gdc(x, prep[name])
    out = x[..., :prep["out_c"]].astype(jnp.float32)    # drop pad lanes once
    return jnp.transpose(out, (0, 3, 1, 2))


# ----------------------------------------------------------------------------
if __name__ == "__main__":
    key = jax.random.PRNGKey(0)
    pkey, xkey = jax.random.split(key)

    in_channels = 4
    raw_params = init_encoder(pkey, in_channels)
    prep = prepare_encoder(raw_params, in_channels)     # one-time weight prep

    x = jax.random.normal(xkey, (2, in_channels, 32, 32), jnp.float32)  # NCHW
    fwd = jax.jit(lambda inp: apply_encoder(inp, prep))
    y = jax.block_until_ready(fwd(x))

    # Spatial: 32 ->16 (stem s2) ->8 ->4 ->2 ->2 ; channels = 4 * in_channels.
    assert y.shape == (2, 4 * in_channels, 2, 2), y.shape
    assert bool(jnp.all(jnp.isfinite(y)))
    print("KERNEL_OK")
</pallas_src>

<mosaic_0001>
module attributes {stable_mosaic.version = 11 : i64} {
  func.func @_conv_kernel(%arg0: i32, %arg1: i32, %arg2: memref<1x256x256xbf16, #tpu.memory_space<vmem>>, %arg3: memref<1x256x128xbf16, #tpu.memory_space<vmem>>, %arg4: memref<1x1x128xf32, #tpu.memory_space<vmem>>, %arg5: memref<1x256x128xbf16, #tpu.memory_space<vmem>>) attributes {dimension_semantics = [#tpu.dimension_semantics<parallel>, #tpu.dimension_semantics<parallel>], iteration_bounds = array<i64: 1, 2>, scalar_prefetch = 0 : i64, scratch_operands = 0 : i64, tpu.core_type = #tpu.core_type<tc>, window_params = [{transform_indices = @transform_0, window_bounds = array<i64: 1, 256, 256>}, {transform_indices = @transform_1, window_bounds = array<i64: 1, 256, 128>}, {transform_indices = @transform_2, window_bounds = array<i64: 1, 1, 128>}, {transform_indices = @transform_3, window_bounds = array<i64: 1, 256, 128>}]} {
    %c0 = arith.constant 0 : index
    %c0_0 = arith.constant 0 : index
    %c0_1 = arith.constant 0 : index
    %0 = vector.load %arg2[%c0, %c0_0, %c0_1] : memref<1x256x256xbf16, #tpu.memory_space<vmem>>, vector<1x256x256xbf16>
    %1 = vector.shape_cast %0 : vector<1x256x256xbf16> to vector<256x256xbf16>
    %c0_2 = arith.constant 0 : index
    %c0_3 = arith.constant 0 : index
    %c0_4 = arith.constant 0 : index
    %2 = vector.load %arg3[%c0_2, %c0_3, %c0_4] : memref<1x256x128xbf16, #tpu.memory_space<vmem>>, vector<1x256x128xbf16>
    %3 = vector.shape_cast %2 : vector<1x256x128xbf16> to vector<256x128xbf16>
    %cst = arith.constant dense<0.000000e+00> : vector<256x128xf32>
    %4 = tpu.matmul %1, %3, %cst {dimension_numbers = #tpu.dot_dimension_numbers<[1], [0], [0], [1], [0, 0, 1, 1], [], []>} : vector<256x256xbf16>, vector<256x128xbf16>, vector<256x128xf32> -> vector<256x128xf32>
    %c0_5 = arith.constant 0 : index
    %c0_6 = arith.constant 0 : index
    %c0_7 = arith.constant 0 : index
    %5 = vector.load %arg4[%c0_5, %c0_6, %c0_7] : memref<1x1x128xf32, #tpu.memory_space<vmem>>, vector<1x1x128xf32>
    %6 = vector.shape_cast %5 : vector<1x1x128xf32> to vector<1x128xf32>
    %7 = vector.broadcast %6 : vector<1x128xf32> to vector<256x128xf32>
    %8 = arith.addf %4, %7 : vector<256x128xf32>
    %cst_8 = arith.constant 0.00999999977 : f32
    %9 = vector.broadcast %cst_8 : f32 to vector<256x128xf32>
    %10 = arith.mulf %9, %8 : vector<256x128xf32>
    %11 = arith.maximumf %8, %10 : vector<256x128xf32>
    %12 = arith.truncf %11 : vector<256x128xf32> to vector<256x128xbf16>
    %c0_9 = arith.constant 0 : index
    %c0_10 = arith.constant 0 : index
    %c0_11 = arith.constant 0 : index
    %13 = vector.load %arg5[%c0_9, %c0_10, %c0_11] : memref<1x256x128xbf16, #tpu.memory_space<vmem>>, vector<1x256x128xbf16>
    %14 = vector.shape_cast %13 : vector<1x256x128xbf16> to vector<256x128xbf16>
    %15 = vector.shape_cast %12 : vector<256x128xbf16> to vector<1x256x128xbf16>
    tpu.vector_store %arg5[%c0_9, %c0_10, %c0_11], %15 {strides = array<i32>} : memref<1x256x128xbf16, #tpu.memory_space<vmem>>, vector<1x256x128xbf16>,
    return
  }
  func.func @transform_0(%arg0: i32, %arg1: i32) -> (i32, i32, i32) {
    %c0_i32 = arith.constant 0 : i32
    %c0_i32_0 = arith.constant 0 : i32
    return %arg0, %arg1, %c0_i32 : i32, i32, i32
  }
  func.func @transform_1(%arg0: i32, %arg1: i32) -> (i32, i32, i32) {
    %c0_i32 = arith.constant 0 : i32
    %c0_i32_0 = arith.constant 0 : i32
    %c0_i32_1 = arith.constant 0 : i32
    return %arg0, %c0_i32, %c0_i32_0 : i32, i32, i32
  }
  func.func @transform_2(%arg0: i32, %arg1: i32) -> (i32, i32, i32) {
    %c0_i32 = arith.constant 0 : i32
    %c0_i32_0 = arith.constant 0 : i32
    %c0_i32_1 = arith.constant 0 : i32
    return %arg0, %c0_i32, %c0_i32_0 : i32, i32, i32
  }
  func.func @transform_3(%arg0: i32, %arg1: i32) -> (i32, i32, i32) {
    %c0_i32 = arith.constant 0 : i32
    %c0_i32_0 = arith.constant 0 : i32
    return %arg0, %arg1, %c0_i32 : i32, i32, i32
  }
}

module attributes {stable_mosaic.version = 11 : i64} {
  func.func @_conv_kernel(%arg0: i32, %arg1: i32, %arg2: memref<1x256x128xbf16, #tpu.memory_space<vmem>>, %arg3: memref<1x128x128xbf16, #tpu.memory_space<vmem>>, %arg4: memref<1x1x128xf32, #tpu.memory_space<vmem>>, %arg5: memref<1x256x128xbf16, #tpu.memory_space<vmem>>) attributes {dimension_semantics = [#tpu.dimension_semantics<parallel>, #tpu.dimension_semantics<parallel>], iteration_bounds = array<i64: 1, 2>, scalar_prefetch = 0 : i64, scratch_operands = 0 : i64, tpu.core_type = #tpu.core_type<tc>, window_params = [{transform_indices = @transform_0, window_bounds = array<i64: 1, 256, 128>}, {transform_indices = @transform_1, window_bounds = array<i64: 1, 128, 128>}, {transform_indices = @transform_2, window_bounds = array<i64: 1, 1, 128>}, {transform_indices = @transform_3, window_bounds = array<i64: 1, 256, 128>}]} {
    %c0 = arith.constant 0 : index
    %c0_0 = arith.constant 0 : index
    %c0_1 = arith.constant 0 : index
    %0 = vector.load %arg2[%c0, %c0_0, %c0_1] : memref<1x256x128xbf16, #tpu.memory_space<vmem>>, vector<1x256x128xbf16>
    %1 = vector.shape_cast %0 : vector<1x256x128xbf16> to vector<256x128xbf16>
    %c0_2 = arith.constant 0 : index
    %c0_3 = arith.constant 0 : index
    %c0_4 = arith.constant 0 : index
    %2 = vector.load %arg3[%c0_2, %c0_3, %c0_4] : memref<1x128x128xbf16, #tpu.memory_space<vmem>>, vector<1x128x128xbf16>
    %3 = vector.shape_cast %2 : vector<1x128x128xbf16> to vector<128x128xbf16>
    %cst = arith.constant dense<0.000000e+00> : vector<256x128xf32>
    %4 = tpu.matmul %1, %3, %cst {dimension_numbers = #tpu.dot_dimension_numbers<[1], [0], [0], [1], [0, 0, 1, 1], [], []>} : vector<256x128xbf16>, vector<128x128xbf16>, vector<256x128xf32> -> vector<256x128xf32>
    %c0_5 = arith.constant 0 : index
    %c0_6 = arith.constant 0 : index
    %c0_7 = arith.constant 0 : index
    %5 = vector.load %arg4[%c0_5, %c0_6, %c0_7] : memref<1x1x128xf32, #tpu.memory_space<vmem>>, vector<1x1x128xf32>
    %6 = vector.shape_cast %5 : vector<1x1x128xf32> to vector<1x128xf32>
    %7 = vector.broadcast %6 : vector<1x128xf32> to vector<256x128xf32>
    %8 = arith.addf %4, %7 : vector<256x128xf32>
    %cst_8 = arith.constant 0.00999999977 : f32
    %9 = vector.broadcast %cst_8 : f32 to vector<256x128xf32>
    %10 = arith.mulf %9, %8 : vector<256x128xf32>
    %11 = arith.maximumf %8, %10 : vector<256x128xf32>
    %12 = arith.truncf %11 : vector<256x128xf32> to vector<256x128xbf16>
    %c0_9 = arith.constant 0 : index
    %c0_10 = arith.constant 0 : index
    %c0_11 = arith.constant 0 : index
    %13 = vector.load %arg5[%c0_9, %c0_10, %c0_11] : memref<1x256x128xbf16, #tpu.memory_space<vmem>>, vector<1x256x128xbf16>
    %14 = vector.shape_cast %13 : vector<1x256x128xbf16> to vector<256x128xbf16>
    %15 = vector.shape_cast %12 : vector<256x128xbf16> to vector<1x256x128xbf16>
    tpu.vector_store %arg5[%c0_9, %c0_10, %c0_11], %15 {strides = array<i32>} : memref<1x256x128xbf16, #tpu.memory_space<vmem>>, vector<1x256x128xbf16>,
    return
  }
  func.func @transform_0(%arg0: i32, %arg1: i32) -> (i32, i32, i32) {
    %c0_i32 = arith.constant 0 : i32
    %c0_i32_0 = arith.constant 0 : i32
    return %arg0, %arg1, %c0_i32 : i32, i32, i32
  }
  func.func @transform_1(%arg0: i32, %arg1: i32) -> (i32, i32, i32) {
    %c0_i32 = arith.constant 0 : i32
    %c0_i32_0 = arith.constant 0 : i32
    %c0_i32_1 = arith.constant 0 : i32
    return %arg0, %c0_i32, %c0_i32_0 : i32, i32, i32
  }
  func.func @transform_2(%arg0: i32, %arg1: i32) -> (i32, i32, i32) {
    %c0_i32 = arith.constant 0 : i32
    %c0_i32_0 = arith.constant 0 : i32
    %c0_i32_1 = arith.constant 0 : i32
    return %arg0, %c0_i32, %c0_i32_0 : i32, i32, i32
  }
  func.func @transform_3(%arg0: i32, %arg1: i32) -> (i32, i32, i32) {
    %c0_i32 = arith.constant 0 : i32
    %c0_i32_0 = arith.constant 0 : i32
    return %arg0, %arg1, %c0_i32 : i32, i32, i32
  }
}

module attributes {stable_mosaic.version = 11 : i64} {
  func.func @_conv_kernel(%arg0: i32, %arg1: i32, %arg2: memref<1x128x128xbf16, #tpu.memory_space<vmem>>, %arg3: memref<1x128x128xbf16, #tpu.memory_space<vmem>>, %arg4: memref<1x1x128xf32, #tpu.memory_space<vmem>>, %arg5: memref<1x128x128xbf16, #tpu.memory_space<vmem>>) attributes {dimension_semantics = [#tpu.dimension_semantics<parallel>, #tpu.dimension_semantics<parallel>], iteration_bounds = array<i64: 3, 1>, scalar_prefetch = 0 : i64, scratch_operands = 0 : i64, tpu.core_type = #tpu.core_type<tc>, window_params = [{transform_indices = @transform_0, window_bounds = array<i64: 1, 128, 128>}, {transform_indices = @transform_1, window_bounds = array<i64: 1, 128, 128>}, {transform_indices = @transform_2, window_bounds = array<i64: 1, 1, 128>}, {transform_indices = @transform_3, window_bounds = array<i64: 1, 128, 128>}]} {
    %c0 = arith.constant 0 : index
    %c0_0 = arith.constant 0 : index
    %c0_1 = arith.constant 0 : index
    %0 = vector.load %arg2[%c0, %c0_0, %c0_1] : memref<1x128x128xbf16, #tpu.memory_space<vmem>>, vector<1x128x128xbf16>
    %1 = vector.shape_cast %0 : vector<1x128x128xbf16> to vector<128x128xbf16>
    %c0_2 = arith.constant 0 : index
    %c0_3 = arith.constant 0 : index
    %c0_4 = arith.constant 0 : index
    %2 = vector.load %arg3[%c0_2, %c0_3, %c0_4] : memref<1x128x128xbf16, #tpu.memory_space<vmem>>, vector<1x128x128xbf16>
    %3 = vector.shape_cast %2 : vector<1x128x128xbf16> to vector<128x128xbf16>
    %cst = arith.constant dense<0.000000e+00> : vector<128x128xf32>
    %4 = tpu.matmul %1, %3, %cst {dimension_numbers = #tpu.dot_dimension_numbers<[1], [0], [0], [1], [0, 0, 1, 1], [], []>} : vector<128x128xbf16>, vector<128x128xbf16>, vector<128x128xf32> -> vector<128x128xf32>
    %c0_5 = arith.constant 0 : index
    %c0_6 = arith.constant 0 : index
    %c0_7 = arith.constant 0 : index
    %5 = vector.load %arg4[%c0_5, %c0_6, %c0_7] : memref<1x1x128xf32, #tpu.memory_space<vmem>>, vector<1x1x128xf32>
    %6 = vector.shape_cast %5 : vector<1x1x128xf32> to vector<1x128xf32>
    %7 = vector.broadcast %6 : vector<1x128xf32> to vector<128x128xf32>
    %8 = arith.addf %4, %7 : vector<128x128xf32>
    %cst_8 = arith.constant 0.00999999977 : f32
    %9 = vector.broadcast %cst_8 : f32 to vector<128x128xf32>
    %10 = arith.mulf %9, %8 : vector<128x128xf32>
    %11 = arith.maximumf %8, %10 : vector<128x128xf32>
    %12 = arith.truncf %11 : vector<128x128xf32> to vector<128x128xbf16>
    %c0_9 = arith.constant 0 : index
    %c0_10 = arith.constant 0 : index
    %c0_11 = arith.constant 0 : index
    %13 = vector.load %arg5[%c0_9, %c0_10, %c0_11] : memref<1x128x128xbf16, #tpu.memory_space<vmem>>, vector<1x128x128xbf16>
    %14 = vector.shape_cast %13 : vector<1x128x128xbf16> to vector<128x128xbf16>
    %15 = vector.shape_cast %12 : vector<128x128xbf16> to vector<1x128x128xbf16>
    tpu.vector_store %arg5[%c0_9, %c0_10, %c0_11], %15 {strides = array<i32>} : memref<1x128x128xbf16, #tpu.memory_space<vmem>>, vector<1x128x128xbf16>,
    return
  }
  func.func @transform_0(%arg0: i32, %arg1: i32) -> (i32, i32, i32) {
    %c0_i32 = arith.constant 0 : i32
    %c0_i32_0 = arith.constant 0 : i32
    return %arg0, %arg1, %c0_i32 : i32, i32, i32
  }
  func.func @transform_1(%arg0: i32, %arg1: i32) -> (i32, i32, i32) {
    %c0_i32 = arith.constant 0 : i32
    %c0_i32_0 = arith.constant 0 : i32
    %c0_i32_1 = arith.constant 0 : i32
    return %arg0, %c0_i32, %c0_i32_0 : i32, i32, i32
  }
  func.func @transform_2(%arg0: i32, %arg1: i32) -> (i32, i32, i32) {
    %c0_i32 = arith.constant 0 : i32
    %c0_i32_0 = arith.constant 0 : i32
    %c0_i32_1 = arith.constant 0 : i32
    return %arg0, %c0_i32, %c0_i32_0 : i32, i32, i32
  }
  func.func @transform_3(%arg0: i32, %arg1: i32) -> (i32, i32, i32) {
    %c0_i32 = arith.constant 0 : i32
    %c0_i32_0 = arith.constant 0 : i32
    return %arg0, %arg1, %c0_i32 : i32, i32, i32
  }
}

module attributes {stable_mosaic.version = 11 : i64} {
  func.func @_residual_dsconv_kernel(%arg0: i32, %arg1: memref<3x128x128xbf16, #tpu.memory_space<vmem>>, %arg2: memref<3x128x128xbf16, #tpu.memory_space<vmem>>, %arg3: memref<128x128xbf16, #tpu.memory_space<vmem>>, %arg4: memref<128x128xbf16, #tpu.memory_space<vmem>>, %arg5: memref<1x128xf32, #tpu.memory_space<vmem>>, %arg6: memref<1x128xf32, #tpu.memory_space<vmem>>, %arg7: memref<1x128xf32, #tpu.memory_space<vmem>>, %arg8: memref<128x128xbf16, #tpu.memory_space<vmem>>) attributes {dimension_semantics = [#tpu.dimension_semantics<parallel>], iteration_bounds = array<i64: 1>, scalar_prefetch = 0 : i64, scratch_operands = 0 : i64, tpu.core_type = #tpu.core_type<tc>, window_params = [{transform_indices = @transform_0, window_bounds = array<i64: 3, 128, 128>}, {pipeline_mode = #tpu.pipeline_mode<synchronous>, transform_indices = @transform_1, window_bounds = array<i64: 3, 128, 128>}, {transform_indices = @transform_2, window_bounds = array<i64: 128, 128>}, {pipeline_mode = #tpu.pipeline_mode<synchronous>, transform_indices = @transform_3, window_bounds = array<i64: 128, 128>}, {pipeline_mode = #tpu.pipeline_mode<synchronous>, transform_indices = @transform_4, window_bounds = array<i64: 1, 128>}, {pipeline_mode = #tpu.pipeline_mode<synchronous>, transform_indices = @transform_5, window_bounds = array<i64: 1, 128>}, {pipeline_mode = #tpu.pipeline_mode<synchronous>, transform_indices = @transform_6, window_bounds = array<i64: 1, 128>}, {transform_indices = @transform_7, window_bounds = array<i64: 128, 128>}]} {
    %c0 = arith.constant 0 : index
    %c0_0 = arith.constant 0 : index
    %c0_1 = arith.constant 0 : index
    %0 = vector.load %arg1[%c0, %c0_0, %c0_1] : memref<3x128x128xbf16, #tpu.memory_space<vmem>>, vector<1x128x128xbf16>
    %1 = vector.shape_cast %0 : vector<1x128x128xbf16> to vector<128x128xbf16>
    %c0_2 = arith.constant 0 : index
    %c0_3 = arith.constant 0 : index
    %c0_4 = arith.constant 0 : index
    %2 = vector.load %arg2[%c0_2, %c0_3, %c0_4] : memref<3x128x128xbf16, #tpu.memory_space<vmem>>, vector<1x128x128xbf16>
    %3 = vector.shape_cast %2 : vector<1x128x128xbf16> to vector<128x128xbf16>
    %cst = arith.constant dense<0.000000e+00> : vector<128x128xf32>
    %4 = tpu.matmul %1, %3, %cst {dimension_numbers = #tpu.dot_dimension_numbers<[1], [0], [0], [1], [0, 0, 1, 1], [], []>} : vector<128x128xbf16>, vector<128x128xbf16>, vector<128x128xf32> -> vector<128x128xf32>
    %c1 = arith.constant 1 : index
    %c0_5 = arith.constant 0 : index
    %c0_6 = arith.constant 0 : index
    %5 = vector.load %arg1[%c1, %c0_5, %c0_6] : memref<3x128x128xbf16, #tpu.memory_space<vmem>>, vector<1x128x128xbf16>
    %6 = vector.shape_cast %5 : vector<1x128x128xbf16> to vector<128x128xbf16>
    %c1_7 = arith.constant 1 : index
    %c0_8 = arith.constant 0 : index
    %c0_9 = arith.constant 0 : index
    %7 = vector.load %arg2[%c1_7, %c0_8, %c0_9] : memref<3x128x128xbf16, #tpu.memory_space<vmem>>, vector<1x128x128xbf16>
    %8 = vector.shape_cast %7 : vector<1x128x128xbf16> to vector<128x128xbf16>
    %cst_10 = arith.constant dense<0.000000e+00> : vector<128x128xf32>
    %9 = tpu.matmul %6, %8, %cst_10 {dimension_numbers = #tpu.dot_dimension_numbers<[1], [0], [0], [1], [0, 0, 1, 1], [], []>} : vector<128x128xbf16>, vector<128x128xbf16>, vector<128x128xf32> -> vector<128x128xf32>
    %10 = arith.addf %4, %9 : vector<128x128xf32>
    %c2 = arith.constant 2 : index
    %c0_11 = arith.constant 0 : index
    %c0_12 = arith.constant 0 : index
    %11 = vector.load %arg1[%c2, %c0_11, %c0_12] : memref<3x128x128xbf16, #tpu.memory_space<vmem>>, vector<1x128x128xbf16>
    %12 = vector.shape_cast %11 : vector<1x128x128xbf16> to vector<128x128xbf16>
    %c2_13 = arith.constant 2 : index
    %c0_14 = arith.constant 0 : index
    %c0_15 = arith.constant 0 : index
    %13 = vector.load %arg2[%c2_13, %c0_14, %c0_15] : memref<3x128x128xbf16, #tpu.memory_space<vmem>>, vector<1x128x128xbf16>
    %14 = vector.shape_cast %13 : vector<1x128x128xbf16> to vector<128x128xbf16>
    %cst_16 = arith.constant dense<0.000000e+00> : vector<128x128xf32>
    %15 = tpu.matmul %12, %14, %cst_16 {dimension_numbers = #tpu.dot_dimension_numbers<[1], [0], [0], [1], [0, 0, 1, 1], [], []>} : vector<128x128xbf16>, vector<128x128xbf16>, vector<128x128xf32> -> vector<128x128xf32>
    %16 = arith.addf %10, %15 : vector<128x128xf32>
    %c0_17 = arith.constant 0 : index
    %c0_18 = arith.constant 0 : index
    %17 = vector.load %arg3[%c0_17, %c0_18] : memref<128x128xbf16, #tpu.memory_space<vmem>>, vector<128x128xbf16>
    %c0_19 = arith.constant 0 : index
    %c0_20 = arith.constant 0 : index
    %18 = vector.load %arg4[%c0_19, %c0_20] : memref<128x128xbf16, #tpu.memory_space<vmem>>, vector<128x128xbf16>
    %cst_21 = arith.constant dense<0.000000e+00> : vector<128x128xf32>
    %19 = tpu.matmul %17, %18, %cst_21 {dimension_numbers = #tpu.dot_dimension_numbers<[1], [0], [0], [1], [0, 0, 1, 1], [], []>} : vector<128x128xbf16>, vector<128x128xbf16>, vector<128x128xf32> -> vector<128x128xf32>
    %c0_22 = arith.constant 0 : index
    %c0_23 = arith.constant 0 : index
    %20 = vector.load %arg5[%c0_22, %c0_23] : memref<1x128xf32, #tpu.memory_space<vmem>>, vector<1x128xf32>
    %21 = vector.broadcast %20 : vector<1x128xf32> to vector<128x128xf32>
    %22 = arith.addf %19, %21 : vector<128x128xf32>
    %cst_24 = arith.constant 0.00999999977 : f32
    %23 = vector.broadcast %cst_24 : f32 to vector<128x128xf32>
    %24 = arith.mulf %23, %22 : vector<128x128xf32>
    %25 = arith.maximumf %22, %24 : vector<128x128xf32>
    %26 = arith.addf %16, %25 : vector<128x128xf32>
    %c0_25 = arith.constant 0 : index
    %c0_26 = arith.constant 0 : index
    %27 = vector.load %arg6[%c0_25, %c0_26] : memref<1x128xf32, #tpu.memory_space<vmem>>, vector<1x128xf32>
    %28 = vector.broadcast %27 : vector<1x128xf32> to vector<128x128xf32>
    %29 = arith.mulf %26, %28 : vector<128x128xf32>
    %c0_27 = arith.constant 0 : index
    %c0_28 = arith.constant 0 : index
    %30 = vector.load %arg7[%c0_27, %c0_28] : memref<1x128xf32, #tpu.memory_space<vmem>>, vector<1x128xf32>
    %31 = vector.broadcast %30 : vector<1x128xf32> to vector<128x128xf32>
    %32 = arith.addf %29, %31 : vector<128x128xf32>
    %cst_29 = arith.constant 0.000000e+00 : f32
    %33 = vector.broadcast %cst_29 : f32 to vector<128x128xf32>
    %34 = arith.maximumf %32, %33 : vector<128x128xf32>
    %35 = arith.truncf %34 : vector<128x128xf32> to vector<128x128xbf16>
    %c0_30 = arith.constant 0 : index
    %c0_31 = arith.constant 0 : index
    %36 = vector.load %arg8[%c0_30, %c0_31] : memref<128x128xbf16, #tpu.memory_space<vmem>>, vector<128x128xbf16>
    tpu.vector_store %arg8[%c0_30, %c0_31], %35 {strides = array<i32>} : memref<128x128xbf16, #tpu.memory_space<vmem>>, vector<128x128xbf16>,
    return
  }
  func.func @transform_0(%arg0: i32) -> (i32, i32, i32) {
    %c0_i32 = arith.constant 0 : i32
    %c0_i32_0 = arith.constant 0 : i32
    %c0_i32_1 = arith.constant 0 : i32
    return %c0_i32, %arg0, %c0_i32_0 : i32, i32, i32
  }
  func.func @transform_1(%arg0: i32) -> (i32, i32, i32) {
    %c0_i32 = arith.constant 0 : i32
    %c0_i32_0 = arith.constant 0 : i32
    %c0_i32_1 = arith.constant 0 : i32
    %c0_i32_2 = arith.constant 0 : i32
    return %c0_i32, %c0_i32_0, %c0_i32_1 : i32, i32, i32
  }
  func.func @transform_2(%arg0: i32) -> (i32, i32) {
    %c0_i32 = arith.constant 0 : i32
    %c0_i32_0 = arith.constant 0 : i32
    return %arg0, %c0_i32 : i32, i32
  }
  func.func @transform_3(%arg0: i32) -> (i32, i32) {
    %c0_i32 = arith.constant 0 : i32
    %c0_i32_0 = arith.constant 0 : i32
    %c0_i32_1 = arith.constant 0 : i32
    return %c0_i32, %c0_i32_0 : i32, i32
  }
  func.func @transform_4(%arg0: i32) -> (i32, i32) {
    %c0_i32 = arith.constant 0 : i32
    %c0_i32_0 = arith.constant 0 : i32
    %c0_i32_1 = arith.constant 0 : i32
    return %c0_i32, %c0_i32_0 : i32, i32
  }
  func.func @transform_5(%arg0: i32) -> (i32, i32) {
    %c0_i32 = arith.constant 0 : i32
    %c0_i32_0 = arith.constant 0 : i32
    %c0_i32_1 = arith.constant 0 : i32
    return %c0_i32, %c0_i32_0 : i32, i32
  }
  func.func @transform_6(%arg0: i32) -> (i32, i32) {
    %c0_i32 = arith.constant 0 : i32
    %c0_i32_0 = arith.constant 0 : i32
    %c0_i32_1 = arith.constant 0 : i32
    return %c0_i32, %c0_i32_0 : i32, i32
  }
  func.func @transform_7(%arg0: i32) -> (i32, i32) {
    %c0_i32 = arith.constant 0 : i32
    %c0_i32_0 = arith.constant 0 : i32
    return %arg0, %c0_i32 : i32, i32
  }
}

module attributes {stable_mosaic.version = 11 : i64} {
  func.func @_conv_kernel(%arg0: i32, %arg1: i32, %arg2: memref<1x128x128xbf16, #tpu.memory_space<vmem>>, %arg3: memref<1x128x128xbf16, #tpu.memory_space<vmem>>, %arg4: memref<1x1x128xf32, #tpu.memory_space<vmem>>, %arg5: memref<1x128x128xbf16, #tpu.memory_space<vmem>>) attributes {dimension_semantics = [#tpu.dimension_semantics<parallel>, #tpu.dimension_semantics<parallel>], iteration_bounds = array<i64: 1, 1>, scalar_prefetch = 0 : i64, scratch_operands = 0 : i64, tpu.core_type = #tpu.core_type<tc>, window_params = [{transform_indices = @transform_0, window_bounds = array<i64: 1, 128, 128>}, {transform_indices = @transform_1, window_bounds = array<i64: 1, 128, 128>}, {transform_indices = @transform_2, window_bounds = array<i64: 1, 1, 128>}, {transform_indices = @transform_3, window_bounds = array<i64: 1, 128, 128>}]} {
    %c0 = arith.constant 0 : index
    %c0_0 = arith.constant 0 : index
    %c0_1 = arith.constant 0 : index
    %0 = vector.load %arg2[%c0, %c0_0, %c0_1] : memref<1x128x128xbf16, #tpu.memory_space<vmem>>, vector<1x128x128xbf16>
    %1 = vector.shape_cast %0 : vector<1x128x128xbf16> to vector<128x128xbf16>
    %c0_2 = arith.constant 0 : index
    %c0_3 = arith.constant 0 : index
    %c0_4 = arith.constant 0 : index
    %2 = vector.load %arg3[%c0_2, %c0_3, %c0_4] : memref<1x128x128xbf16, #tpu.memory_space<vmem>>, vector<1x128x128xbf16>
    %3 = vector.shape_cast %2 : vector<1x128x128xbf16> to vector<128x128xbf16>
    %cst = arith.constant dense<0.000000e+00> : vector<128x128xf32>
    %4 = tpu.matmul %1, %3, %cst {dimension_numbers = #tpu.dot_dimension_numbers<[1], [0], [0], [1], [0, 0, 1, 1], [], []>} : vector<128x128xbf16>, vector<128x128xbf16>, vector<128x128xf32> -> vector<128x128xf32>
    %c0_5 = arith.constant 0 : index
    %c0_6 = arith.constant 0 : index
    %c0_7 = arith.constant 0 : index
    %5 = vector.load %arg4[%c0_5, %c0_6, %c0_7] : memref<1x1x128xf32, #tpu.memory_space<vmem>>, vector<1x1x128xf32>
    %6 = vector.shape_cast %5 : vector<1x1x128xf32> to vector<1x128xf32>
    %7 = vector.broadcast %6 : vector<1x128xf32> to vector<128x128xf32>
    %8 = arith.addf %4, %7 : vector<128x128xf32>
    %cst_8 = arith.constant 0.00999999977 : f32
    %9 = vector.broadcast %cst_8 : f32 to vector<128x128xf32>
    %10 = arith.mulf %9, %8 : vector<128x128xf32>
    %11 = arith.maximumf %8, %10 : vector<128x128xf32>
    %12 = arith.truncf %11 : vector<128x128xf32> to vector<128x128xbf16>
    %c0_9 = arith.constant 0 : index
    %c0_10 = arith.constant 0 : index
    %c0_11 = arith.constant 0 : index
    %13 = vector.load %arg5[%c0_9, %c0_10, %c0_11] : memref<1x128x128xbf16, #tpu.memory_space<vmem>>, vector<1x128x128xbf16>
    %14 = vector.shape_cast %13 : vector<1x128x128xbf16> to vector<128x128xbf16>
    %15 = vector.shape_cast %12 : vector<128x128xbf16> to vector<1x128x128xbf16>
    tpu.vector_store %arg5[%c0_9, %c0_10, %c0_11], %15 {strides = array<i32>} : memref<1x128x128xbf16, #tpu.memory_space<vmem>>, vector<1x128x128xbf16>,
    return
  }
  func.func @transform_0(%arg0: i32, %arg1: i32) -> (i32, i32, i32) {
    %c0_i32 = arith.constant 0 : i32
    %c0_i32_0 = arith.constant 0 : i32
    return %arg0, %arg1, %c0_i32 : i32, i32, i32
  }
  func.func @transform_1(%arg0: i32, %arg1: i32) -> (i32, i32, i32) {
    %c0_i32 = arith.constant 0 : i32
    %c0_i32_0 = arith.constant 0 : i32
    %c0_i32_1 = arith.constant 0 : i32
    return %arg0, %c0_i32, %c0_i32_0 : i32, i32, i32
  }
  func.func @transform_2(%arg0: i32, %arg1: i32) -> (i32, i32, i32) {
    %c0_i32 = arith.constant 0 : i32
    %c0_i32_0 = arith.constant 0 : i32
    %c0_i32_1 = arith.constant 0 : i32
    return %arg0, %c0_i32, %c0_i32_0 : i32, i32, i32
  }
  func.func @transform_3(%arg0: i32, %arg1: i32) -> (i32, i32, i32) {
    %c0_i32 = arith.constant 0 : i32
    %c0_i32_0 = arith.constant 0 : i32
    return %arg0, %arg1, %c0_i32 : i32, i32, i32
  }
}

module attributes {stable_mosaic.version = 11 : i64} {
  func.func @_conv_kernel(%arg0: i32, %arg1: i32, %arg2: memref<1x32x128xbf16, #tpu.memory_space<vmem>>, %arg3: memref<1x128x128xbf16, #tpu.memory_space<vmem>>, %arg4: memref<1x1x128xf32, #tpu.memory_space<vmem>>, %arg5: memref<1x32x128xbf16, #tpu.memory_space<vmem>>) attributes {dimension_semantics = [#tpu.dimension_semantics<parallel>, #tpu.dimension_semantics<parallel>], iteration_bounds = array<i64: 3, 1>, scalar_prefetch = 0 : i64, scratch_operands = 0 : i64, tpu.core_type = #tpu.core_type<tc>, window_params = [{transform_indices = @transform_0, window_bounds = array<i64: 1, 32, 128>}, {transform_indices = @transform_1, window_bounds = array<i64: 1, 128, 128>}, {transform_indices = @transform_2, window_bounds = array<i64: 1, 1, 128>}, {transform_indices = @transform_3, window_bounds = array<i64: 1, 32, 128>}]} {
    %c0 = arith.constant 0 : index
    %c0_0 = arith.constant 0 : index
    %c0_1 = arith.constant 0 : index
    %0 = vector.load %arg2[%c0, %c0_0, %c0_1] : memref<1x32x128xbf16, #tpu.memory_space<vmem>>, vector<1x32x128xbf16>
    %1 = vector.shape_cast %0 : vector<1x32x128xbf16> to vector<32x128xbf16>
    %c0_2 = arith.constant 0 : index
    %c0_3 = arith.constant 0 : index
    %c0_4 = arith.constant 0 : index
    %2 = vector.load %arg3[%c0_2, %c0_3, %c0_4] : memref<1x128x128xbf16, #tpu.memory_space<vmem>>, vector<1x128x128xbf16>
    %3 = vector.shape_cast %2 : vector<1x128x128xbf16> to vector<128x128xbf16>
    %cst = arith.constant dense<0.000000e+00> : vector<32x128xf32>
    %4 = tpu.matmul %1, %3, %cst {dimension_numbers = #tpu.dot_dimension_numbers<[1], [0], [0], [1], [0, 0, 1, 1], [], []>} : vector<32x128xbf16>, vector<128x128xbf16>, vector<32x128xf32> -> vector<32x128xf32>
    %c0_5 = arith.constant 0 : index
    %c0_6 = arith.constant 0 : index
    %c0_7 = arith.constant 0 : index
    %5 = vector.load %arg4[%c0_5, %c0_6, %c0_7] : memref<1x1x128xf32, #tpu.memory_space<vmem>>, vector<1x1x128xf32>
    %6 = vector.shape_cast %5 : vector<1x1x128xf32> to vector<1x128xf32>
    %7 = vector.broadcast %6 : vector<1x128xf32> to vector<32x128xf32>
    %8 = arith.addf %4, %7 : vector<32x128xf32>
    %cst_8 = arith.constant 0.00999999977 : f32
    %9 = vector.broadcast %cst_8 : f32 to vector<32x128xf32>
    %10 = arith.mulf %9, %8 : vector<32x128xf32>
    %11 = arith.maximumf %8, %10 : vector<32x128xf32>
    %12 = arith.truncf %11 : vector<32x128xf32> to vector<32x128xbf16>
    %c0_9 = arith.constant 0 : index
    %c0_10 = arith.constant 0 : index
    %c0_11 = arith.constant 0 : index
    %13 = vector.load %arg5[%c0_9, %c0_10, %c0_11] : memref<1x32x128xbf16, #tpu.memory_space<vmem>>, vector<1x32x128xbf16>
    %14 = vector.shape_cast %13 : vector<1x32x128xbf16> to vector<32x128xbf16>
    %15 = vector.shape_cast %12 : vector<32x128xbf16> to vector<1x32x128xbf16>
    tpu.vector_store %arg5[%c0_9, %c0_10, %c0_11], %15 {strides = array<i32>} : memref<1x32x128xbf16, #tpu.memory_space<vmem>>, vector<1x32x128xbf16>,
    return
  }
  func.func @transform_0(%arg0: i32, %arg1: i32) -> (i32, i32, i32) {
    %c0_i32 = arith.constant 0 : i32
    %c0_i32_0 = arith.constant 0 : i32
    return %arg0, %arg1, %c0_i32 : i32, i32, i32
  }
  func.func @transform_1(%arg0: i32, %arg1: i32) -> (i32, i32, i32) {
    %c0_i32 = arith.constant 0 : i32
    %c0_i32_0 = arith.constant 0 : i32
    %c0_i32_1 = arith.constant 0 : i32
    return %arg0, %c0_i32, %c0_i32_0 : i32, i32, i32
  }
  func.func @transform_2(%arg0: i32, %arg1: i32) -> (i32, i32, i32) {
    %c0_i32 = arith.constant 0 : i32
    %c0_i32_0 = arith.constant 0 : i32
    %c0_i32_1 = arith.constant 0 : i32
    return %arg0, %c0_i32, %c0_i32_0 : i32, i32, i32
  }
  func.func @transform_3(%arg0: i32, %arg1: i32) -> (i32, i32, i32) {
    %c0_i32 = arith.constant 0 : i32
    %c0_i32_0 = arith.constant 0 : i32
    return %arg0, %arg1, %c0_i32 : i32, i32, i32
  }
}

module attributes {stable_mosaic.version = 11 : i64} {
  func.func @_residual_kernel(%arg0: i32, %arg1: memref<3x32x128xbf16, #tpu.memory_space<vmem>>, %arg2: memref<3x128x128xbf16, #tpu.memory_space<vmem>>, %arg3: memref<32x128xbf16, #tpu.memory_space<vmem>>, %arg4: memref<1x128xf32, #tpu.memory_space<vmem>>, %arg5: memref<1x128xf32, #tpu.memory_space<vmem>>, %arg6: memref<32x128xbf16, #tpu.memory_space<vmem>>) attributes {dimension_semantics = [#tpu.dimension_semantics<parallel>], iteration_bounds = array<i64: 1>, scalar_prefetch = 0 : i64, scratch_operands = 0 : i64, tpu.core_type = #tpu.core_type<tc>, window_params = [{transform_indices = @transform_0, window_bounds = array<i64: 3, 32, 128>}, {pipeline_mode = #tpu.pipeline_mode<synchronous>, transform_indices = @transform_1, window_bounds = array<i64: 3, 128, 128>}, {transform_indices = @transform_2, window_bounds = array<i64: 32, 128>}, {pipeline_mode = #tpu.pipeline_mode<synchronous>, transform_indices = @transform_3, window_bounds = array<i64: 1, 128>}, {pipeline_mode = #tpu.pipeline_mode<synchronous>, transform_indices = @transform_4, window_bounds = array<i64: 1, 128>}, {transform_indices = @transform_5, window_bounds = array<i64: 32, 128>}]} {
    %c0 = arith.constant 0 : index
    %c0_0 = arith.constant 0 : index
    %c0_1 = arith.constant 0 : index
    %0 = vector.load %arg1[%c0, %c0_0, %c0_1] : memref<3x32x128xbf16, #tpu.memory_space<vmem>>, vector<1x32x128xbf16>
    %1 = vector.shape_cast %0 : vector<1x32x128xbf16> to vector<32x128xbf16>
    %c0_2 = arith.constant 0 : index
    %c0_3 = arith.constant 0 : index
    %c0_4 = arith.constant 0 : index
    %2 = vector.load %arg2[%c0_2, %c0_3, %c0_4] : memref<3x128x128xbf16, #tpu.memory_space<vmem>>, vector<1x128x128xbf16>
    %3 = vector.shape_cast %2 : vector<1x128x128xbf16> to vector<128x128xbf16>
    %cst = arith.constant dense<0.000000e+00> : vector<32x128xf32>
    %4 = tpu.matmul %1, %3, %cst {dimension_numbers = #tpu.dot_dimension_numbers<[1], [0], [0], [1], [0, 0, 1, 1], [], []>} : vector<32x128xbf16>, vector<128x128xbf16>, vector<32x128xf32> -> vector<32x128xf32>
    %c1 = arith.constant 1 : index
    %c0_5 = arith.constant 0 : index
    %c0_6 = arith.constant 0 : index
    %5 = vector.load %arg1[%c1, %c0_5, %c0_6] : memref<3x32x128xbf16, #tpu.memory_space<vmem>>, vector<1x32x128xbf16>
    %6 = vector.shape_cast %5 : vector<1x32x128xbf16> to vector<32x128xbf16>
    %c1_7 = arith.constant 1 : index
    %c0_8 = arith.constant 0 : index
    %c0_9 = arith.constant 0 : index
    %7 = vector.load %arg2[%c1_7, %c0_8, %c0_9] : memref<3x128x128xbf16, #tpu.memory_space<vmem>>, vector<1x128x128xbf16>
    %8 = vector.shape_cast %7 : vector<1x128x128xbf16> to vector<128x128xbf16>
    %cst_10 = arith.constant dense<0.000000e+00> : vector<32x128xf32>
    %9 = tpu.matmul %6, %8, %cst_10 {dimension_numbers = #tpu.dot_dimension_numbers<[1], [0], [0], [1], [0, 0, 1, 1], [], []>} : vector<32x128xbf16>, vector<128x128xbf16>, vector<32x128xf32> -> vector<32x128xf32>
    %10 = arith.addf %4, %9 : vector<32x128xf32>
    %c2 = arith.constant 2 : index
    %c0_11 = arith.constant 0 : index
    %c0_12 = arith.constant 0 : index
    %11 = vector.load %arg1[%c2, %c0_11, %c0_12] : memref<3x32x128xbf16, #tpu.memory_space<vmem>>, vector<1x32x128xbf16>
    %12 = vector.shape_cast %11 : vector<1x32x128xbf16> to vector<32x128xbf16>
    %c2_13 = arith.constant 2 : index
    %c0_14 = arith.constant 0 : index
    %c0_15 = arith.constant 0 : index
    %13 = vector.load %arg2[%c2_13, %c0_14, %c0_15] : memref<3x128x128xbf16, #tpu.memory_space<vmem>>, vector<1x128x128xbf16>
    %14 = vector.shape_cast %13 : vector<1x128x128xbf16> to vector<128x128xbf16>
    %cst_16 = arith.constant dense<0.000000e+00> : vector<32x128xf32>
    %15 = tpu.matmul %12, %14, %cst_16 {dimension_numbers = #tpu.dot_dimension_numbers<[1], [0], [0], [1], [0, 0, 1, 1], [], []>} : vector<32x128xbf16>, vector<128x128xbf16>, vector<32x128xf32> -> vector<32x128xf32>
    %16 = arith.addf %10, %15 : vector<32x128xf32>
    %c0_17 = arith.constant 0 : index
    %c0_18 = arith.constant 0 : index
    %17 = vector.load %arg3[%c0_17, %c0_18] : memref<32x128xbf16, #tpu.memory_space<vmem>>, vector<32x128xbf16>
    %18 = arith.extf %17 : vector<32x128xbf16> to vector<32x128xf32>
    %19 = arith.addf %16, %18 : vector<32x128xf32>
    %c0_19 = arith.constant 0 : index
    %c0_20 = arith.constant 0 : index
    %20 = vector.load %arg4[%c0_19, %c0_20] : memref<1x128xf32, #tpu.memory_space<vmem>>, vector<1x128xf32>
    %21 = vector.broadcast %20 : vector<1x128xf32> to vector<32x128xf32>
    %22 = arith.mulf %19, %21 : vector<32x128xf32>
    %c0_21 = arith.constant 0 : index
    %c0_22 = arith.constant 0 : index
    %23 = vector.load %arg5[%c0_21, %c0_22] : memref<1x128xf32, #tpu.memory_space<vmem>>, vector<1x128xf32>
    %24 = vector.broadcast %23 : vector<1x128xf32> to vector<32x128xf32>
    %25 = arith.addf %22, %24 : vector<32x128xf32>
    %cst_23 = arith.constant 0.000000e+00 : f32
    %26 = vector.broadcast %cst_23 : f32 to vector<32x128xf32>
    %27 = arith.maximumf %25, %26 : vector<32x128xf32>
    %28 = arith.truncf %27 : vector<32x128xf32> to vector<32x128xbf16>
    %c0_24 = arith.constant 0 : index
    %c0_25 = arith.constant 0 : index
    %29 = vector.load %arg6[%c0_24, %c0_25] : memref<32x128xbf16, #tpu.memory_space<vmem>>, vector<32x128xbf16>
    tpu.vector_store %arg6[%c0_24, %c0_25], %28 {strides = array<i32>} : memref<32x128xbf16, #tpu.memory_space<vmem>>, vector<32x128xbf16>,
    return
  }
  func.func @transform_0(%arg0: i32) -> (i32, i32, i32) {
    %c0_i32 = arith.constant 0 : i32
    %c0_i32_0 = arith.constant 0 : i32
    %c0_i32_1 = arith.constant 0 : i32
    return %c0_i32, %arg0, %c0_i32_0 : i32, i32, i32
  }
  func.func @transform_1(%arg0: i32) -> (i32, i32, i32) {
    %c0_i32 = arith.constant 0 : i32
    %c0_i32_0 = arith.constant 0 : i32
    %c0_i32_1 = arith.constant 0 : i32
    %c0_i32_2 = arith.constant 0 : i32
    return %c0_i32, %c0_i32_0, %c0_i32_1 : i32, i32, i32
  }
  func.func @transform_2(%arg0: i32) -> (i32, i32) {
    %c0_i32 = arith.constant 0 : i32
    %c0_i32_0 = arith.constant 0 : i32
    return %arg0, %c0_i32 : i32, i32
  }
  func.func @transform_3(%arg0: i32) -> (i32, i32) {
    %c0_i32 = arith.constant 0 : i32
    %c0_i32_0 = arith.constant 0 : i32
    %c0_i32_1 = arith.constant 0 : i32
    return %c0_i32, %c0_i32_0 : i32, i32
  }
  func.func @transform_4(%arg0: i32) -> (i32, i32) {
    %c0_i32 = arith.constant 0 : i32
    %c0_i32_0 = arith.constant 0 : i32
    %c0_i32_1 = arith.constant 0 : i32
    return %c0_i32, %c0_i32_0 : i32, i32
  }
  func.func @transform_5(%arg0: i32) -> (i32, i32) {
    %c0_i32 = arith.constant 0 : i32
    %c0_i32_0 = arith.constant 0 : i32
    return %arg0, %c0_i32 : i32, i32
  }
}

module attributes {stable_mosaic.version = 11 : i64} {
  func.func @_conv_kernel(%arg0: i32, %arg1: i32, %arg2: memref<1x32x128xbf16, #tpu.memory_space<vmem>>, %arg3: memref<1x128x128xbf16, #tpu.memory_space<vmem>>, %arg4: memref<1x1x128xf32, #tpu.memory_space<vmem>>, %arg5: memref<1x32x128xbf16, #tpu.memory_space<vmem>>) attributes {dimension_semantics = [#tpu.dimension_semantics<parallel>, #tpu.dimension_semantics<parallel>], iteration_bounds = array<i64: 1, 1>, scalar_prefetch = 0 : i64, scratch_operands = 0 : i64, tpu.core_type = #tpu.core_type<tc>, window_params = [{transform_indices = @transform_0, window_bounds = array<i64: 1, 32, 128>}, {transform_indices = @transform_1, window_bounds = array<i64: 1, 128, 128>}, {transform_indices = @transform_2, window_bounds = array<i64: 1, 1, 128>}, {transform_indices = @transform_3, window_bounds = array<i64: 1, 32, 128>}]} {
    %c0 = arith.constant 0 : index
    %c0_0 = arith.constant 0 : index
    %c0_1 = arith.constant 0 : index
    %0 = vector.load %arg2[%c0, %c0_0, %c0_1] : memref<1x32x128xbf16, #tpu.memory_space<vmem>>, vector<1x32x128xbf16>
    %1 = vector.shape_cast %0 : vector<1x32x128xbf16> to vector<32x128xbf16>
    %c0_2 = arith.constant 0 : index
    %c0_3 = arith.constant 0 : index
    %c0_4 = arith.constant 0 : index
    %2 = vector.load %arg3[%c0_2, %c0_3, %c0_4] : memref<1x128x128xbf16, #tpu.memory_space<vmem>>, vector<1x128x128xbf16>
    %3 = vector.shape_cast %2 : vector<1x128x128xbf16> to vector<128x128xbf16>
    %cst = arith.constant dense<0.000000e+00> : vector<32x128xf32>
    %4 = tpu.matmul %1, %3, %cst {dimension_numbers = #tpu.dot_dimension_numbers<[1], [0], [0], [1], [0, 0, 1, 1], [], []>} : vector<32x128xbf16>, vector<128x128xbf16>, vector<32x128xf32> -> vector<32x128xf32>
    %c0_5 = arith.constant 0 : index
    %c0_6 = arith.constant 0 : index
    %c0_7 = arith.constant 0 : index
    %5 = vector.load %arg4[%c0_5, %c0_6, %c0_7] : memref<1x1x128xf32, #tpu.memory_space<vmem>>, vector<1x1x128xf32>
    %6 = vector.shape_cast %5 : vector<1x1x128xf32> to vector<1x128xf32>
    %7 = vector.broadcast %6 : vector<1x128xf32> to vector<32x128xf32>
    %8 = arith.addf %4, %7 : vector<32x128xf32>
    %cst_8 = arith.constant 0.00999999977 : f32
    %9 = vector.broadcast %cst_8 : f32 to vector<32x128xf32>
    %10 = arith.mulf %9, %8 : vector<32x128xf32>
    %11 = arith.maximumf %8, %10 : vector<32x128xf32>
    %12 = arith.truncf %11 : vector<32x128xf32> to vector<32x128xbf16>
    %c0_9 = arith.constant 0 : index
    %c0_10 = arith.constant 0 : index
    %c0_11 = arith.constant 0 : index
    %13 = vector.load %arg5[%c0_9, %c0_10, %c0_11] : memref<1x32x128xbf16, #tpu.memory_space<vmem>>, vector<1x32x128xbf16>
    %14 = vector.shape_cast %13 : vector<1x32x128xbf16> to vector<32x128xbf16>
    %15 = vector.shape_cast %12 : vector<32x128xbf16> to vector<1x32x128xbf16>
    tpu.vector_store %arg5[%c0_9, %c0_10, %c0_11], %15 {strides = array<i32>} : memref<1x32x128xbf16, #tpu.memory_space<vmem>>, vector<1x32x128xbf16>,
    return
  }
  func.func @transform_0(%arg0: i32, %arg1: i32) -> (i32, i32, i32) {
    %c0_i32 = arith.constant 0 : i32
    %c0_i32_0 = arith.constant 0 : i32
    return %arg0, %arg1, %c0_i32 : i32, i32, i32
  }
  func.func @transform_1(%arg0: i32, %arg1: i32) -> (i32, i32, i32) {
    %c0_i32 = arith.constant 0 : i32
    %c0_i32_0 = arith.constant 0 : i32
    %c0_i32_1 = arith.constant 0 : i32
    return %arg0, %c0_i32, %c0_i32_0 : i32, i32, i32
  }
  func.func @transform_2(%arg0: i32, %arg1: i32) -> (i32, i32, i32) {
    %c0_i32 = arith.constant 0 : i32
    %c0_i32_0 = arith.constant 0 : i32
    %c0_i32_1 = arith.constant 0 : i32
    return %arg0, %c0_i32, %c0_i32_0 : i32, i32, i32
  }
  func.func @transform_3(%arg0: i32, %arg1: i32) -> (i32, i32, i32) {
    %c0_i32 = arith.constant 0 : i32
    %c0_i32_0 = arith.constant 0 : i32
    return %arg0, %arg1, %c0_i32 : i32, i32, i32
  }
}

module attributes {stable_mosaic.version = 11 : i64} {
  func.func @_conv_kernel(%arg0: i32, %arg1: i32, %arg2: memref<1x8x128xbf16, #tpu.memory_space<vmem>>, %arg3: memref<1x128x128xbf16, #tpu.memory_space<vmem>>, %arg4: memref<1x1x128xf32, #tpu.memory_space<vmem>>, %arg5: memref<1x8x128xbf16, #tpu.memory_space<vmem>>) attributes {dimension_semantics = [#tpu.dimension_semantics<parallel>, #tpu.dimension_semantics<parallel>], iteration_bounds = array<i64: 3, 1>, scalar_prefetch = 0 : i64, scratch_operands = 0 : i64, tpu.core_type = #tpu.core_type<tc>, window_params = [{transform_indices = @transform_0, window_bounds = array<i64: 1, 8, 128>}, {transform_indices = @transform_1, window_bounds = array<i64: 1, 128, 128>}, {transform_indices = @transform_2, window_bounds = array<i64: 1, 1, 128>}, {transform_indices = @transform_3, window_bounds = array<i64: 1, 8, 128>}]} {
    %c0 = arith.constant 0 : index
    %c0_0 = arith.constant 0 : index
    %c0_1 = arith.constant 0 : index
    %0 = vector.load %arg2[%c0, %c0_0, %c0_1] : memref<1x8x128xbf16, #tpu.memory_space<vmem>>, vector<1x8x128xbf16>
    %1 = vector.shape_cast %0 : vector<1x8x128xbf16> to vector<8x128xbf16>
    %c0_2 = arith.constant 0 : index
    %c0_3 = arith.constant 0 : index
    %c0_4 = arith.constant 0 : index
    %2 = vector.load %arg3[%c0_2, %c0_3, %c0_4] : memref<1x128x128xbf16, #tpu.memory_space<vmem>>, vector<1x128x128xbf16>
    %3 = vector.shape_cast %2 : vector<1x128x128xbf16> to vector<128x128xbf16>
    %cst = arith.constant dense<0.000000e+00> : vector<8x128xf32>
    %4 = tpu.matmul %1, %3, %cst {dimension_numbers = #tpu.dot_dimension_numbers<[1], [0], [0], [1], [0, 0, 1, 1], [], []>} : vector<8x128xbf16>, vector<128x128xbf16>, vector<8x128xf32> -> vector<8x128xf32>
    %c0_5 = arith.constant 0 : index
    %c0_6 = arith.constant 0 : index
    %c0_7 = arith.constant 0 : index
    %5 = vector.load %arg4[%c0_5, %c0_6, %c0_7] : memref<1x1x128xf32, #tpu.memory_space<vmem>>, vector<1x1x128xf32>
    %6 = vector.shape_cast %5 : vector<1x1x128xf32> to vector<1x128xf32>
    %7 = vector.broadcast %6 : vector<1x128xf32> to vector<8x128xf32>
    %8 = arith.addf %4, %7 : vector<8x128xf32>
    %cst_8 = arith.constant 0.00999999977 : f32
    %9 = vector.broadcast %cst_8 : f32 to vector<8x128xf32>
    %10 = arith.mulf %9, %8 : vector<8x128xf32>
    %11 = arith.maximumf %8, %10 : vector<8x128xf32>
    %12 = arith.truncf %11 : vector<8x128xf32> to vector<8x128xbf16>
    %c0_9 = arith.constant 0 : index
    %c0_10 = arith.constant 0 : index
    %c0_11 = arith.constant 0 : index
    %13 = vector.load %arg5[%c0_9, %c0_10, %c0_11] : memref<1x8x128xbf16, #tpu.memory_space<vmem>>, vector<1x8x128xbf16>
    %14 = vector.shape_cast %13 : vector<1x8x128xbf16> to vector<8x128xbf16>
    %15 = vector.shape_cast %12 : vector<8x128xbf16> to vector<1x8x128xbf16>
    tpu.vector_store %arg5[%c0_9, %c0_10, %c0_11], %15 {strides = array<i32>} : memref<1x8x128xbf16, #tpu.memory_space<vmem>>, vector<1x8x128xbf16>,
    return
  }
  func.func @transform_0(%arg0: i32, %arg1: i32) -> (i32, i32, i32) {
    %c0_i32 = arith.constant 0 : i32
    %c0_i32_0 = arith.constant 0 : i32
    return %arg0, %arg1, %c0_i32 : i32, i32, i32
  }
  func.func @transform_1(%arg0: i32, %arg1: i32) -> (i32, i32, i32) {
    %c0_i32 = arith.constant 0 : i32
    %c0_i32_0 = arith.constant 0 : i32
    %c0_i32_1 = arith.constant 0 : i32
    return %arg0, %c0_i32, %c0_i32_0 : i32, i32, i32
  }
  func.func @transform_2(%arg0: i32, %arg1: i32) -> (i32, i32, i32) {
    %c0_i32 = arith.constant 0 : i32
    %c0_i32_0 = arith.constant 0 : i32
    %c0_i32_1 = arith.constant 0 : i32
    return %arg0, %c0_i32, %c0_i32_0 : i32, i32, i32
  }
  func.func @transform_3(%arg0: i32, %arg1: i32) -> (i32, i32, i32) {
    %c0_i32 = arith.constant 0 : i32
    %c0_i32_0 = arith.constant 0 : i32
    return %arg0, %arg1, %c0_i32 : i32, i32, i32
  }
}

module attributes {stable_mosaic.version = 11 : i64} {
  func.func @_residual_kernel(%arg0: i32, %arg1: memref<3x8x128xbf16, #tpu.memory_space<vmem>>, %arg2: memref<3x128x128xbf16, #tpu.memory_space<vmem>>, %arg3: memref<8x128xbf16, #tpu.memory_space<vmem>>, %arg4: memref<1x128xf32, #tpu.memory_space<vmem>>, %arg5: memref<1x128xf32, #tpu.memory_space<vmem>>, %arg6: memref<8x128xbf16, #tpu.memory_space<vmem>>) attributes {dimension_semantics = [#tpu.dimension_semantics<parallel>], iteration_bounds = array<i64: 1>, scalar_prefetch = 0 : i64, scratch_operands = 0 : i64, tpu.core_type = #tpu.core_type<tc>, window_params = [{transform_indices = @transform_0, window_bounds = array<i64: 3, 8, 128>}, {pipeline_mode = #tpu.pipeline_mode<synchronous>, transform_indices = @transform_1, window_bounds = array<i64: 3, 128, 128>}, {transform_indices = @transform_2, window_bounds = array<i64: 8, 128>}, {pipeline_mode = #tpu.pipeline_mode<synchronous>, transform_indices = @transform_3, window_bounds = array<i64: 1, 128>}, {pipeline_mode = #tpu.pipeline_mode<synchronous>, transform_indices = @transform_4, window_bounds = array<i64: 1, 128>}, {transform_indices = @transform_5, window_bounds = array<i64: 8, 128>}]} {
    %c0 = arith.constant 0 : index
    %c0_0 = arith.constant 0 : index
    %c0_1 = arith.constant 0 : index
    %0 = vector.load %arg1[%c0, %c0_0, %c0_1] : memref<3x8x128xbf16, #tpu.memory_space<vmem>>, vector<1x8x128xbf16>
    %1 = vector.shape_cast %0 : vector<1x8x128xbf16> to vector<8x128xbf16>
    %c0_2 = arith.constant 0 : index
    %c0_3 = arith.constant 0 : index
    %c0_4 = arith.constant 0 : index
    %2 = vector.load %arg2[%c0_2, %c0_3, %c0_4] : memref<3x128x128xbf16, #tpu.memory_space<vmem>>, vector<1x128x128xbf16>
    %3 = vector.shape_cast %2 : vector<1x128x128xbf16> to vector<128x128xbf16>
    %cst = arith.constant dense<0.000000e+00> : vector<8x128xf32>
    %4 = tpu.matmul %1, %3, %cst {dimension_numbers = #tpu.dot_dimension_numbers<[1], [0], [0], [1], [0, 0, 1, 1], [], []>} : vector<8x128xbf16>, vector<128x128xbf16>, vector<8x128xf32> -> vector<8x128xf32>
    %c1 = arith.constant 1 : index
    %c0_5 = arith.constant 0 : index
    %c0_6 = arith.constant 0 : index
    %5 = vector.load %arg1[%c1, %c0_5, %c0_6] : memref<3x8x128xbf16, #tpu.memory_space<vmem>>, vector<1x8x128xbf16>
    %6 = vector.shape_cast %5 : vector<1x8x128xbf16> to vector<8x128xbf16>
    %c1_7 = arith.constant 1 : index
    %c0_8 = arith.constant 0 : index
    %c0_9 = arith.constant 0 : index
    %7 = vector.load %arg2[%c1_7, %c0_8, %c0_9] : memref<3x128x128xbf16, #tpu.memory_space<vmem>>, vector<1x128x128xbf16>
    %8 = vector.shape_cast %7 : vector<1x128x128xbf16> to vector<128x128xbf16>
    %cst_10 = arith.constant dense<0.000000e+00> : vector<8x128xf32>
    %9 = tpu.matmul %6, %8, %cst_10 {dimension_numbers = #tpu.dot_dimension_numbers<[1], [0], [0], [1], [0, 0, 1, 1], [], []>} : vector<8x128xbf16>, vector<128x128xbf16>, vector<8x128xf32> -> vector<8x128xf32>
    %10 = arith.addf %4, %9 : vector<8x128xf32>
    %c2 = arith.constant 2 : index
    %c0_11 = arith.constant 0 : index
    %c0_12 = arith.constant 0 : index
    %11 = vector.load %arg1[%c2, %c0_11, %c0_12] : memref<3x8x128xbf16, #tpu.memory_space<vmem>>, vector<1x8x128xbf16>
    %12 = vector.shape_cast %11 : vector<1x8x128xbf16> to vector<8x128xbf16>
    %c2_13 = arith.constant 2 : index
    %c0_14 = arith.constant 0 : index
    %c0_15 = arith.constant 0 : index
    %13 = vector.load %arg2[%c2_13, %c0_14, %c0_15] : memref<3x128x128xbf16, #tpu.memory_space<vmem>>, vector<1x128x128xbf16>
    %14 = vector.shape_cast %13 : vector<1x128x128xbf16> to vector<128x128xbf16>
    %cst_16 = arith.constant dense<0.000000e+00> : vector<8x128xf32>
    %15 = tpu.matmul %12, %14, %cst_16 {dimension_numbers = #tpu.dot_dimension_numbers<[1], [0], [0], [1], [0, 0, 1, 1], [], []>} : vector<8x128xbf16>, vector<128x128xbf16>, vector<8x128xf32> -> vector<8x128xf32>
    %16 = arith.addf %10, %15 : vector<8x128xf32>
    %c0_17 = arith.constant 0 : index
    %c0_18 = arith.constant 0 : index
    %17 = vector.load %arg3[%c0_17, %c0_18] : memref<8x128xbf16, #tpu.memory_space<vmem>>, vector<8x128xbf16>
    %18 = arith.extf %17 : vector<8x128xbf16> to vector<8x128xf32>
    %19 = arith.addf %16, %18 : vector<8x128xf32>
    %c0_19 = arith.constant 0 : index
    %c0_20 = arith.constant 0 : index
    %20 = vector.load %arg4[%c0_19, %c0_20] : memref<1x128xf32, #tpu.memory_space<vmem>>, vector<1x128xf32>
    %21 = vector.broadcast %20 : vector<1x128xf32> to vector<8x128xf32>
    %22 = arith.mulf %19, %21 : vector<8x128xf32>
    %c0_21 = arith.constant 0 : index
    %c0_22 = arith.constant 0 : index
    %23 = vector.load %arg5[%c0_21, %c0_22] : memref<1x128xf32, #tpu.memory_space<vmem>>, vector<1x128xf32>
    %24 = vector.broadcast %23 : vector<1x128xf32> to vector<8x128xf32>
    %25 = arith.addf %22, %24 : vector<8x128xf32>
    %cst_23 = arith.constant 0.000000e+00 : f32
    %26 = vector.broadcast %cst_23 : f32 to vector<8x128xf32>
    %27 = arith.maximumf %25, %26 : vector<8x128xf32>
    %28 = arith.truncf %27 : vector<8x128xf32> to vector<8x128xbf16>
    %c0_24 = arith.constant 0 : index
    %c0_25 = arith.constant 0 : index
    %29 = vector.load %arg6[%c0_24, %c0_25] : memref<8x128xbf16, #tpu.memory_space<vmem>>, vector<8x128xbf16>
    tpu.vector_store %arg6[%c0_24, %c0_25], %28 {strides = array<i32>} : memref<8x128xbf16, #tpu.memory_space<vmem>>, vector<8x128xbf16>,
    return
  }
  func.func @transform_0(%arg0: i32) -> (i32, i32, i32) {
    %c0_i32 = arith.constant 0 : i32
    %c0_i32_0 = arith.constant 0 : i32
    %c0_i32_1 = arith.constant 0 : i32
    return %c0_i32, %arg0, %c0_i32_0 : i32, i32, i32
  }
  func.func @transform_1(%arg0: i32) -> (i32, i32, i32) {
    %c0_i32 = arith.constant 0 : i32
    %c0_i32_0 = arith.constant 0 : i32
    %c0_i32_1 = arith.constant 0 : i32
    %c0_i32_2 = arith.constant 0 : i32
    return %c0_i32, %c0_i32_0, %c0_i32_1 : i32, i32, i32
  }
  func.func @transform_2(%arg0: i32) -> (i32, i32) {
    %c0_i32 = arith.constant 0 : i32
    %c0_i32_0 = arith.constant 0 : i32
    return %arg0, %c0_i32 : i32, i32
  }
  func.func @transform_3(%arg0: i32) -> (i32, i32) {
    %c0_i32 = arith.constant 0 : i32
    %c0_i32_0 = arith.constant 0 : i32
    %c0_i32_1 = arith.constant 0 : i32
    return %c0_i32, %c0_i32_0 : i32, i32
  }
  func.func @transform_4(%arg0: i32) -> (i32, i32) {
    %c0_i32 = arith.constant 0 : i32
    %c0_i32_0 = arith.constant 0 : i32
    %c0_i32_1 = arith.constant 0 : i32
    return %c0_i32, %c0_i32_0 : i32, i32
  }
  func.func @transform_5(%arg0: i32) -> (i32, i32) {
    %c0_i32 = arith.constant 0 : i32
    %c0_i32_0 = arith.constant 0 : i32
    return %arg0, %c0_i32 : i32, i32
  }
}

module attributes {stable_mosaic.version = 11 : i64} {
  func.func @_conv_kernel(%arg0: i32, %arg1: i32, %arg2: memref<1x8x128xbf16, #tpu.memory_space<vmem>>, %arg3: memref<1x128x128xbf16, #tpu.memory_space<vmem>>, %arg4: memref<1x1x128xf32, #tpu.memory_space<vmem>>, %arg5: memref<1x8x128xbf16, #tpu.memory_space<vmem>>) attributes {dimension_semantics = [#tpu.dimension_semantics<parallel>, #tpu.dimension_semantics<parallel>], iteration_bounds = array<i64: 1, 1>, scalar_prefetch = 0 : i64, scratch_operands = 0 : i64, tpu.core_type = #tpu.core_type<tc>, window_params = [{transform_indices = @transform_0, window_bounds = array<i64: 1, 8, 128>}, {transform_indices = @transform_1, window_bounds = array<i64: 1, 128, 128>}, {transform_indices = @transform_2, window_bounds = array<i64: 1, 1, 128>}, {transform_indices = @transform_3, window_bounds = array<i64: 1, 8, 128>}]} {
    %c0 = arith.constant 0 : index
    %c0_0 = arith.constant 0 : index
    %c0_1 = arith.constant 0 : index
    %0 = vector.load %arg2[%c0, %c0_0, %c0_1] : memref<1x8x128xbf16, #tpu.memory_space<vmem>>, vector<1x8x128xbf16>
    %1 = vector.shape_cast %0 : vector<1x8x128xbf16> to vector<8x128xbf16>
    %c0_2 = arith.constant 0 : index
    %c0_3 = arith.constant 0 : index
    %c0_4 = arith.constant 0 : index
    %2 = vector.load %arg3[%c0_2, %c0_3, %c0_4] : memref<1x128x128xbf16, #tpu.memory_space<vmem>>, vector<1x128x128xbf16>
    %3 = vector.shape_cast %2 : vector<1x128x128xbf16> to vector<128x128xbf16>
    %cst = arith.constant dense<0.000000e+00> : vector<8x128xf32>
    %4 = tpu.matmul %1, %3, %cst {dimension_numbers = #tpu.dot_dimension_numbers<[1], [0], [0], [1], [0, 0, 1, 1], [], []>} : vector<8x128xbf16>, vector<128x128xbf16>, vector<8x128xf32> -> vector<8x128xf32>
    %c0_5 = arith.constant 0 : index
    %c0_6 = arith.constant 0 : index
    %c0_7 = arith.constant 0 : index
    %5 = vector.load %arg4[%c0_5, %c0_6, %c0_7] : memref<1x1x128xf32, #tpu.memory_space<vmem>>, vector<1x1x128xf32>
    %6 = vector.shape_cast %5 : vector<1x1x128xf32> to vector<1x128xf32>
    %7 = vector.broadcast %6 : vector<1x128xf32> to vector<8x128xf32>
    %8 = arith.addf %4, %7 : vector<8x128xf32>
    %cst_8 = arith.constant 0.00999999977 : f32
    %9 = vector.broadcast %cst_8 : f32 to vector<8x128xf32>
    %10 = arith.mulf %9, %8 : vector<8x128xf32>
    %11 = arith.maximumf %8, %10 : vector<8x128xf32>
    %12 = arith.truncf %11 : vector<8x128xf32> to vector<8x128xbf16>
    %c0_9 = arith.constant 0 : index
    %c0_10 = arith.constant 0 : index
    %c0_11 = arith.constant 0 : index
    %13 = vector.load %arg5[%c0_9, %c0_10, %c0_11] : memref<1x8x128xbf16, #tpu.memory_space<vmem>>, vector<1x8x128xbf16>
    %14 = vector.shape_cast %13 : vector<1x8x128xbf16> to vector<8x128xbf16>
    %15 = vector.shape_cast %12 : vector<8x128xbf16> to vector<1x8x128xbf16>
    tpu.vector_store %arg5[%c0_9, %c0_10, %c0_11], %15 {strides = array<i32>} : memref<1x8x128xbf16, #tpu.memory_space<vmem>>, vector<1x8x128xbf16>,
    return
  }
  func.func @transform_0(%arg0: i32, %arg1: i32) -> (i32, i32, i32) {
    %c0_i32 = arith.constant 0 : i32
    %c0_i32_0 = arith.constant 0 : i32
    return %arg0, %arg1, %c0_i32 : i32, i32, i32
  }
  func.func @transform_1(%arg0: i32, %arg1: i32) -> (i32, i32, i32) {
    %c0_i32 = arith.constant 0 : i32
    %c0_i32_0 = arith.constant 0 : i32
    %c0_i32_1 = arith.constant 0 : i32
    return %arg0, %c0_i32, %c0_i32_0 : i32, i32, i32
  }
  func.func @transform_2(%arg0: i32, %arg1: i32) -> (i32, i32, i32) {
    %c0_i32 = arith.constant 0 : i32
    %c0_i32_0 = arith.constant 0 : i32
    %c0_i32_1 = arith.constant 0 : i32
    return %arg0, %c0_i32, %c0_i32_0 : i32, i32, i32
  }
  func.func @transform_3(%arg0: i32, %arg1: i32) -> (i32, i32, i32) {
    %c0_i32 = arith.constant 0 : i32
    %c0_i32_0 = arith.constant 0 : i32
    return %arg0, %arg1, %c0_i32 : i32, i32, i32
  }
}

</mosaic_0001>

<bundles_post_ra>
// kernel: _lambda_.13
= control target key start
LH: loop header
LB: loop body
LE: loop exit
PB: predicated region body
PF: predicated region fallthrough
CT: control target
= control target key end

     0   :  { %s1560_s12 = smov 0   ;;  %s1562_s13 = smov 0   ;;  %s1734_s0 = inlined_call_operand.vmem [shape: bf16[1,512,256], index: 0, kind: input, shape index: {}]   ;;  %s1735_s1 = inlined_call_operand.vmem [shape: bf16[1,256,128], index: 1, kind: input, shape index: {}]   ;;  %s1736_s2 = inlined_call_operand.vmem [shape: f32[1,1,128], index: 2, kind: input, shape index: {}]   ;;  %s1737_s3 = inlined_call_operand.vmem [shape: bf16[1,512,128], index: 3, kind: output, shape index: {}]  }
   0x1   :  { %s1564_s14 = smov 0  }
   0x2 LB: > { %s22_s15 = sadd.s32 1, %s1534_s13  ;;  %p1083_p0 = scmp.ge.s32.totalorder %s1538_s14, 1  ;;  %s1538_s14 = sphi %s1564_s14, %s13_s14   ;;  %s1534_s13 = sphi %s1562_s13, %s1739_s13   ;;  %s1530_s12 = sphi %s1560_s12, %s1738_s12  }
   0x3   : > { %p23_p1 = scmp.ge.s32.totalorder %s22_s15, 2  ;;  %p177_p2 = scmp.lt.s32.totalorder %s1538_s14, 3 }
   0x5   : > { %s1741_s15 = smov (%p23_p1, %s22_s15), 0  ;;  %p178_p3 = pnand %p1083_p0, %p177_p2 }
   0x6   : > { %v1452_v0 = vld [vmem:[%s1735_s1 + $0x40] sm:$0xff] (!%p178_p3)   ;;  %s1084_s18 = sshll.u32 (!%p178_p3), %s1530_s12, 5  ;;  %v1454_v2 = vld [vmem:[%s1735_s1 + $0x48] sm:$0xff] (!%p178_p3)   ;;  %v1456_v4 = vld [vmem:[%s1735_s1 + $0x50] sm:$0xff] (!%p178_p3)  }
   0x7   : > { %181 = sbr.rel (%p178_p3) target bundleno = 322 (0x142), region = 32  ;;  %v1453_v1 = vld [vmem:[%s1735_s1] sm:$0xff] (!%p178_p3)   ;;  %1300 = vmatprep.subr.bf16.mxu0 (!%p178_p3), %v1452_v0  ;;  %1412 = vmatprep.subr.bf16.mxu1 (!%p178_p3), %v1452_v0  ;;  %v1455_v3 = vld [vmem:[%s1735_s1 + $0x8] sm:$0xff] (!%p178_p3)   ;;  %p221_p4 = scmp.lt.s32.totalorder (!%p178_p3), %s1084_s18, 63  ;;  %v1457_v5 = vld [vmem:[%s1735_s1 + $0x10] sm:$0xff] (!%p178_p3)  }
   0x8   : > { %1301 = vmatpush3.bf16.msra.mxu0 (!%p178_p3), %v1453_v1  ;;  %1420 = vmatpush3.bf16.msra.mxu1 (!%p178_p3), %v1453_v1  ;;  %v1458_v6 = vld [vmem:[%s1735_s1 + $0x58] sm:$0xff] (!%p178_p3)   ;;  %v1460_v8 = vld [vmem:[%s1735_s1 + $0x60] sm:$0xff] (!%p178_p3)   ;;  %v1462_v10 = vld [vmem:[%s1735_s1 + $0x68] sm:$0xff] (!%p178_p3)  }
   0x9   : > { %1302 = vmatprep.subr.bf16.mxu0 (!%p178_p3), %v1454_v2  ;;  %1413 = vmatprep.subr.bf16.mxu1 (!%p178_p3), %v1454_v2  ;;  %v1459_v7 = vld [vmem:[%s1735_s1 + $0x18] sm:$0xff] (!%p178_p3)   ;;  %v1461_v9 = vld [vmem:[%s1735_s1 + $0x20] sm:$0xff] (!%p178_p3)   ;;  %v1463_v13 = vld [vmem:[%s1735_s1 + $0x28] sm:$0xff] (!%p178_p3)  }
   0xa   : > { %v1464_v14 = vld [vmem:[%s1735_s1 + $0x70] sm:$0xff] (!%p178_p3)   ;;  %v1466_v16 = vld [vmem:[%s1735_s1 + $0x78] sm:$0xff] (!%p178_p3)   ;;  %v1669_v50 = vld [vmem:[%s1736_s2] ss:$0 sm:$0xff] (!%p178_p3) }
   0xb   : > { %v1465_v15 = vld [vmem:[%s1735_s1 + $0x30] sm:$0xff] (!%p178_p3)   ;;  %v1467_v17 = vld [vmem:[%s1735_s1 + $0x38] sm:$0xff] (!%p178_p3)  }
   0xc   : > { %1303 = vmatpush3.bf16.msra.mxu0 (!%p178_p3), %v1455_v3  ;;  %1421 = vmatpush3.bf16.msra.mxu1 (!%p178_p3), %v1455_v3 }
   0xd   : > { %1304 = vmatprep.subr.bf16.mxu0 (!%p178_p3), %v1456_v4  ;;  %1414 = vmatprep.subr.bf16.mxu1 (!%p178_p3), %v1456_v4 }
   0xe   : > { %s1743_s18 = smov (!%p221_p4, %s1084_s18), 63 }
   0xf   : > { %s1172_s6 = sshll.u32 %s1743_s18, 3  ;;  %s1088_s5 = sshll.u32 %s1743_s18, 2 }
  0x10   : > { %1305 = vmatpush3.bf16.msra.mxu0 %v1457_v5  ;;  %1422 = vmatpush3.bf16.msra.mxu1 %v1457_v5  ;;  %s1611_s11 = scalar_lea.vmem %s1734_s0, %s1172_s6  ;;  %s1679_s8 = scalar_lea.vmem %s1737_s3, %s1088_s5 }
  0x11   : > { %1306 = vmatprep.subr.bf16.mxu0 %v1458_v6  ;;  %1415 = vmatprep.subr.bf16.mxu1 %v1458_v6  ;;  %v1470_v11 = vld [vmem:[%s1611_s11 + $0x4] ss:$8 sps:$4 sm:$0xff]   ;;  %v1468_v18 = vld [vmem:[%s1611_s11] ss:$8 sps:$4 sm:$0xff]   ;;  %v1474_v20 = vld [vmem:[%s1611_s11 + $0x14] ss:$8 sps:$4 sm:$0xff]  }
  0x12   : > { %v1473_v12 = vld [vmem:[%s1611_s11 + $0x84] ss:$8 sps:$4 sm:$0xff]   ;;  %607 = vmatprep.mubr.bf16.mxu0 %v1470_v11  ;;  %v1471_v19 = vld [vmem:[%s1611_s11 + $0x80] ss:$8 sps:$4 sm:$0xff]   ;;  %v1476_v21 = vld [vmem:[%s1611_s11 + $0x94] ss:$8 sps:$4 sm:$0xff]  }
  0x13   : > { %671 = vmatprep.mubr.bf16.mxu1 %v1473_v12  ;;  %v1478_v22 = vld [vmem:[%s1611_s11 + $0x10] ss:$8 sps:$4 sm:$0xff]   ;;  %v1480_v24 = vld [vmem:[%s1611_s11 + $0x24] ss:$8 sps:$4 sm:$0xff]   ;;  %v1484_v26 = vld [vmem:[%s1611_s11 + $0x20] ss:$8 sps:$4 sm:$0xff]  }
  0x14   : > { %1307 = vmatpush3.bf16.msra.mxu0 %v1459_v7  ;;  %1423 = vmatpush3.bf16.msra.mxu1 %v1459_v7  ;;  %v1479_v23 = vld [vmem:[%s1611_s11 + $0x90] ss:$8 sps:$4 sm:$0xff]   ;;  %v1482_v25 = vld [vmem:[%s1611_s11 + $0xa4] ss:$8 sps:$4 sm:$0xff]   ;;  %v1485_v27 = vld [vmem:[%s1611_s11 + $0xa0] ss:$8 sps:$4 sm:$0xff]  }
  0x15   : > { %1308 = vmatprep.subr.bf16.mxu0 %v1460_v8  ;;  %1416 = vmatprep.subr.bf16.mxu1 %v1460_v8  ;;  %v1486_v28 = vld [vmem:[%s1611_s11 + $0x34] ss:$8 sps:$4 sm:$0xff]   ;;  %v1490_v30 = vld [vmem:[%s1611_s11 + $0x30] ss:$8 sps:$4 sm:$0xff]   ;;  %v1492_v32 = vld [vmem:[%s1611_s11 + $0x44] ss:$8 sps:$4 sm:$0xff]  }
  0x16   : > { %v1488_v29 = vld [vmem:[%s1611_s11 + $0xb4] ss:$8 sps:$4 sm:$0xff]   ;;  %v1491_v31 = vld [vmem:[%s1611_s11 + $0xb0] ss:$8 sps:$4 sm:$0xff]   ;;  %v1494_v33 = vld [vmem:[%s1611_s11 + $0xc4] ss:$8 sps:$4 sm:$0xff]  }
  0x17   : > { %v1496_v34 = vld [vmem:[%s1611_s11 + $0x40] ss:$8 sps:$4 sm:$0xff]   ;;  %v1498_v36 = vld [vmem:[%s1611_s11 + $0x54] ss:$8 sps:$4 sm:$0xff]   ;;  %v1502_v38 = vld [vmem:[%s1611_s11 + $0x50] ss:$8 sps:$4 sm:$0xff]  }
  0x18   : > { %1309 = vmatpush3.bf16.msra.mxu0 %v1461_v9  ;;  %1424 = vmatpush3.bf16.msra.mxu1 %v1461_v9  ;;  %v1497_v35 = vld [vmem:[%s1611_s11 + $0xc0] ss:$8 sps:$4 sm:$0xff]   ;;  %v1500_v37 = vld [vmem:[%s1611_s11 + $0xd4] ss:$8 sps:$4 sm:$0xff]   ;;  %v1503_v39 = vld [vmem:[%s1611_s11 + $0xd0] ss:$8 sps:$4 sm:$0xff]  }
  0x19   : > { %1310 = vmatprep.subr.bf16.mxu0 %v1462_v10  ;;  %1417 = vmatprep.subr.bf16.mxu1 %v1462_v10  ;;  %v1504_v40 = vld [vmem:[%s1611_s11 + $0x64] ss:$8 sps:$4 sm:$0xff]   ;;  %v1508_v42 = vld [vmem:[%s1611_s11 + $0x60] ss:$8 sps:$4 sm:$0xff]   ;;  %v1510_v44 = vld [vmem:[%s1611_s11 + $0x74] ss:$8 sps:$4 sm:$0xff]  }
  0x1a   : > { %v1506_v41 = vld [vmem:[%s1611_s11 + $0xe4] ss:$8 sps:$4 sm:$0xff]   ;;  %v1509_v43 = vld [vmem:[%s1611_s11 + $0xe0] ss:$8 sps:$4 sm:$0xff]   ;;  %v1512_v45 = vld [vmem:[%s1611_s11 + $0xf4] ss:$8 sps:$4 sm:$0xff]  }
  0x1b   : > { %v1514_v46 = vld [vmem:[%s1611_s11 + $0x70] ss:$8 sps:$4 sm:$0xff]  }
  0x1c   : > { %1311 = vmatpush3.bf16.msra.mxu0 %v1463_v13  ;;  %1425 = vmatpush3.bf16.msra.mxu1 %v1463_v13  ;;  %v1515_v47 = vld [vmem:[%s1611_s11 + $0xf0] ss:$8 sps:$4 sm:$0xff]  }
  0x1d   : > { %1312 = vmatprep.subr.bf16.mxu0 %v1464_v14  ;;  %1418 = vmatprep.subr.bf16.mxu1 %v1464_v14 }
  0x20   : > { %1313 = vmatpush3.bf16.msra.mxu0 %v1465_v15  ;;  %1426 = vmatpush3.bf16.msra.mxu1 %v1465_v15 }
  0x21   : > { %1314 = vmatprep.subr.bf16.mxu0 %v1466_v16  ;;  %1419 = vmatprep.subr.bf16.mxu1 %v1466_v16 }
  0x24   : > { %1315 = vmatpush3.bf16.msra.mxu0 %v1467_v17  ;;  %1427 = vmatpush3.bf16.msra.mxu1 %v1467_v17 }
  0x27   : > { %608 = vmatmul.mubr.bf16.vlgmr.msra.gmra.mrb[0].mxu0 %v1468_v18  ;;  %672 = vmatmul.mubr.bf16.vlgmr.msra.gmra.mrb[0].mxu1 %v1471_v19 }
  0x28   : > { %615 = vmatprep.mubr.bf16.mxu0 %v1474_v20  ;;  %679 = vmatprep.mubr.bf16.mxu1 %v1476_v21 }
  0x2f   : > { %616 = vmatmul.mubr.bf16.gmra.mrb[4].mxu0 %v1478_v22  ;;  %680 = vmatmul.mubr.bf16.gmra.mrb[4].mxu1 %v1479_v23 }
  0x30   : > { %623 = vmatprep.mubr.bf16.mxu0 %v1480_v24  ;;  %687 = vmatprep.mubr.bf16.mxu1 %v1482_v25 }
  0x37   : > { %624 = vmatmul.mubr.bf16.gmra.mrb[8].mxu0 %v1484_v26  ;;  %688 = vmatmul.mubr.bf16.gmra.mrb[8].mxu1 %v1485_v27 }
  0x38   : > { %631 = vmatprep.mubr.bf16.mxu0 %v1486_v28  ;;  %695 = vmatprep.mubr.bf16.mxu1 %v1488_v29 }
  0x3f   : > { %632 = vmatmul.mubr.bf16.gmra.mrb[12].mxu0 %v1490_v30  ;;  %696 = vmatmul.mubr.bf16.gmra.mrb[12].mxu1 %v1491_v31 }
  0x40   : > { %639 = vmatprep.mubr.bf16.mxu0 %v1492_v32  ;;  %703 = vmatprep.mubr.bf16.mxu1 %v1494_v33 }
  0x47   : > { %640 = vmatmul.mubr.bf16.gmra.mrb[16].mxu0 %v1496_v34  ;;  %704 = vmatmul.mubr.bf16.gmra.mrb[16].mxu1 %v1497_v35 }
  0x48   : > { %647 = vmatprep.mubr.bf16.mxu0 %v1498_v36  ;;  %711 = vmatprep.mubr.bf16.mxu1 %v1500_v37 }
  0x4f   : > { %648 = vmatmul.mubr.bf16.gmra.mrb[20].mxu0 %v1502_v38  ;;  %712 = vmatmul.mubr.bf16.gmra.mrb[20].mxu1 %v1503_v39 }
  0x50   : > { %655 = vmatprep.mubr.bf16.mxu0 %v1504_v40  ;;  %719 = vmatprep.mubr.bf16.mxu1 %v1506_v41 }
  0x57   : > { %656 = vmatmul.mubr.bf16.gmra.mrb[24].mxu0 %v1508_v42  ;;  %720 = vmatmul.mubr.bf16.gmra.mrb[24].mxu1 %v1509_v43 }
  0x58   : > { %663 = vmatprep.mubr.bf16.mxu0 %v1510_v44  ;;  %727 = vmatprep.mubr.bf16.mxu1 %v1512_v45 }
  0x5f   : > { %664 = vmatmul.mubr.bf16.gmra.mrb[28].mxu0 %v1514_v46  ;;  %728 = vmatmul.mubr.bf16.gmra.mrb[28].mxu1 %v1515_v47 }
  0xfa   : > { %v1316_v48 = vpop.f32.mrb[0].mxu0  ;;  %v1364_v49 = vpop.f32.mrb[0].mxu1 }
  0xfb   : > { %v1317_v51 = vpop.f32.mrb[1].mxu0  ;;  %v1365_v52 = vpop.f32.mrb[1].mxu1 }
  0xfc   : > { %v1318_v53 = vadd.f32 %v1317_v51, %v1316_v48  ;;  %v1366_v54 = vadd.f32 %v1365_v52, %v1364_v49  ;;  %v1319_v55 = vpop.f32.mrb[2].mxu0  ;;  %v1367_v56 = vpop.f32.mrb[2].mxu1 }
  0xfd   : > { %v1320_v57 = vpop.f32.mrb[3].mxu0  ;;  %v1368_v58 = vpop.f32.mrb[3].mxu1 }
  0xfe   : > { %v610_v59 = vadd.f32 %v1318_v53, %v1669_v50  ;;  %v674_v60 = vadd.f32 %v1366_v54, %v1669_v50  ;;  %v1321_v61 = vadd.f32 %v1320_v57, %v1319_v55  ;;  %v1369_v62 = vadd.f32 %v1368_v58, %v1367_v56 }
 0x100   : > { %v736_v63 = vmul.f32 0.01, %v610_v59  ;;  %v752_v0 = vmul.f32 0.01, %v674_v60  ;;  %v613_v1 = vadd.f32 %v1321_v61, %v1669_v50  ;;  %v677_v2 = vadd.f32 %v1369_v62, %v1669_v50 }
 0x102   : > { %v737_v3 = vmul.f32 0.01, %v613_v1  ;;  %v753_v4 = vmul.f32 0.01, %v677_v2  ;;  %v1322_v5 = vpop.f32.mrb[4].mxu0  ;;  %v1370_v6 = vpop.f32.mrb[4].mxu1  ;;  %v768_v7 = vmax.f32 %v610_v59, %v736_v63  ;;  %v784_v8 = vmax.f32 %v674_v60, %v752_v0 }
 0x103   : > { %v1323_v9 = vpop.f32.mrb[5].mxu0  ;;  %v1371_v10 = vpop.f32.mrb[5].mxu1 }
 0x104   : > { %v769_v11 = vmax.f32 %v613_v1, %v737_v3  ;;  %v785_v12 = vmax.f32 %v677_v2, %v753_v4  ;;  %v1324_v13 = vadd.f32 %v1323_v9, %v1322_v5  ;;  %v1372_v14 = vadd.f32 %v1371_v10, %v1370_v6  ;;  %v1325_v15 = vpop.f32.mrb[6].mxu0  ;;  %v1373_v16 = vpop.f32.mrb[6].mxu1 }
 0x105   : > { %v1326_v17 = vpop.f32.mrb[7].mxu0  ;;  %v1374_v18 = vpop.f32.mrb[7].mxu1 }
 0x106   : > { %v1208_v19 = vpack.c.bf16 %v769_v11, %v768_v7  ;;  %v1248_v20 = vpack.c.bf16 %v785_v12, %v784_v8  ;;  %v618_v21 = vadd.f32 %v1324_v13, %v1669_v50  ;;  %v682_v22 = vadd.f32 %v1372_v14, %v1669_v50 }
 0x107   : > { %v1327_v23 = vadd.f32 %v1326_v17, %v1325_v15  ;;  %v1375_v24 = vadd.f32 %v1374_v18, %v1373_v16 }
 0x108   : > { %1209 = vst [vmem:[%s1679_s8] sm:$0xff] %v1208_v19   ;;  %1292 = vst [vmem:[%s1679_s8 + $0x40] sm:$0xff] %v1248_v20   ;;  %v738_v25 = vmul.f32 0.01, %v618_v21  ;;  %v754_v26 = vmul.f32 0.01, %v682_v22 }
 0x109   : > { %v621_v27 = vadd.f32 %v1327_v23, %v1669_v50  ;;  %v685_v28 = vadd.f32 %v1375_v24, %v1669_v50 }
 0x10a   : > { %v1328_v29 = vpop.f32.mrb[8].mxu0  ;;  %v1376_v30 = vpop.f32.mrb[8].mxu1  ;;  %v770_v39 = vmax.f32 %v618_v21, %v738_v25  ;;  %v786_v40 = vmax.f32 %v682_v22, %v754_v26 }
 0x10b   : > { %v739_v31 = vmul.f32 0.01, %v621_v27  ;;  %v755_v32 = vmul.f32 0.01, %v685_v28  ;;  %v1329_v33 = vpop.f32.mrb[9].mxu0  ;;  %v1377_v34 = vpop.f32.mrb[9].mxu1 }
 0x10c   : > { %v1330_v35 = vadd.f32 %v1329_v33, %v1328_v29  ;;  %v1378_v36 = vadd.f32 %v1377_v34, %v1376_v30  ;;  %v1331_v37 = vpop.f32.mrb[10].mxu0  ;;  %v1379_v38 = vpop.f32.mrb[10].mxu1 }
 0x10d   : > { %v771_v41 = vmax.f32 %v621_v27, %v739_v31  ;;  %v787_v42 = vmax.f32 %v685_v28, %v755_v32  ;;  %v1332_v43 = vpop.f32.mrb[11].mxu0  ;;  %v1380_v44 = vpop.f32.mrb[11].mxu1 }
 0x10e   : > { %v626_v45 = vadd.f32 %v1330_v35, %v1669_v50  ;;  %v690_v46 = vadd.f32 %v1378_v36, %v1669_v50  ;;  %v1333_v47 = vadd.f32 %v1332_v43, %v1331_v37  ;;  %v1381_v48 = vadd.f32 %v1380_v44, %v1379_v38 }
 0x10f   : > { %v1213_v49 = vpack.c.bf16 %v771_v41, %v770_v39  ;;  %v1253_v51 = vpack.c.bf16 %v787_v42, %v786_v40 }
 0x110   : > { %v740_v52 = vmul.f32 0.01, %v626_v45  ;;  %v756_v53 = vmul.f32 0.01, %v690_v46  ;;  %v629_v54 = vadd.f32 %v1333_v47, %v1669_v50  ;;  %v693_v55 = vadd.f32 %v1381_v48, %v1669_v50 }
 0x111   : > { %1285 = vst [vmem:[%s1679_s8 + $0x8] sm:$0xff] %v1213_v49   ;;  %1293 = vst [vmem:[%s1679_s8 + $0x48] sm:$0xff] %v1253_v51  }
 0x112   : > { %v741_v56 = vmul.f32 0.01, %v629_v54  ;;  %v757_v57 = vmul.f32 0.01, %v693_v55  ;;  %v1334_v58 = vpop.f32.mrb[12].mxu0  ;;  %v1382_v59 = vpop.f32.mrb[12].mxu1  ;;  %v772_v60 = vmax.f32 %v626_v45, %v740_v52  ;;  %v788_v61 = vmax.f32 %v690_v46, %v756_v53 }
 0x113   : > { %v1335_v62 = vpop.f32.mrb[13].mxu0  ;;  %v1383_v63 = vpop.f32.mrb[13].mxu1 }
 0x114   : > { %v773_v0 = vmax.f32 %v629_v54, %v741_v56  ;;  %v789_v1 = vmax.f32 %v693_v55, %v757_v57  ;;  %v1336_v2 = vadd.f32 %v1335_v62, %v1334_v58  ;;  %v1384_v3 = vadd.f32 %v1383_v63, %v1382_v59  ;;  %v1337_v4 = vpop.f32.mrb[14].mxu0  ;;  %v1385_v5 = vpop.f32.mrb[14].mxu1 }
 0x115   : > { %v1338_v6 = vpop.f32.mrb[15].mxu0  ;;  %v1386_v7 = vpop.f32.mrb[15].mxu1 }
 0x116   : > { %v1218_v8 = vpack.c.bf16 %v773_v0, %v772_v60  ;;  %v1258_v9 = vpack.c.bf16 %v789_v1, %v788_v61  ;;  %v634_v10 = vadd.f32 %v1336_v2, %v1669_v50  ;;  %v698_v11 = vadd.f32 %v1384_v3, %v1669_v50 }
 0x117   : > { %v1339_v12 = vadd.f32 %v1338_v6, %v1337_v4  ;;  %v1387_v13 = vadd.f32 %v1386_v7, %v1385_v5 }
 0x118   : > { %1286 = vst [vmem:[%s1679_s8 + $0x10] sm:$0xff] %v1218_v8   ;;  %1294 = vst [vmem:[%s1679_s8 + $0x50] sm:$0xff] %v1258_v9   ;;  %v742_v14 = vmul.f32 0.01, %v634_v10  ;;  %v758_v15 = vmul.f32 0.01, %v698_v11 }
 0x119   : > { %v637_v16 = vadd.f32 %v1339_v12, %v1669_v50  ;;  %v701_v17 = vadd.f32 %v1387_v13, %v1669_v50 }
 0x11a   : > { %v1340_v18 = vpop.f32.mrb[16].mxu0  ;;  %v1388_v19 = vpop.f32.mrb[16].mxu1  ;;  %v774_v28 = vmax.f32 %v634_v10, %v742_v14  ;;  %v790_v29 = vmax.f32 %v698_v11, %v758_v15 }
 0x11b   : > { %v743_v20 = vmul.f32 0.01, %v637_v16  ;;  %v759_v21 = vmul.f32 0.01, %v701_v17  ;;  %v1341_v22 = vpop.f32.mrb[17].mxu0  ;;  %v1389_v23 = vpop.f32.mrb[17].mxu1 }
 0x11c   : > { %v1342_v24 = vadd.f32 %v1341_v22, %v1340_v18  ;;  %v1390_v25 = vadd.f32 %v1389_v23, %v1388_v19  ;;  %v1343_v26 = vpop.f32.mrb[18].mxu0  ;;  %v1391_v27 = vpop.f32.mrb[18].mxu1 }
 0x11d   : > { %v775_v30 = vmax.f32 %v637_v16, %v743_v20  ;;  %v791_v31 = vmax.f32 %v701_v17, %v759_v21  ;;  %v1344_v32 = vpop.f32.mrb[19].mxu0  ;;  %v1392_v33 = vpop.f32.mrb[19].mxu1 }
 0x11e   : > { %v642_v34 = vadd.f32 %v1342_v24, %v1669_v50  ;;  %v706_v35 = vadd.f32 %v1390_v25, %v1669_v50  ;;  %v1345_v36 = vadd.f32 %v1344_v32, %v1343_v26  ;;  %v1393_v37 = vadd.f32 %v1392_v33, %v1391_v27 }
 0x11f   : > { %v1223_v38 = vpack.c.bf16 %v775_v30, %v774_v28  ;;  %v1263_v39 = vpack.c.bf16 %v791_v31, %v790_v29 }
 0x120   : > { %v744_v40 = vmul.f32 0.01, %v642_v34  ;;  %v760_v41 = vmul.f32 0.01, %v706_v35  ;;  %v645_v42 = vadd.f32 %v1345_v36, %v1669_v50  ;;  %v709_v43 = vadd.f32 %v1393_v37, %v1669_v50 }
 0x121   : > { %1287 = vst [vmem:[%s1679_s8 + $0x18] sm:$0xff] %v1223_v38   ;;  %1295 = vst [vmem:[%s1679_s8 + $0x58] sm:$0xff] %v1263_v39  }
 0x122   : > { %v745_v44 = vmul.f32 0.01, %v645_v42  ;;  %v761_v45 = vmul.f32 0.01, %v709_v43  ;;  %v1346_v46 = vpop.f32.mrb[20].mxu0  ;;  %v1394_v47 = vpop.f32.mrb[20].mxu1  ;;  %v776_v48 = vmax.f32 %v642_v34, %v744_v40  ;;  %v792_v49 = vmax.f32 %v706_v35, %v760_v41 }
 0x123   : > { %v1347_v51 = vpop.f32.mrb[21].mxu0  ;;  %v1395_v52 = vpop.f32.mrb[21].mxu1 }
 0x124   : > { %v777_v53 = vmax.f32 %v645_v42, %v745_v44  ;;  %v793_v54 = vmax.f32 %v709_v43, %v761_v45  ;;  %v1348_v55 = vadd.f32 %v1347_v51, %v1346_v46  ;;  %v1396_v56 = vadd.f32 %v1395_v52, %v1394_v47  ;;  %v1349_v57 = vpop.f32.mrb[22].mxu0  ;;  %v1397_v58 = vpop.f32.mrb[22].mxu1 }
 0x125   : > { %v1350_v59 = vpop.f32.mrb[23].mxu0  ;;  %v1398_v60 = vpop.f32.mrb[23].mxu1 }
 0x126   : > { %v1228_v61 = vpack.c.bf16 %v777_v53, %v776_v48  ;;  %v1268_v62 = vpack.c.bf16 %v793_v54, %v792_v49  ;;  %v650_v63 = vadd.f32 %v1348_v55, %v1669_v50  ;;  %v714_v0 = vadd.f32 %v1396_v56, %v1669_v50 }
 0x127   : > { %v1351_v1 = vadd.f32 %v1350_v59, %v1349_v57  ;;  %v1399_v2 = vadd.f32 %v1398_v60, %v1397_v58 }
 0x128   : > { %1288 = vst [vmem:[%s1679_s8 + $0x20] sm:$0xff] %v1228_v61   ;;  %1296 = vst [vmem:[%s1679_s8 + $0x60] sm:$0xff] %v1268_v62   ;;  %v746_v3 = vmul.f32 0.01, %v650_v63  ;;  %v762_v4 = vmul.f32 0.01, %v714_v0 }
 0x129   : > { %v653_v5 = vadd.f32 %v1351_v1, %v1669_v50  ;;  %v717_v6 = vadd.f32 %v1399_v2, %v1669_v50 }
 0x12a   : > { %v1352_v7 = vpop.f32.mrb[24].mxu0  ;;  %v1400_v8 = vpop.f32.mrb[24].mxu1  ;;  %v778_v17 = vmax.f32 %v650_v63, %v746_v3  ;;  %v794_v18 = vmax.f32 %v714_v0, %v762_v4 }
 0x12b   : > { %v747_v9 = vmul.f32 0.01, %v653_v5  ;;  %v763_v10 = vmul.f32 0.01, %v717_v6  ;;  %v1353_v11 = vpop.f32.mrb[25].mxu0  ;;  %v1401_v12 = vpop.f32.mrb[25].mxu1 }
 0x12c   : > { %v1354_v13 = vadd.f32 %v1353_v11, %v1352_v7  ;;  %v1402_v14 = vadd.f32 %v1401_v12, %v1400_v8  ;;  %v1355_v15 = vpop.f32.mrb[26].mxu0  ;;  %v1403_v16 = vpop.f32.mrb[26].mxu1 }
 0x12d   : > { %v779_v19 = vmax.f32 %v653_v5, %v747_v9  ;;  %v795_v20 = vmax.f32 %v717_v6, %v763_v10  ;;  %v1356_v21 = vpop.f32.mrb[27].mxu0  ;;  %v1404_v22 = vpop.f32.mrb[27].mxu1 }
 0x12e   : > { %v658_v23 = vadd.f32 %v1354_v13, %v1669_v50  ;;  %v722_v24 = vadd.f32 %v1402_v14, %v1669_v50  ;;  %v1357_v25 = vadd.f32 %v1356_v21, %v1355_v15  ;;  %v1405_v26 = vadd.f32 %v1404_v22, %v1403_v16 }
 0x12f   : > { %v1233_v27 = vpack.c.bf16 %v779_v19, %v778_v17  ;;  %v1273_v28 = vpack.c.bf16 %v795_v20, %v794_v18 }
 0x130   : > { %v748_v29 = vmul.f32 0.01, %v658_v23  ;;  %v764_v30 = vmul.f32 0.01, %v722_v24  ;;  %v661_v31 = vadd.f32 %v1357_v25, %v1669_v50  ;;  %v725_v32 = vadd.f32 %v1405_v26, %v1669_v50 }
 0x131   : > { %1289 = vst [vmem:[%s1679_s8 + $0x28] sm:$0xff] %v1233_v27   ;;  %1297 = vst [vmem:[%s1679_s8 + $0x68] sm:$0xff] %v1273_v28  }
 0x132   : > { %v749_v33 = vmul.f32 0.01, %v661_v31  ;;  %v765_v34 = vmul.f32 0.01, %v725_v32  ;;  %v1358_v35 = vpop.f32.mrb[28].mxu0  ;;  %v1406_v36 = vpop.f32.mrb[28].mxu1  ;;  %v780_v37 = vmax.f32 %v658_v23, %v748_v29  ;;  %v796_v38 = vmax.f32 %v722_v24, %v764_v30 }
 0x133   : > { %v1359_v39 = vpop.f32.mrb[29].mxu0  ;;  %v1407_v40 = vpop.f32.mrb[29].mxu1 }
 0x134   : > { %v781_v41 = vmax.f32 %v661_v31, %v749_v33  ;;  %v797_v42 = vmax.f32 %v725_v32, %v765_v34  ;;  %v1360_v43 = vadd.f32 %v1359_v39, %v1358_v35  ;;  %v1408_v44 = vadd.f32 %v1407_v40, %v1406_v36  ;;  %v1361_v45 = vpop.f32.mrb[30].mxu0  ;;  %v1409_v46 = vpop.f32.mrb[30].mxu1 }
 0x135   : > { %v1362_v47 = vpop.f32.mrb[31].mxu0  ;;  %v1410_v48 = vpop.f32.mrb[31].mxu1 }
 0x136   : > { %v1238_v49 = vpack.c.bf16 %v781_v41, %v780_v37  ;;  %v1278_v51 = vpack.c.bf16 %v797_v42, %v796_v38  ;;  %v666_v52 = vadd.f32 %v1360_v43, %v1669_v50  ;;  %v730_v53 = vadd.f32 %v1408_v44, %v1669_v50 }
 0x137   : > { %v1363_v54 = vadd.f32 %v1362_v47, %v1361_v45  ;;  %v1411_v55 = vadd.f32 %v1410_v48, %v1409_v46 }
 0x138   : > { %1290 = vst [vmem:[%s1679_s8 + $0x30] sm:$0xff] %v1238_v49   ;;  %1298 = vst [vmem:[%s1679_s8 + $0x70] sm:$0xff] %v1278_v51   ;;  %v750_v56 = vmul.f32 0.01, %v666_v52  ;;  %v766_v57 = vmul.f32 0.01, %v730_v53 }
 0x139   : > { %v669_v58 = vadd.f32 %v1363_v54, %v1669_v50  ;;  %v733_v59 = vadd.f32 %v1411_v55, %v1669_v50 }
 0x13a   : > { %v782_v62 = vmax.f32 %v666_v52, %v750_v56  ;;  %v798_v63 = vmax.f32 %v730_v53, %v766_v57 }
 0x13b   : > { %v751_v60 = vmul.f32 0.01, %v669_v58  ;;  %v767_v61 = vmul.f32 0.01, %v733_v59 }
 0x13d   : > { %v783_v0 = vmax.f32 %v669_v58, %v751_v60  ;;  %v799_v1 = vmax.f32 %v733_v59, %v767_v61 }
 0x13f   : > { %v1243_v2 = vpack.c.bf16 %v783_v0, %v782_v62  ;;  %v1283_v3 = vpack.c.bf16 %v799_v1, %v798_v63 }
 0x141   : > { %1291 = vst [vmem:[%s1679_s8 + $0x38] sm:$0xff] %v1243_v2   ;;  %1299 = vst [vmem:[%s1679_s8 + $0x78] sm:$0xff] %v1283_v3  }
 0x142 PF: > { %s13_s14 = sadd.s32 1, %s1538_s14   ;;  %s1738_s12 = smov %s1534_s13 }
 0x143   : > { %p10_p5 = scmp.ge.s32.totalorder %s13_s14, 4   ;;  %s1739_s13 = smov %s1741_s15 }
 0x145   :  { %12 = sbr.rel (!%p10_p5) target bundleno = 2 (0x2), region = 68 }

// kernel: _lambda_.14
= control target key start
LH: loop header
LB: loop body
LE: loop exit
PB: predicated region body
PF: predicated region fallthrough
CT: control target
= control target key end

     0   :  { %s1320_s12 = smov 0   ;;  %s1322_s13 = smov 0   ;;  %s1457_s0 = inlined_call_operand.vmem [shape: bf16[1,512,128], index: 0, kind: input, shape index: {}]   ;;  %s1458_s1 = inlined_call_operand.vmem [shape: bf16[1,128,128], index: 1, kind: input, shape index: {}]   ;;  %s1459_s2 = inlined_call_operand.vmem [shape: f32[1,1,128], index: 2, kind: input, shape index: {}]   ;;  %s1460_s3 = inlined_call_operand.vmem [shape: bf16[1,512,128], index: 3, kind: output, shape index: {}]  }
   0x1   :  { %s1324_s14 = smov 0  }
   0x2 LB: > { %s22_s15 = sadd.s32 1, %s1294_s13  ;;  %p949_p0 = scmp.ge.s32.totalorder %s1298_s14, 1  ;;  %s1298_s14 = sphi %s1324_s14, %s13_s14   ;;  %s1294_s13 = sphi %s1322_s13, %s1462_s13   ;;  %s1290_s12 = sphi %s1320_s12, %s1461_s12  }
   0x3   : > { %p23_p1 = scmp.ge.s32.totalorder %s22_s15, 2  ;;  %p176_p2 = scmp.lt.s32.totalorder %s1298_s14, 3 }
   0x5   : > { %s1464_s15 = smov (%p23_p1, %s22_s15), 0  ;;  %p177_p3 = pnand %p949_p0, %p176_p2 }
   0x6   : > { %v1252_v0 = vld [vmem:[%s1458_s1] sm:$0xff] (!%p177_p3)   ;;  %s950_s18 = sshll.u32 (!%p177_p3), %s1290_s12, 5  ;;  %v1253_v1 = vld [vmem:[%s1458_s1 + $0x8] sm:$0xff] (!%p177_p3)   ;;  %v1254_v2 = vld [vmem:[%s1458_s1 + $0x10] sm:$0xff] (!%p177_p3)  }
   0x7   : > { %180 = sbr.rel (%p177_p3) target bundleno = 288 (0x120), region = 32  ;;  %p219_p4 = scmp.lt.s32.totalorder (!%p177_p3), %s950_s18, 63  ;;  %1164 = vmatprep.subr.bf16.mxu0 (!%p177_p3), %v1252_v0  ;;  %1212 = vmatprep.subr.bf16.mxu1 (!%p177_p3), %v1252_v0  ;;  %v1255_v3 = vld [vmem:[%s1458_s1 + $0x18] sm:$0xff] (!%p177_p3)   ;;  %v1256_v6 = vld [vmem:[%s1458_s1 + $0x20] sm:$0xff] (!%p177_p3)   ;;  %v1257_v7 = vld [vmem:[%s1458_s1 + $0x28] sm:$0xff] (!%p177_p3)  }
   0x8   : > { %1165 = vmatpush3.bf16.msra.mxu0 (!%p177_p3), %v1252_v0  ;;  %1220 = vmatpush3.bf16.msra.mxu1 (!%p177_p3), %v1252_v0  ;;  %v1258_v8 = vld [vmem:[%s1458_s1 + $0x30] sm:$0xff] (!%p177_p3)   ;;  %v1259_v9 = vld [vmem:[%s1458_s1 + $0x38] sm:$0xff] (!%p177_p3)   ;;  %v1391_v24 = vld [vmem:[%s1459_s2] ss:$0 sm:$0xff] (!%p177_p3) }
   0x9   : > { %1166 = vmatprep.subr.bf16.mxu0 (!%p177_p3), %v1253_v1  ;;  %1213 = vmatprep.subr.bf16.mxu1 (!%p177_p3), %v1253_v1 }
   0xc   : > { %1167 = vmatpush3.bf16.msra.mxu0 (!%p177_p3), %v1253_v1  ;;  %1221 = vmatpush3.bf16.msra.mxu1 (!%p177_p3), %v1253_v1 }
   0xd   : > { %1168 = vmatprep.subr.bf16.mxu0 (!%p177_p3), %v1254_v2  ;;  %1214 = vmatprep.subr.bf16.mxu1 (!%p177_p3), %v1254_v2 }
   0xe   : > { %s1466_s18 = smov (!%p219_p4, %s950_s18), 63 }
   0xf   : > { %s951_s23 = sshll.u32 %s1466_s18, 2 }
  0x10   : > { %s1355_s26 = scalar_lea.vmem %s1457_s0, %s951_s23  ;;  %1169 = vmatpush3.bf16.msra.mxu0 %v1254_v2  ;;  %1222 = vmatpush3.bf16.msra.mxu1 %v1254_v2  ;;  %s1406_s17 = scalar_lea.vmem %s1460_s3, %s951_s23 }
  0x11   : > { %v1260_v4 = vld [vmem:[%s1355_s26] sm:$0xff]   ;;  %1170 = vmatprep.subr.bf16.mxu0 %v1255_v3  ;;  %1215 = vmatprep.subr.bf16.mxu1 %v1255_v3  ;;  %v1262_v10 = vld [vmem:[%s1355_s26 + $0x8] sm:$0xff]   ;;  %v1264_v12 = vld [vmem:[%s1355_s26 + $0x10] sm:$0xff]  }
  0x12   : > { %v1261_v5 = vld [vmem:[%s1355_s26 + $0x40] sm:$0xff]   ;;  %1180 = vmatprep.mubr.bf16.mxu0 %v1260_v4  ;;  %v1263_v11 = vld [vmem:[%s1355_s26 + $0x48] sm:$0xff]   ;;  %v1265_v13 = vld [vmem:[%s1355_s26 + $0x50] sm:$0xff]  }
  0x13   : > { %1196 = vmatprep.mubr.bf16.mxu1 %v1261_v5  ;;  %v1266_v14 = vld [vmem:[%s1355_s26 + $0x18] sm:$0xff]   ;;  %v1268_v16 = vld [vmem:[%s1355_s26 + $0x20] sm:$0xff]   ;;  %v1270_v18 = vld [vmem:[%s1355_s26 + $0x28] sm:$0xff]  }
  0x14   : > { %1171 = vmatpush3.bf16.msra.mxu0 %v1255_v3  ;;  %1223 = vmatpush3.bf16.msra.mxu1 %v1255_v3  ;;  %v1267_v15 = vld [vmem:[%s1355_s26 + $0x58] sm:$0xff]   ;;  %v1269_v17 = vld [vmem:[%s1355_s26 + $0x60] sm:$0xff]   ;;  %v1271_v19 = vld [vmem:[%s1355_s26 + $0x68] sm:$0xff]  }
  0x15   : > { %1172 = vmatprep.subr.bf16.mxu0 %v1256_v6  ;;  %1216 = vmatprep.subr.bf16.mxu1 %v1256_v6  ;;  %v1272_v20 = vld [vmem:[%s1355_s26 + $0x30] sm:$0xff]   ;;  %v1274_v22 = vld [vmem:[%s1355_s26 + $0x38] sm:$0xff]  }
  0x16   : > { %v1273_v21 = vld [vmem:[%s1355_s26 + $0x70] sm:$0xff]   ;;  %v1275_v23 = vld [vmem:[%s1355_s26 + $0x78] sm:$0xff]  }
  0x18   : > { %1173 = vmatpush3.bf16.msra.mxu0 %v1256_v6  ;;  %1224 = vmatpush3.bf16.msra.mxu1 %v1256_v6 }
  0x19   : > { %1174 = vmatprep.subr.bf16.mxu0 %v1257_v7  ;;  %1217 = vmatprep.subr.bf16.mxu1 %v1257_v7 }
  0x1c   : > { %1175 = vmatpush3.bf16.msra.mxu0 %v1257_v7  ;;  %1225 = vmatpush3.bf16.msra.mxu1 %v1257_v7 }
  0x1d   : > { %1176 = vmatprep.subr.bf16.mxu0 %v1258_v8  ;;  %1218 = vmatprep.subr.bf16.mxu1 %v1258_v8 }
  0x20   : > { %1177 = vmatpush3.bf16.msra.mxu0 %v1258_v8  ;;  %1226 = vmatpush3.bf16.msra.mxu1 %v1258_v8 }
  0x21   : > { %1178 = vmatprep.subr.bf16.mxu0 %v1259_v9  ;;  %1219 = vmatprep.subr.bf16.mxu1 %v1259_v9 }
  0x24   : > { %1179 = vmatpush3.bf16.msra.mxu0 %v1259_v9  ;;  %1227 = vmatpush3.bf16.msra.mxu1 %v1259_v9 }
  0x27   : > { %1181 = vmatmul.mubr.bf16.vlgmr.msra.gmra.mrb[0].mxu0 %v1262_v10  ;;  %1197 = vmatmul.mubr.bf16.vlgmr.msra.gmra.mrb[0].mxu1 %v1263_v11 }
  0x28   : > { %1184 = vmatprep.mubr.bf16.mxu0 %v1264_v12  ;;  %1200 = vmatprep.mubr.bf16.mxu1 %v1265_v13 }
  0x2f   : > { %1185 = vmatmul.mubr.bf16.gmra.mrb[4].mxu0 %v1266_v14  ;;  %1201 = vmatmul.mubr.bf16.gmra.mrb[4].mxu1 %v1267_v15 }
  0x30   : > { %1188 = vmatprep.mubr.bf16.mxu0 %v1268_v16  ;;  %1204 = vmatprep.mubr.bf16.mxu1 %v1269_v17 }
  0x37   : > { %1189 = vmatmul.mubr.bf16.gmra.mrb[8].mxu0 %v1270_v18  ;;  %1205 = vmatmul.mubr.bf16.gmra.mrb[8].mxu1 %v1271_v19 }
  0x38   : > { %1192 = vmatprep.mubr.bf16.mxu0 %v1272_v20  ;;  %1208 = vmatprep.mubr.bf16.mxu1 %v1273_v21 }
  0x3f   : > { %1193 = vmatmul.mubr.bf16.gmra.mrb[12].mxu0 %v1274_v22  ;;  %1209 = vmatmul.mubr.bf16.gmra.mrb[12].mxu1 %v1275_v23 }
  0xfa   : > { %v1182_v25 = vpop.f32.mrb[0].mxu0  ;;  %v1198_v26 = vpop.f32.mrb[0].mxu1 }
  0xfb   : > { %v487_v27 = vadd.f32 %v1182_v25, %v1391_v24  ;;  %v551_v28 = vadd.f32 %v1198_v26, %v1391_v24  ;;  %v478_v29 = vpop.f32.mrb[1].mxu0  ;;  %v542_v30 = vpop.f32.mrb[1].mxu1 }
  0xfc   : > { %v479_v31 = vadd.f32 %v1391_v24, %v478_v29  ;;  %v543_v32 = vadd.f32 %v1391_v24, %v542_v30  ;;  %v1183_v33 = vpop.f32.mrb[2].mxu0  ;;  %v1199_v34 = vpop.f32.mrb[2].mxu1 }
  0xfd   : > { %v607_v35 = vmul.f32 0.01, %v487_v27  ;;  %v623_v36 = vmul.f32 0.01, %v551_v28  ;;  %v490_v37 = vadd.f32 %v1183_v33, %v1391_v24  ;;  %v554_v38 = vadd.f32 %v1199_v34, %v1391_v24  ;;  %v481_v39 = vpop.f32.mrb[3].mxu0  ;;  %v545_v40 = vpop.f32.mrb[3].mxu1 }
  0xfe   : > { %v605_v41 = vmul.f32 0.01, %v479_v31  ;;  %v621_v42 = vmul.f32 0.01, %v543_v32  ;;  %v482_v43 = vadd.f32 %v1391_v24, %v481_v39  ;;  %v546_v44 = vadd.f32 %v1391_v24, %v545_v40 }
  0xff   : > { %v608_v45 = vmul.f32 0.01, %v490_v37  ;;  %v624_v46 = vmul.f32 0.01, %v554_v38  ;;  %v639_v49 = vmax.f32 %v487_v27, %v607_v35  ;;  %v655_v50 = vmax.f32 %v551_v28, %v623_v36 }
 0x100   : > { %v606_v47 = vmul.f32 0.01, %v482_v43  ;;  %v622_v48 = vmul.f32 0.01, %v546_v44  ;;  %v637_v53 = vmax.f32 %v479_v31, %v605_v41  ;;  %v653_v54 = vmax.f32 %v543_v32, %v621_v42 }
 0x101   : > { %v640_v51 = vmax.f32 %v490_v37, %v608_v45  ;;  %v656_v52 = vmax.f32 %v554_v38, %v624_v46 }
 0x102   : > { %v638_v55 = vmax.f32 %v482_v43, %v606_v47  ;;  %v654_v56 = vmax.f32 %v546_v44, %v622_v48  ;;  %v1186_v57 = vpop.f32.mrb[4].mxu0  ;;  %v1202_v58 = vpop.f32.mrb[4].mxu1 }
 0x103   : > { %v1053_v59 = vpack.c.bf16 %v640_v51, %v639_v49  ;;  %v1093_v60 = vpack.c.bf16 %v656_v52, %v655_v50  ;;  %v503_v61 = vadd.f32 %v1186_v57, %v1391_v24  ;;  %v567_v62 = vadd.f32 %v1202_v58, %v1391_v24  ;;  %v494_v63 = vpop.f32.mrb[5].mxu0  ;;  %v558_v0 = vpop.f32.mrb[5].mxu1 }
 0x104   : > { %v1048_v1 = vpack.c.bf16 %v638_v55, %v637_v53  ;;  %v1088_v2 = vpack.c.bf16 %v654_v56, %v653_v54  ;;  %v495_v3 = vadd.f32 %v1391_v24, %v494_v63  ;;  %v559_v4 = vadd.f32 %v1391_v24, %v558_v0  ;;  %v1187_v5 = vpop.f32.mrb[6].mxu0  ;;  %v1203_v6 = vpop.f32.mrb[6].mxu1 }
 0x105   : > { %1125 = vst [vmem:[%s1406_s17 + $0x8] sm:$0xff] %v1053_v59   ;;  %1133 = vst [vmem:[%s1406_s17 + $0x48] sm:$0xff] %v1093_v60   ;;  %v611_v7 = vmul.f32 0.01, %v503_v61  ;;  %v627_v8 = vmul.f32 0.01, %v567_v62  ;;  %v506_v9 = vadd.f32 %v1187_v5, %v1391_v24  ;;  %v570_v10 = vadd.f32 %v1203_v6, %v1391_v24 }
 0x106   : > { %v497_v11 = vpop.f32.mrb[7].mxu0  ;;  %v561_v12 = vpop.f32.mrb[7].mxu1  ;;  %1049 = vst [vmem:[%s1406_s17] sm:$0xff] %v1048_v1   ;;  %1132 = vst [vmem:[%s1406_s17 + $0x40] sm:$0xff] %v1088_v2   ;;  %v609_v13 = vmul.f32 0.01, %v495_v3 }
 0x107   : > { %v625_v14 = vmul.f32 0.01, %v559_v4  ;;  %v498_v15 = vadd.f32 %v1391_v24, %v497_v11  ;;  %v562_v16 = vadd.f32 %v1391_v24, %v561_v12  ;;  %v612_v17 = vmul.f32 0.01, %v506_v9 }
 0x108   : > { %v628_v18 = vmul.f32 0.01, %v570_v10  ;;  %v643_v21 = vmax.f32 %v503_v61, %v611_v7  ;;  %v659_v22 = vmax.f32 %v567_v62, %v627_v8  ;;  %v641_v26 = vmax.f32 %v495_v3, %v609_v13 }
 0x109   : > { %v610_v19 = vmul.f32 0.01, %v498_v15  ;;  %v626_v20 = vmul.f32 0.01, %v562_v16  ;;  %v644_v23 = vmax.f32 %v506_v9, %v612_v17  ;;  %v657_v27 = vmax.f32 %v559_v4, %v625_v14 }
 0x10a   : > { %v660_v25 = vmax.f32 %v570_v10, %v628_v18  ;;  %v1190_v30 = vpop.f32.mrb[8].mxu0  ;;  %v1206_v31 = vpop.f32.mrb[8].mxu1 }
 0x10b   : > { %v642_v28 = vmax.f32 %v498_v15, %v610_v19  ;;  %v658_v29 = vmax.f32 %v562_v16, %v626_v20  ;;  %v1063_v32 = vpack.c.bf16 %v644_v23, %v643_v21  ;;  %v519_v34 = vadd.f32 %v1190_v30, %v1391_v24  ;;  %v510_v36 = vpop.f32.mrb[9].mxu0  ;;  %v574_v37 = vpop.f32.mrb[9].mxu1 }
 0x10c   : > { %v1103_v33 = vpack.c.bf16 %v660_v25, %v659_v22  ;;  %v583_v35 = vadd.f32 %v1206_v31, %v1391_v24  ;;  %v511_v40 = vadd.f32 %v1391_v24, %v510_v36  ;;  %v575_v41 = vadd.f32 %v1391_v24, %v574_v37  ;;  %v1191_v42 = vpop.f32.mrb[10].mxu0  ;;  %v1207_v43 = vpop.f32.mrb[10].mxu1 }
 0x10d   : > { %v1058_v38 = vpack.c.bf16 %v642_v28, %v641_v26  ;;  %v1098_v39 = vpack.c.bf16 %v658_v29, %v657_v27  ;;  %1127 = vst [vmem:[%s1406_s17 + $0x18] sm:$0xff] %v1063_v32   ;;  %v615_v44 = vmul.f32 0.01, %v519_v34  ;;  %v522_v46 = vadd.f32 %v1191_v42, %v1391_v24  ;;  %v513_v48 = vpop.f32.mrb[11].mxu0  ;;  %v577_v49 = vpop.f32.mrb[11].mxu1 }
 0x10e   : > { %1135 = vst [vmem:[%s1406_s17 + $0x58] sm:$0xff] %v1103_v33   ;;  %v631_v45 = vmul.f32 0.01, %v583_v35  ;;  %v586_v47 = vadd.f32 %v1207_v43, %v1391_v24  ;;  %v613_v50 = vmul.f32 0.01, %v511_v40  ;;  %v514_v52 = vadd.f32 %v1391_v24, %v513_v48 }
 0x10f   : > { %1126 = vst [vmem:[%s1406_s17 + $0x10] sm:$0xff] %v1058_v38   ;;  %1134 = vst [vmem:[%s1406_s17 + $0x50] sm:$0xff] %v1098_v39   ;;  %v629_v51 = vmul.f32 0.01, %v575_v41  ;;  %v578_v53 = vadd.f32 %v1391_v24, %v577_v49  ;;  %v616_v54 = vmul.f32 0.01, %v522_v46  ;;  %v647_v58 = vmax.f32 %v519_v34, %v615_v44 }
 0x110   : > { %v632_v55 = vmul.f32 0.01, %v586_v47  ;;  %v614_v56 = vmul.f32 0.01, %v514_v52  ;;  %v663_v59 = vmax.f32 %v583_v35, %v631_v45  ;;  %v645_v62 = vmax.f32 %v511_v40, %v613_v50 }
 0x111   : > { %v630_v57 = vmul.f32 0.01, %v578_v53  ;;  %v648_v60 = vmax.f32 %v522_v46, %v616_v54  ;;  %v661_v63 = vmax.f32 %v575_v41, %v629_v51 }
 0x112   : > { %v664_v61 = vmax.f32 %v586_v47, %v632_v55  ;;  %v646_v0 = vmax.f32 %v514_v52, %v614_v56  ;;  %v1194_v2 = vpop.f32.mrb[12].mxu0  ;;  %v1210_v3 = vpop.f32.mrb[12].mxu1 }
 0x113   : > { %v662_v1 = vmax.f32 %v578_v53, %v630_v57  ;;  %v1073_v4 = vpack.c.bf16 %v648_v60, %v647_v58  ;;  %v535_v6 = vadd.f32 %v1194_v2, %v1391_v24  ;;  %v599_v7 = vadd.f32 %v1210_v3, %v1391_v24  ;;  %v526_v8 = vpop.f32.mrb[13].mxu0  ;;  %v590_v9 = vpop.f32.mrb[13].mxu1 }
 0x114   : > { %v1113_v5 = vpack.c.bf16 %v664_v61, %v663_v59  ;;  %v1068_v10 = vpack.c.bf16 %v646_v0, %v645_v62  ;;  %v527_v12 = vadd.f32 %v1391_v24, %v526_v8  ;;  %v591_v13 = vadd.f32 %v1391_v24, %v590_v9  ;;  %v1195_v14 = vpop.f32.mrb[14].mxu0  ;;  %v1211_v15 = vpop.f32.mrb[14].mxu1 }
 0x115   : > { %v1108_v11 = vpack.c.bf16 %v662_v1, %v661_v63  ;;  %1129 = vst [vmem:[%s1406_s17 + $0x28] sm:$0xff] %v1073_v4   ;;  %v619_v16 = vmul.f32 0.01, %v535_v6  ;;  %v635_v17 = vmul.f32 0.01, %v599_v7  ;;  %v538_v18 = vadd.f32 %v1195_v14, %v1391_v24  ;;  %v529_v20 = vpop.f32.mrb[15].mxu0 }
 0x116   : > { %1137 = vst [vmem:[%s1406_s17 + $0x68] sm:$0xff] %v1113_v5   ;;  %v602_v19 = vadd.f32 %v1211_v15, %v1391_v24  ;;  %v593_v21 = vpop.f32.mrb[15].mxu1  ;;  %1128 = vst [vmem:[%s1406_s17 + $0x20] sm:$0xff] %v1068_v10   ;;  %v617_v22 = vmul.f32 0.01, %v527_v12  ;;  %v530_v25 = vadd.f32 %v1391_v24, %v529_v20 }
 0x117   : > { %1136 = vst [vmem:[%s1406_s17 + $0x60] sm:$0xff] %v1108_v11   ;;  %v633_v23 = vmul.f32 0.01, %v591_v13  ;;  %v594_v26 = vadd.f32 %v1391_v24, %v593_v21  ;;  %v620_v27 = vmul.f32 0.01, %v538_v18  ;;  %v651_v31 = vmax.f32 %v535_v6, %v619_v16 }
 0x118   : > { %v636_v28 = vmul.f32 0.01, %v602_v19  ;;  %v618_v29 = vmul.f32 0.01, %v530_v25  ;;  %v667_v32 = vmax.f32 %v599_v7, %v635_v17  ;;  %v649_v35 = vmax.f32 %v527_v12, %v617_v22 }
 0x119   : > { %v634_v30 = vmul.f32 0.01, %v594_v26  ;;  %v652_v33 = vmax.f32 %v538_v18, %v620_v27  ;;  %v665_v36 = vmax.f32 %v591_v13, %v633_v23 }
 0x11a   : > { %v668_v34 = vmax.f32 %v602_v19, %v636_v28  ;;  %v650_v37 = vmax.f32 %v530_v25, %v618_v29 }
 0x11b   : > { %v666_v38 = vmax.f32 %v594_v26, %v634_v30  ;;  %v1083_v39 = vpack.c.bf16 %v652_v33, %v651_v31 }
 0x11c   : > { %v1123_v40 = vpack.c.bf16 %v668_v34, %v667_v32  ;;  %v1078_v41 = vpack.c.bf16 %v650_v37, %v649_v35 }
 0x11d   : > { %v1118_v24 = vpack.c.bf16 %v666_v38, %v665_v36  ;;  %1131 = vst [vmem:[%s1406_s17 + $0x38] sm:$0xff] %v1083_v39  }
 0x11e   : > { %1139 = vst [vmem:[%s1406_s17 + $0x78] sm:$0xff] %v1123_v40   ;;  %1130 = vst [vmem:[%s1406_s17 + $0x30] sm:$0xff] %v1078_v41  }
 0x11f   : > { %1138 = vst [vmem:[%s1406_s17 + $0x70] sm:$0xff] %v1118_v24  }
 0x120 PF: > { %s13_s14 = sadd.s32 1, %s1298_s14   ;;  %s1461_s12 = smov %s1294_s13 }
 0x121   : > { %p10_p5 = scmp.ge.s32.totalorder %s13_s14, 4   ;;  %s1462_s13 = smov %s1464_s15 }
 0x123   :  { %12 = sbr.rel (!%p10_p5) target bundleno = 2 (0x2), region = 68 }

// kernel: _lambda_.15
= control target key start
LH: loop header
LB: loop body
LE: loop exit
PB: predicated region body
PF: predicated region fallthrough
CT: control target
= control target key end

     0   :  { %s957_s12 = smov 0   ;;  %s959_s13 = smov 0   ;;  %s1035_s0 = inlined_call_operand.vmem [shape: bf16[3,128,128], index: 0, kind: input, shape index: {}]   ;;  %s1036_s1 = inlined_call_operand.vmem [shape: bf16[3,128,128], index: 1, kind: input, shape index: {}]   ;;  %s1037_s2 = inlined_call_operand.vmem [shape: f32[3,1,128], index: 2, kind: input, shape index: {}]   ;;  %s1038_s3 = inlined_call_operand.vmem [shape: bf16[3,128,128], index: 3, kind: output, shape index: {}]  }
   0x1   :  { %s961_s14 = smov 0  }
   0x2 LB: > { %s25_s15 = sadd.s32 1, %s931_s13  ;;  %p701_p0 = scmp.ge.s32.totalorder %s935_s14, 1  ;;  %s935_s14 = sphi %s961_s14, %s13_s14   ;;  %s931_s13 = sphi %s959_s13, %s1040_s13   ;;  %s927_s12 = sphi %s957_s12, %s1039_s12  }
   0x3   : > { %p27_p1 = scmp.ge.s32.totalorder %s25_s15, 3  ;;  %p176_p2 = scmp.lt.s32.totalorder %s935_s14, 4 }
   0x5   : > { %s1042_s15 = smov (%p27_p1, %s25_s15), 0  ;;  %p177_p3 = pnand %p701_p0, %p176_p2 }
   0x6   : > { %p217_p4 = scmp.lt.s32.totalorder (!%p177_p3), %s927_s12, 2 }
   0x7   : > { %180 = sbr.rel (%p177_p3) target bundleno = 283 (0x11b), region = 32 }
   0xe   : > { %s1044_s12 = smov (!%p217_p4, %s927_s12), 2 }
   0xf   : > { %s978_s16 = sshll.u32 %s1044_s12, 6  ;;  %s233_s25 = scalar_lea.vmem %s1037_s2, %s1044_s12 }
  0x10   : > { %s984_s19 = scalar_lea.vmem %s1036_s1, %s978_s16  ;;  %s993_s22 = scalar_lea.vmem %s1035_s0, %s978_s16  ;;  %v708_v16 = vld [vmem:[%s233_s25] ss:$0 sm:$0xff] }
  0x11   : > { %v897_v0 = vld [vmem:[%s984_s19] sm:$0xff]   ;;  %v898_v1 = vld [vmem:[%s984_s19 + $0x8] sm:$0xff]   ;;  %v899_v2 = vld [vmem:[%s984_s19 + $0x10] sm:$0xff]   ;;  %s1016_s28 = scalar_lea.vmem %s1038_s3, %s978_s16 }
  0x12   : > { %825 = vmatprep.subr.bf16.mxu0 %v897_v0  ;;  %857 = vmatprep.subr.bf16.mxu1 %v897_v0  ;;  %v900_v3 = vld [vmem:[%s984_s19 + $0x18] sm:$0xff]   ;;  %v905_v4 = vld [vmem:[%s993_s22] sm:$0xff]   ;;  %v902_v7 = vld [vmem:[%s984_s19 + $0x28] sm:$0xff]  }
  0x13   : > { %826 = vmatpush3.bf16.msra.mxu0 %v897_v0  ;;  %865 = vmatpush3.bf16.msra.mxu1 %v897_v0  ;;  %v906_v5 = vld [vmem:[%s993_s22 + $0x20] sm:$0xff]   ;;  %v903_v8 = vld [vmem:[%s984_s19 + $0x30] sm:$0xff]   ;;  %v904_v9 = vld [vmem:[%s984_s19 + $0x38] sm:$0xff]  }
  0x14   : > { %827 = vmatprep.subr.bf16.mxu0 %v898_v1  ;;  %858 = vmatprep.subr.bf16.mxu1 %v898_v1  ;;  %v901_v6 = vld [vmem:[%s984_s19 + $0x20] sm:$0xff]   ;;  %v907_v10 = vld [vmem:[%s993_s22 + $0x8] sm:$0xff]   ;;  %v909_v12 = vld [vmem:[%s993_s22 + $0x10] sm:$0xff]  }
  0x15   : > { %841 = vmatprep.mubr.bf16.mxu0 %v905_v4  ;;  %849 = vmatprep.mubr.bf16.mxu1 %v906_v5  ;;  %v908_v11 = vld [vmem:[%s993_s22 + $0x28] sm:$0xff]   ;;  %v910_v13 = vld [vmem:[%s993_s22 + $0x30] sm:$0xff]   ;;  %v911_v14 = vld [vmem:[%s993_s22 + $0x18] sm:$0xff]  }
  0x16   : > { %v912_v15 = vld [vmem:[%s993_s22 + $0x38] sm:$0xff]  }
  0x17   : > { %828 = vmatpush3.bf16.msra.mxu0 %v898_v1  ;;  %866 = vmatpush3.bf16.msra.mxu1 %v898_v1 }
  0x18   : > { %829 = vmatprep.subr.bf16.mxu0 %v899_v2  ;;  %859 = vmatprep.subr.bf16.mxu1 %v899_v2 }
  0x1b   : > { %830 = vmatpush3.bf16.msra.mxu0 %v899_v2  ;;  %867 = vmatpush3.bf16.msra.mxu1 %v899_v2 }
  0x1c   : > { %831 = vmatprep.subr.bf16.mxu0 %v900_v3  ;;  %860 = vmatprep.subr.bf16.mxu1 %v900_v3 }
  0x1f   : > { %832 = vmatpush3.bf16.msra.mxu0 %v900_v3  ;;  %868 = vmatpush3.bf16.msra.mxu1 %v900_v3 }
  0x20   : > { %833 = vmatprep.subr.bf16.mxu0 %v901_v6  ;;  %861 = vmatprep.subr.bf16.mxu1 %v901_v6 }
  0x23   : > { %834 = vmatpush3.bf16.msra.mxu0 %v901_v6  ;;  %869 = vmatpush3.bf16.msra.mxu1 %v901_v6 }
  0x24   : > { %835 = vmatprep.subr.bf16.mxu0 %v902_v7  ;;  %862 = vmatprep.subr.bf16.mxu1 %v902_v7 }
  0x27   : > { %836 = vmatpush3.bf16.msra.mxu0 %v902_v7  ;;  %870 = vmatpush3.bf16.msra.mxu1 %v902_v7 }
  0x28   : > { %837 = vmatprep.subr.bf16.mxu0 %v903_v8  ;;  %863 = vmatprep.subr.bf16.mxu1 %v903_v8 }
  0x2b   : > { %838 = vmatpush3.bf16.msra.mxu0 %v903_v8  ;;  %871 = vmatpush3.bf16.msra.mxu1 %v903_v8 }
  0x2c   : > { %839 = vmatprep.subr.bf16.mxu0 %v904_v9  ;;  %864 = vmatprep.subr.bf16.mxu1 %v904_v9 }
  0x2f   : > { %840 = vmatpush3.bf16.msra.mxu0 %v904_v9  ;;  %872 = vmatpush3.bf16.msra.mxu1 %v904_v9 }
  0x32   : > { %842 = vmatmul.mubr.bf16.vlgmr.msra.gmra.mrb[0].mxu0 %v907_v10  ;;  %850 = vmatmul.mubr.bf16.vlgmr.msra.gmra.mrb[0].mxu1 %v908_v11 }
  0x33   : > { %845 = vmatprep.mubr.bf16.mxu0 %v909_v12  ;;  %853 = vmatprep.mubr.bf16.mxu1 %v910_v13 }
  0x3a   : > { %846 = vmatmul.mubr.bf16.gmra.mrb[4].mxu0 %v911_v14  ;;  %854 = vmatmul.mubr.bf16.gmra.mrb[4].mxu1 %v912_v15 }
 0x105   : > { %v843_v17 = vpop.f32.mrb[0].mxu0  ;;  %v851_v18 = vpop.f32.mrb[0].mxu1 }
 0x106   : > { %v423_v19 = vadd.f32 %v843_v17, %v708_v16  ;;  %v455_v20 = vadd.f32 %v851_v18, %v708_v16  ;;  %v414_v21 = vpop.f32.mrb[1].mxu0  ;;  %v446_v22 = vpop.f32.mrb[1].mxu1 }
 0x107   : > { %v415_v23 = vadd.f32 %v708_v16, %v414_v21  ;;  %v447_v24 = vadd.f32 %v708_v16, %v446_v22  ;;  %v844_v25 = vpop.f32.mrb[2].mxu0  ;;  %v852_v26 = vpop.f32.mrb[2].mxu1 }
 0x108   : > { %v479_v27 = vmul.f32 0.01, %v423_v19  ;;  %v487_v28 = vmul.f32 0.01, %v455_v20  ;;  %v426_v29 = vadd.f32 %v844_v25, %v708_v16  ;;  %v458_v30 = vadd.f32 %v852_v26, %v708_v16  ;;  %v417_v31 = vpop.f32.mrb[3].mxu0  ;;  %v449_v32 = vpop.f32.mrb[3].mxu1 }
 0x109   : > { %v477_v33 = vmul.f32 0.01, %v415_v23  ;;  %v485_v34 = vmul.f32 0.01, %v447_v24  ;;  %v418_v35 = vadd.f32 %v708_v16, %v417_v31  ;;  %v450_v36 = vadd.f32 %v708_v16, %v449_v32 }
 0x10a   : > { %v480_v37 = vmul.f32 0.01, %v426_v29  ;;  %v488_v38 = vmul.f32 0.01, %v458_v30  ;;  %v495_v41 = vmax.f32 %v423_v19, %v479_v27  ;;  %v503_v42 = vmax.f32 %v455_v20, %v487_v28 }
 0x10b   : > { %v478_v39 = vmul.f32 0.01, %v418_v35  ;;  %v486_v40 = vmul.f32 0.01, %v450_v36  ;;  %v493_v45 = vmax.f32 %v415_v23, %v477_v33  ;;  %v501_v46 = vmax.f32 %v447_v24, %v485_v34 }
 0x10c   : > { %v496_v43 = vmax.f32 %v426_v29, %v480_v37  ;;  %v504_v44 = vmax.f32 %v458_v30, %v488_v38 }
 0x10d   : > { %v494_v47 = vmax.f32 %v418_v35, %v478_v39  ;;  %v502_v48 = vmax.f32 %v450_v36, %v486_v40  ;;  %v847_v49 = vpop.f32.mrb[4].mxu0  ;;  %v855_v50 = vpop.f32.mrb[4].mxu1 }
 0x10e   : > { %v770_v51 = vpack.c.bf16 %v496_v43, %v495_v41  ;;  %v790_v52 = vpack.c.bf16 %v504_v44, %v503_v42  ;;  %v439_v53 = vadd.f32 %v847_v49, %v708_v16  ;;  %v471_v54 = vadd.f32 %v855_v50, %v708_v16  ;;  %v430_v55 = vpop.f32.mrb[5].mxu0  ;;  %v462_v56 = vpop.f32.mrb[5].mxu1 }
 0x10f   : > { %v765_v57 = vpack.c.bf16 %v494_v47, %v493_v45  ;;  %v785_v58 = vpack.c.bf16 %v502_v48, %v501_v46  ;;  %v431_v59 = vadd.f32 %v708_v16, %v430_v55  ;;  %v463_v60 = vadd.f32 %v708_v16, %v462_v56  ;;  %v848_v61 = vpop.f32.mrb[6].mxu0  ;;  %v856_v62 = vpop.f32.mrb[6].mxu1 }
 0x110   : > { %802 = vst [vmem:[%s1016_s28 + $0x8] sm:$0xff] %v770_v51   ;;  %806 = vst [vmem:[%s1016_s28 + $0x28] sm:$0xff] %v790_v52   ;;  %v483_v63 = vmul.f32 0.01, %v439_v53  ;;  %v491_v0 = vmul.f32 0.01, %v471_v54  ;;  %v442_v1 = vadd.f32 %v848_v61, %v708_v16  ;;  %v474_v2 = vadd.f32 %v856_v62, %v708_v16 }
 0x111   : > { %v433_v3 = vpop.f32.mrb[7].mxu0  ;;  %v465_v4 = vpop.f32.mrb[7].mxu1  ;;  %766 = vst [vmem:[%s1016_s28] sm:$0xff] %v765_v57   ;;  %805 = vst [vmem:[%s1016_s28 + $0x20] sm:$0xff] %v785_v58   ;;  %v481_v5 = vmul.f32 0.01, %v431_v59 }
 0x112   : > { %v489_v6 = vmul.f32 0.01, %v463_v60  ;;  %v434_v7 = vadd.f32 %v708_v16, %v433_v3  ;;  %v466_v8 = vadd.f32 %v708_v16, %v465_v4  ;;  %v484_v9 = vmul.f32 0.01, %v442_v1 }
 0x113   : > { %v492_v10 = vmul.f32 0.01, %v474_v2  ;;  %v499_v13 = vmax.f32 %v439_v53, %v483_v63  ;;  %v507_v14 = vmax.f32 %v471_v54, %v491_v0  ;;  %v497_v18 = vmax.f32 %v431_v59, %v481_v5 }
 0x114   : > { %v482_v11 = vmul.f32 0.01, %v434_v7  ;;  %v490_v12 = vmul.f32 0.01, %v466_v8  ;;  %v500_v15 = vmax.f32 %v442_v1, %v484_v9  ;;  %v505_v19 = vmax.f32 %v463_v60, %v489_v6 }
 0x115   : > { %v508_v17 = vmax.f32 %v474_v2, %v492_v10 }
 0x116   : > { %v498_v20 = vmax.f32 %v434_v7, %v482_v11  ;;  %v506_v21 = vmax.f32 %v466_v8, %v490_v12  ;;  %v780_v22 = vpack.c.bf16 %v500_v15, %v499_v13 }
 0x117   : > { %v800_v23 = vpack.c.bf16 %v508_v17, %v507_v14 }
 0x118   : > { %v775_v24 = vpack.c.bf16 %v498_v20, %v497_v18  ;;  %v795_v16 = vpack.c.bf16 %v506_v21, %v505_v19  ;;  %804 = vst [vmem:[%s1016_s28 + $0x18] sm:$0xff] %v780_v22  }
 0x119   : > { %808 = vst [vmem:[%s1016_s28 + $0x38] sm:$0xff] %v800_v23  }
 0x11a   : > { %803 = vst [vmem:[%s1016_s28 + $0x10] sm:$0xff] %v775_v24   ;;  %807 = vst [vmem:[%s1016_s28 + $0x30] sm:$0xff] %v795_v16  }
 0x11b PF: > { %s13_s14 = sadd.s32 1, %s935_s14   ;;  %s1039_s12 = smov %s931_s13 }
 0x11c   : > { %p10_p5 = scmp.ge.s32.totalorder %s13_s14, 5   ;;  %s1040_s13 = smov %s1042_s15 }
 0x11e   :  { %12 = sbr.rel (!%p10_p5) target bundleno = 2 (0x2), region = 68 }

// kernel: _lambda_.17
= control target key start
LH: loop header
LB: loop body
LE: loop exit
PB: predicated region body
PF: predicated region fallthrough
CT: control target
= control target key end

     0   :  { %s634_s1 = inlined_call_operand.vmem [shape: bf16[1,128,128], index: 1, kind: input, shape index: {}]   ;;  %s635_s0 = inlined_call_operand.vmem [shape: bf16[1,128,128], index: 0, kind: input, shape index: {}]   ;;  %s636_s2 = inlined_call_operand.vmem [shape: f32[1,1,128], index: 2, kind: input, shape index: {}]   ;;  %s637_s3 = inlined_call_operand.vmem [shape: bf16[1,128,128], index: 3, kind: output, shape index: {}]  }
   0x1   :  { %v523_v0 = vld [vmem:[%s634_s1] sm:$0xff]   ;;  %v524_v1 = vld [vmem:[%s634_s1 + $0x8] sm:$0xff]   ;;  %v525_v2 = vld [vmem:[%s634_s1 + $0x10] sm:$0xff]  }
   0x2   :  { %475 = vmatprep.subr.bf16.mxu0 %v523_v0  ;;  %507 = vmatprep.subr.bf16.mxu1 %v523_v0  ;;  %v526_v3 = vld [vmem:[%s634_s1 + $0x18] sm:$0xff]   ;;  %v531_v4 = vld [vmem:[%s635_s0] sm:$0xff]   ;;  %v528_v7 = vld [vmem:[%s634_s1 + $0x28] sm:$0xff]  }
   0x3   :  { %476 = vmatpush3.bf16.msra.mxu0 %v523_v0  ;;  %515 = vmatpush3.bf16.msra.mxu1 %v523_v0  ;;  %v532_v5 = vld [vmem:[%s635_s0 + $0x20] sm:$0xff]   ;;  %v529_v8 = vld [vmem:[%s634_s1 + $0x30] sm:$0xff]   ;;  %v530_v9 = vld [vmem:[%s634_s1 + $0x38] sm:$0xff]  }
   0x4   :  { %477 = vmatprep.subr.bf16.mxu0 %v524_v1  ;;  %508 = vmatprep.subr.bf16.mxu1 %v524_v1  ;;  %v527_v6 = vld [vmem:[%s634_s1 + $0x20] sm:$0xff]   ;;  %v533_v10 = vld [vmem:[%s635_s0 + $0x8] sm:$0xff]   ;;  %v535_v12 = vld [vmem:[%s635_s0 + $0x10] sm:$0xff]  }
   0x5   :  { %491 = vmatprep.mubr.bf16.mxu0 %v531_v4  ;;  %499 = vmatprep.mubr.bf16.mxu1 %v532_v5  ;;  %v534_v11 = vld [vmem:[%s635_s0 + $0x28] sm:$0xff]   ;;  %v536_v13 = vld [vmem:[%s635_s0 + $0x30] sm:$0xff]   ;;  %v537_v14 = vld [vmem:[%s635_s0 + $0x18] sm:$0xff]  }
   0x6   :  { %v538_v15 = vld [vmem:[%s635_s0 + $0x38] sm:$0xff]   ;;  %v363_v16 = vld [vmem:[%s636_s2] ss:$0 sm:$0xff] }
   0x7   :  { %478 = vmatpush3.bf16.msra.mxu0 %v524_v1  ;;  %516 = vmatpush3.bf16.msra.mxu1 %v524_v1 }
   0x8   :  { %479 = vmatprep.subr.bf16.mxu0 %v525_v2  ;;  %509 = vmatprep.subr.bf16.mxu1 %v525_v2 }
   0xb   :  { %480 = vmatpush3.bf16.msra.mxu0 %v525_v2  ;;  %517 = vmatpush3.bf16.msra.mxu1 %v525_v2 }
   0xc   :  { %481 = vmatprep.subr.bf16.mxu0 %v526_v3  ;;  %510 = vmatprep.subr.bf16.mxu1 %v526_v3 }
   0xf   :  { %482 = vmatpush3.bf16.msra.mxu0 %v526_v3  ;;  %518 = vmatpush3.bf16.msra.mxu1 %v526_v3 }
  0x10   :  { %483 = vmatprep.subr.bf16.mxu0 %v527_v6  ;;  %511 = vmatprep.subr.bf16.mxu1 %v527_v6 }
  0x13   :  { %484 = vmatpush3.bf16.msra.mxu0 %v527_v6  ;;  %519 = vmatpush3.bf16.msra.mxu1 %v527_v6 }
  0x14   :  { %485 = vmatprep.subr.bf16.mxu0 %v528_v7  ;;  %512 = vmatprep.subr.bf16.mxu1 %v528_v7 }
  0x17   :  { %486 = vmatpush3.bf16.msra.mxu0 %v528_v7  ;;  %520 = vmatpush3.bf16.msra.mxu1 %v528_v7 }
  0x18   :  { %487 = vmatprep.subr.bf16.mxu0 %v529_v8  ;;  %513 = vmatprep.subr.bf16.mxu1 %v529_v8 }
  0x1b   :  { %488 = vmatpush3.bf16.msra.mxu0 %v529_v8  ;;  %521 = vmatpush3.bf16.msra.mxu1 %v529_v8 }
  0x1c   :  { %489 = vmatprep.subr.bf16.mxu0 %v530_v9  ;;  %514 = vmatprep.subr.bf16.mxu1 %v530_v9 }
  0x1f   :  { %490 = vmatpush3.bf16.msra.mxu0 %v530_v9  ;;  %522 = vmatpush3.bf16.msra.mxu1 %v530_v9 }
  0x22   :  { %492 = vmatmul.mubr.bf16.vlgmr.msra.gmra.mrb[0].mxu0 %v533_v10  ;;  %500 = vmatmul.mubr.bf16.vlgmr.msra.gmra.mrb[0].mxu1 %v534_v11 }
  0x23   :  { %495 = vmatprep.mubr.bf16.mxu0 %v535_v12  ;;  %503 = vmatprep.mubr.bf16.mxu1 %v536_v13 }
  0x2a   :  { %496 = vmatmul.mubr.bf16.gmra.mrb[4].mxu0 %v537_v14  ;;  %504 = vmatmul.mubr.bf16.gmra.mrb[4].mxu1 %v538_v15 }
  0xf5   :  { %v493_v17 = vpop.f32.mrb[0].mxu0  ;;  %v501_v18 = vpop.f32.mrb[0].mxu1 }
  0xf6   :  { %v193_v19 = vadd.f32 %v493_v17, %v363_v16  ;;  %v225_v20 = vadd.f32 %v501_v18, %v363_v16  ;;  %v184_v21 = vpop.f32.mrb[1].mxu0  ;;  %v216_v22 = vpop.f32.mrb[1].mxu1 }
  0xf7   :  { %v185_v23 = vadd.f32 %v363_v16, %v184_v21  ;;  %v217_v24 = vadd.f32 %v363_v16, %v216_v22  ;;  %v494_v25 = vpop.f32.mrb[2].mxu0  ;;  %v502_v26 = vpop.f32.mrb[2].mxu1 }
  0xf8   :  { %v249_v27 = vmul.f32 0.01, %v193_v19  ;;  %v257_v28 = vmul.f32 0.01, %v225_v20  ;;  %v196_v29 = vadd.f32 %v494_v25, %v363_v16  ;;  %v228_v30 = vadd.f32 %v502_v26, %v363_v16  ;;  %v187_v31 = vpop.f32.mrb[3].mxu0  ;;  %v219_v32 = vpop.f32.mrb[3].mxu1 }
  0xf9   :  { %v247_v33 = vmul.f32 0.01, %v185_v23  ;;  %v255_v34 = vmul.f32 0.01, %v217_v24  ;;  %v188_v35 = vadd.f32 %v363_v16, %v187_v31  ;;  %v220_v36 = vadd.f32 %v363_v16, %v219_v32 }
  0xfa   :  { %v250_v37 = vmul.f32 0.01, %v196_v29  ;;  %v258_v38 = vmul.f32 0.01, %v228_v30  ;;  %v265_v41 = vmax.f32 %v193_v19, %v249_v27  ;;  %v273_v42 = vmax.f32 %v225_v20, %v257_v28 }
  0xfb   :  { %v248_v39 = vmul.f32 0.01, %v188_v35  ;;  %v256_v40 = vmul.f32 0.01, %v220_v36  ;;  %v263_v45 = vmax.f32 %v185_v23, %v247_v33  ;;  %v271_v46 = vmax.f32 %v217_v24, %v255_v34 }
  0xfc   :  { %v266_v43 = vmax.f32 %v196_v29, %v250_v37  ;;  %v274_v44 = vmax.f32 %v228_v30, %v258_v38 }
  0xfd   :  { %v264_v47 = vmax.f32 %v188_v35, %v248_v39  ;;  %v272_v48 = vmax.f32 %v220_v36, %v256_v40  ;;  %v497_v49 = vpop.f32.mrb[4].mxu0  ;;  %v505_v50 = vpop.f32.mrb[4].mxu1 }
  0xfe   :  { %v420_v51 = vpack.c.bf16 %v266_v43, %v265_v41  ;;  %v440_v52 = vpack.c.bf16 %v274_v44, %v273_v42  ;;  %v209_v53 = vadd.f32 %v497_v49, %v363_v16  ;;  %v241_v54 = vadd.f32 %v505_v50, %v363_v16  ;;  %v200_v55 = vpop.f32.mrb[5].mxu0  ;;  %v232_v56 = vpop.f32.mrb[5].mxu1 }
  0xff   :  { %v415_v57 = vpack.c.bf16 %v264_v47, %v263_v45  ;;  %v435_v58 = vpack.c.bf16 %v272_v48, %v271_v46  ;;  %v201_v59 = vadd.f32 %v363_v16, %v200_v55  ;;  %v233_v60 = vadd.f32 %v363_v16, %v232_v56  ;;  %v498_v61 = vpop.f32.mrb[6].mxu0  ;;  %v506_v62 = vpop.f32.mrb[6].mxu1 }
 0x100   :  { %452 = vst [vmem:[%s637_s3 + $0x8] sm:$0xff] %v420_v51   ;;  %456 = vst [vmem:[%s637_s3 + $0x28] sm:$0xff] %v440_v52   ;;  %v253_v63 = vmul.f32 0.01, %v209_v53  ;;  %v261_v0 = vmul.f32 0.01, %v241_v54  ;;  %v212_v1 = vadd.f32 %v498_v61, %v363_v16  ;;  %v244_v2 = vadd.f32 %v506_v62, %v363_v16 }
 0x101   :  { %v203_v3 = vpop.f32.mrb[7].mxu0  ;;  %v235_v4 = vpop.f32.mrb[7].mxu1  ;;  %416 = vst [vmem:[%s637_s3] sm:$0xff] %v415_v57   ;;  %455 = vst [vmem:[%s637_s3 + $0x20] sm:$0xff] %v435_v58   ;;  %v251_v5 = vmul.f32 0.01, %v201_v59 }
 0x102   :  { %v259_v6 = vmul.f32 0.01, %v233_v60  ;;  %v204_v7 = vadd.f32 %v363_v16, %v203_v3  ;;  %v236_v8 = vadd.f32 %v363_v16, %v235_v4  ;;  %v254_v9 = vmul.f32 0.01, %v212_v1 }
 0x103   :  { %v262_v10 = vmul.f32 0.01, %v244_v2  ;;  %v269_v13 = vmax.f32 %v209_v53, %v253_v63  ;;  %v277_v14 = vmax.f32 %v241_v54, %v261_v0  ;;  %v267_v18 = vmax.f32 %v201_v59, %v251_v5 }
 0x104   :  { %v252_v11 = vmul.f32 0.01, %v204_v7  ;;  %v260_v12 = vmul.f32 0.01, %v236_v8  ;;  %v270_v15 = vmax.f32 %v212_v1, %v254_v9  ;;  %v275_v19 = vmax.f32 %v233_v60, %v259_v6 }
 0x105   :  { %v278_v17 = vmax.f32 %v244_v2, %v262_v10 }
 0x106   :  { %v268_v20 = vmax.f32 %v204_v7, %v252_v11  ;;  %v276_v21 = vmax.f32 %v236_v8, %v260_v12  ;;  %v430_v22 = vpack.c.bf16 %v270_v15, %v269_v13 }
 0x107   :  { %v450_v23 = vpack.c.bf16 %v278_v17, %v277_v14 }
 0x108   :  { %v425_v24 = vpack.c.bf16 %v268_v20, %v267_v18  ;;  %v445_v25 = vpack.c.bf16 %v276_v21, %v275_v19  ;;  %454 = vst [vmem:[%s637_s3 + $0x18] sm:$0xff] %v430_v22  }
 0x109   :  { %458 = vst [vmem:[%s637_s3 + $0x38] sm:$0xff] %v450_v23  }
 0x10a   :  { %453 = vst [vmem:[%s637_s3 + $0x10] sm:$0xff] %v425_v24   ;;  %457 = vst [vmem:[%s637_s3 + $0x30] sm:$0xff] %v445_v25  }

// kernel: _lambda_.16
= control target key start
LH: loop header
LB: loop body
LE: loop exit
PB: predicated region body
PF: predicated region fallthrough
CT: control target
= control target key end

     0   :  { %s1995_s1 = inlined_call_operand.vmem [shape: bf16[3,128,128], index: 1, kind: input, shape index: {}]   ;;  %s1996_s0 = inlined_call_operand.vmem [shape: bf16[3,128,128], index: 0, kind: input, shape index: {}]   ;;  %s1997_s3 = inlined_call_operand.vmem [shape: bf16[128,128], index: 3, kind: input, shape index: {}]   ;;  %s1998_s2 = inlined_call_operand.vmem [shape: bf16[128,128], index: 2, kind: input, shape index: {}]   ;;  %s1999_s4 = inlined_call_operand.vmem [shape: f32[1,128], index: 4, kind: input, shape index: {}]   ;;  %s2000_s5 = inlined_call_operand.vmem [shape: f32[1,128], index: 5, kind: input, shape index: {}]   ;;  %s2001_s6 = inlined_call_operand.vmem [shape: f32[1,128], index: 6, kind: input, shape index: {}]   ;;  %s2002_s7 = inlined_call_operand.vmem [shape: bf16[128,128], index: 7, kind: output, shape index: {}]  }
   0x1   :  { %v1582_v0 = vld [vmem:[%s1995_s1 + $0x40] sm:$0xff]   ;;  %v1584_v2 = vld [vmem:[%s1995_s1 + $0x48] sm:$0xff]   ;;  %v1586_v4 = vld [vmem:[%s1995_s1 + $0x50] sm:$0xff]  }
   0x2   :  { %v1583_v1 = vld [vmem:[%s1995_s1] sm:$0xff]   ;;  %1422 = vmatprep.subr.bf16.mxu1 %v1582_v0  ;;  %v1585_v3 = vld [vmem:[%s1995_s1 + $0x8] sm:$0xff]   ;;  %v1587_v5 = vld [vmem:[%s1995_s1 + $0x10] sm:$0xff]  }
   0x3   :  { %1454 = vmatprep.subr.bf16.mxu0 %v1583_v1  ;;  %1423 = vmatpush3.bf16.msra.mxu1 %v1582_v0  ;;  %v1588_v6 = vld [vmem:[%s1995_s1 + $0x58] sm:$0xff]   ;;  %v1590_v8 = vld [vmem:[%s1995_s1 + $0x60] sm:$0xff]   ;;  %v1592_v10 = vld [vmem:[%s1995_s1 + $0x68] sm:$0xff]  }
   0x4   :  { %1455 = vmatpush3.bf16.msra.mxu0 %v1583_v1  ;;  %1424 = vmatprep.subr.bf16.mxu1 %v1584_v2  ;;  %v1589_v7 = vld [vmem:[%s1995_s1 + $0x18] sm:$0xff]   ;;  %v1591_v9 = vld [vmem:[%s1995_s1 + $0x20] sm:$0xff]   ;;  %v1593_v11 = vld [vmem:[%s1995_s1 + $0x28] sm:$0xff]  }
   0x5   :  { %1456 = vmatprep.subr.bf16.mxu0 %v1585_v3  ;;  %v1598_v12 = vld [vmem:[%s1996_s0 + $0x40] sm:$0xff]   ;;  %v1594_v14 = vld [vmem:[%s1995_s1 + $0x70] sm:$0xff]   ;;  %v1596_v16 = vld [vmem:[%s1995_s1 + $0x78] sm:$0xff]  }
   0x6   :  { %v1599_v13 = vld [vmem:[%s1996_s0] sm:$0xff]   ;;  %1438 = vmatprep.mubr.bf16.mxu1 %v1598_v12  ;;  %v1595_v15 = vld [vmem:[%s1995_s1 + $0x30] sm:$0xff]   ;;  %v1597_v17 = vld [vmem:[%s1995_s1 + $0x38] sm:$0xff]  }
   0x7   :  { %1425 = vmatpush3.bf16.msra.mxu1 %v1584_v2  ;;  %1470 = vmatprep.mubr.bf16.mxu0 %v1599_v13  ;;  %v1600_v18 = vld [vmem:[%s1996_s0 + $0x48] sm:$0xff]   ;;  %v1603_v19 = vld [vmem:[%s1997_s3] sm:$0xff]   ;;  %v1606_v24 = vld [vmem:[%s1996_s0 + $0x50] sm:$0xff]  }
   0x8   :  { %1457 = vmatpush3.bf16.msra.mxu0 %v1585_v3  ;;  %1426 = vmatprep.subr.bf16.mxu1 %v1586_v4  ;;  %v1602_v20 = vld [vmem:[%s1995_s1 + $0x80] sm:$0xff]   ;;  %v1601_v21 = vld [vmem:[%s1996_s0 + $0x8] sm:$0xff]   ;;  %v1607_v25 = vld [vmem:[%s1996_s0 + $0x10] sm:$0xff]  }
   0x9   :  { %1458 = vmatprep.subr.bf16.mxu0 %v1587_v5  ;;  %v1604_v22 = vld [vmem:[%s1995_s1 + $0x88] sm:$0xff]   ;;  %v1608_v26 = vld [vmem:[%s1996_s0 + $0x58] sm:$0xff]   ;;  %v1611_v27 = vld [vmem:[%s1997_s3 + $0x10] sm:$0xff]  }
   0xa   :  { %v1605_v23 = vld [vmem:[%s1997_s3 + $0x8] sm:$0xff]   ;;  %v1610_v28 = vld [vmem:[%s1995_s1 + $0x90] sm:$0xff]   ;;  %v1609_v29 = vld [vmem:[%s1996_s0 + $0x18] sm:$0xff]  }
   0xb   :  { %1427 = vmatpush3.bf16.msra.mxu1 %v1586_v4  ;;  %v1612_v30 = vld [vmem:[%s1995_s1 + $0x98] sm:$0xff]   ;;  %v1614_v32 = vld [vmem:[%s1996_s0 + $0x60] sm:$0xff]   ;;  %v1616_v34 = vld [vmem:[%s1996_s0 + $0x68] sm:$0xff]  }
   0xc   :  { %1459 = vmatpush3.bf16.msra.mxu0 %v1587_v5  ;;  %1428 = vmatprep.subr.bf16.mxu1 %v1588_v6  ;;  %v1613_v31 = vld [vmem:[%s1997_s3 + $0x18] sm:$0xff]   ;;  %v1615_v33 = vld [vmem:[%s1996_s0 + $0x20] sm:$0xff]   ;;  %v1617_v37 = vld [vmem:[%s1996_s0 + $0x28] sm:$0xff]  }
   0xd   :  { %1460 = vmatprep.subr.bf16.mxu0 %v1589_v7  ;;  %v1619_v35 = vld [vmem:[%s1997_s3 + $0x20] sm:$0xff]   ;;  %v1620_v38 = vld [vmem:[%s1995_s1 + $0xa8] sm:$0xff]   ;;  %v1622_v40 = vld [vmem:[%s1996_s0 + $0x70] sm:$0xff]  }
   0xe   :  { %v1618_v36 = vld [vmem:[%s1995_s1 + $0xa0] sm:$0xff]   ;;  %v1621_v39 = vld [vmem:[%s1997_s3 + $0x28] sm:$0xff]   ;;  %v1623_v41 = vld [vmem:[%s1996_s0 + $0x30] sm:$0xff]  }
   0xf   :  { %1429 = vmatpush3.bf16.msra.mxu1 %v1588_v6  ;;  %v1624_v42 = vld [vmem:[%s1996_s0 + $0x78] sm:$0xff]   ;;  %v1627_v43 = vld [vmem:[%s1997_s3 + $0x30] sm:$0xff]   ;;  %v1630_v48 = vld [vmem:[%s1996_s0 + $0x80] sm:$0xff]  }
  0x10   :  { %1461 = vmatpush3.bf16.msra.mxu0 %v1589_v7  ;;  %1430 = vmatprep.subr.bf16.mxu1 %v1590_v8  ;;  %v1626_v44 = vld [vmem:[%s1995_s1 + $0xb0] sm:$0xff]   ;;  %v1625_v45 = vld [vmem:[%s1996_s0 + $0x38] sm:$0xff]   ;;  %v1631_v49 = vld [vmem:[%s1998_s2] sm:$0xff]  }
  0x11   :  { %1462 = vmatprep.subr.bf16.mxu0 %v1591_v9  ;;  %v1628_v46 = vld [vmem:[%s1995_s1 + $0xb8] sm:$0xff]   ;;  %v1632_v50 = vld [vmem:[%s1996_s0 + $0x88] sm:$0xff]   ;;  %v1635_v52 = vld [vmem:[%s1998_s2 + $0x10] sm:$0xff]  }
  0x12   :  { %v1629_v47 = vld [vmem:[%s1997_s3 + $0x38] sm:$0xff]   ;;  %v1633_v51 = vld [vmem:[%s1998_s2 + $0x8] sm:$0xff]   ;;  %v1634_v53 = vld [vmem:[%s1996_s0 + $0x90] sm:$0xff]  }
  0x13   :  { %1431 = vmatpush3.bf16.msra.mxu1 %v1590_v8  ;;  %v1637_v54 = vld [vmem:[%s1998_s2 + $0x18] sm:$0xff]   ;;  %v1639_v56 = vld [vmem:[%s1998_s2 + $0x20] sm:$0xff]   ;;  %v1641_v58 = vld [vmem:[%s1998_s2 + $0x28] sm:$0xff]  }
  0x14   :  { %1463 = vmatpush3.bf16.msra.mxu0 %v1591_v9  ;;  %1432 = vmatprep.subr.bf16.mxu1 %v1592_v10  ;;  %v1636_v55 = vld [vmem:[%s1996_s0 + $0x98] sm:$0xff]   ;;  %v1638_v57 = vld [vmem:[%s1996_s0 + $0xa0] sm:$0xff]   ;;  %v1640_v59 = vld [vmem:[%s1996_s0 + $0xa8] sm:$0xff]  }
  0x15   :  { %1464 = vmatprep.subr.bf16.mxu0 %v1593_v11  ;;  %v1643_v60 = vld [vmem:[%s1998_s2 + $0x30] sm:$0xff]   ;;  %v1645_v62 = vld [vmem:[%s1998_s2 + $0x38] sm:$0xff]  }
  0x16   :  { %v1642_v61 = vld [vmem:[%s1996_s0 + $0xb0] sm:$0xff]   ;;  %v1644_v63 = vld [vmem:[%s1996_s0 + $0xb8] sm:$0xff]  }
  0x17   :  { %1433 = vmatpush3.bf16.msra.mxu1 %v1592_v10 }
  0x18   :  { %1465 = vmatpush3.bf16.msra.mxu0 %v1593_v11  ;;  %1434 = vmatprep.subr.bf16.mxu1 %v1594_v14 }
  0x19   :  { %1466 = vmatprep.subr.bf16.mxu0 %v1595_v15 }
  0x1b   :  { %1435 = vmatpush3.bf16.msra.mxu1 %v1594_v14 }
  0x1c   :  { %1467 = vmatpush3.bf16.msra.mxu0 %v1595_v15  ;;  %1436 = vmatprep.subr.bf16.mxu1 %v1596_v16 }
  0x1d   :  { %1468 = vmatprep.subr.bf16.mxu0 %v1597_v17 }
  0x1f   :  { %1437 = vmatpush3.bf16.msra.mxu1 %v1596_v16  ;;  %v1901_v16 = vld [vmem:[%s1999_s4] ss:$0 sm:$0xff] }
  0x20   :  { %1469 = vmatpush3.bf16.msra.mxu0 %v1597_v17  ;;  %1518 = vmatprep.subr.bf16.mxu1 %v1603_v19 }
  0x21   :  { %1486 = vmatprep.subr.bf16.mxu0 %v1602_v20 }
  0x22   :  { %1439 = vmatmul.mubr.bf16.vlgmr.msra.gmra.mrb[0].mxu1 %v1600_v18 }
  0x23   :  { %1471 = vmatmul.mubr.bf16.vlgmr.msra.gmra.mrb[0].mxu0 %v1601_v21  ;;  %1519 = vmatpush3.bf16.msra.mxu1 %v1603_v19 }
  0x24   :  { %1487 = vmatpush3.bf16.msra.mxu0 %v1602_v20  ;;  %1520 = vmatprep.subr.bf16.mxu1 %v1605_v23 }
  0x25   :  { %1488 = vmatprep.subr.bf16.mxu0 %v1604_v22  ;;  %1442 = vmatprep.mubr.bf16.mxu1 %v1606_v24 }
  0x26   :  { %1474 = vmatprep.mubr.bf16.mxu0 %v1607_v25 }
  0x27   :  { %1521 = vmatpush3.bf16.msra.mxu1 %v1605_v23 }
  0x28   :  { %1489 = vmatpush3.bf16.msra.mxu0 %v1604_v22  ;;  %1522 = vmatprep.subr.bf16.mxu1 %v1611_v27 }
  0x29   :  { %1490 = vmatprep.subr.bf16.mxu0 %v1610_v28 }
  0x2a   :  { %1443 = vmatmul.mubr.bf16.gmra.mrb[4].mxu1 %v1608_v26 }
  0x2b   :  { %1475 = vmatmul.mubr.bf16.gmra.mrb[4].mxu0 %v1609_v29  ;;  %1523 = vmatpush3.bf16.msra.mxu1 %v1611_v27 }
  0x2c   :  { %1491 = vmatpush3.bf16.msra.mxu0 %v1610_v28  ;;  %1524 = vmatprep.subr.bf16.mxu1 %v1613_v31 }
  0x2d   :  { %1492 = vmatprep.subr.bf16.mxu0 %v1612_v30  ;;  %1446 = vmatprep.mubr.bf16.mxu1 %v1614_v32 }
  0x2e   :  { %1478 = vmatprep.mubr.bf16.mxu0 %v1615_v33 }
  0x2f   :  { %1525 = vmatpush3.bf16.msra.mxu1 %v1613_v31 }
  0x30   :  { %1493 = vmatpush3.bf16.msra.mxu0 %v1612_v30  ;;  %1526 = vmatprep.subr.bf16.mxu1 %v1619_v35 }
  0x31   :  { %1494 = vmatprep.subr.bf16.mxu0 %v1618_v36 }
  0x32   :  { %1447 = vmatmul.mubr.bf16.gmra.mrb[8].mxu1 %v1616_v34 }
  0x33   :  { %1479 = vmatmul.mubr.bf16.gmra.mrb[8].mxu0 %v1617_v37  ;;  %1527 = vmatpush3.bf16.msra.mxu1 %v1619_v35  ;;  %v1910_v37 = vld [vmem:[%s2000_s5] ss:$0 sm:$0xff] }
  0x34   :  { %1495 = vmatpush3.bf16.msra.mxu0 %v1618_v36  ;;  %1528 = vmatprep.subr.bf16.mxu1 %v1621_v39 }
  0x35   :  { %1496 = vmatprep.subr.bf16.mxu0 %v1620_v38  ;;  %1450 = vmatprep.mubr.bf16.mxu1 %v1622_v40 }
  0x36   :  { %1482 = vmatprep.mubr.bf16.mxu0 %v1623_v41 }
  0x37   :  { %1529 = vmatpush3.bf16.msra.mxu1 %v1621_v39 }
  0x38   :  { %1497 = vmatpush3.bf16.msra.mxu0 %v1620_v38  ;;  %1530 = vmatprep.subr.bf16.mxu1 %v1627_v43 }
  0x39   :  { %1498 = vmatprep.subr.bf16.mxu0 %v1626_v44 }
  0x3a   :  { %1451 = vmatmul.mubr.bf16.gmra.mrb[12].mxu1 %v1624_v42  ;;  %v1915_v42 = vld [vmem:[%s2001_s6] ss:$0 sm:$0xff] }
  0x3b   :  { %1483 = vmatmul.mubr.bf16.gmra.mrb[12].mxu0 %v1625_v45  ;;  %1531 = vmatpush3.bf16.msra.mxu1 %v1627_v43 }
  0x3c   :  { %1499 = vmatpush3.bf16.msra.mxu0 %v1626_v44  ;;  %1532 = vmatprep.subr.bf16.mxu1 %v1629_v47 }
  0x3d   :  { %1500 = vmatprep.subr.bf16.mxu0 %v1628_v46  ;;  %1502 = vmatprep.mubr.bf16.mxu0 %v1630_v48 }
  0x3e   :  { %1534 = vmatprep.mubr.bf16.mxu1 %v1631_v49 }
  0x3f   :  { %1533 = vmatpush3.bf16.msra.mxu1 %v1629_v47 }
  0x40   :  { %1501 = vmatpush3.bf16.msra.mxu0 %v1628_v46 }
  0x42   :  { %1535 = vmatmul.mubr.bf16.vlgmr.msra.gmra.mrb[16].mxu1 %v1633_v51 }
  0x43   :  { %1503 = vmatmul.mubr.bf16.vlgmr.msra.gmra.mrb[0].mxu0 %v1632_v50  ;;  %1538 = vmatprep.mubr.bf16.mxu1 %v1635_v52 }
  0x44   :  { %1506 = vmatprep.mubr.bf16.mxu0 %v1634_v53 }
  0x4a   :  { %1539 = vmatmul.mubr.bf16.gmra.mrb[20].mxu1 %v1637_v54 }
  0x4b   :  { %1507 = vmatmul.mubr.bf16.gmra.mrb[4].mxu0 %v1636_v55  ;;  %1542 = vmatprep.mubr.bf16.mxu1 %v1639_v56 }
  0x4c   :  { %1510 = vmatprep.mubr.bf16.mxu0 %v1638_v57 }
  0x52   :  { %1543 = vmatmul.mubr.bf16.gmra.mrb[24].mxu1 %v1641_v58 }
  0x53   :  { %1511 = vmatmul.mubr.bf16.gmra.mrb[8].mxu0 %v1640_v59  ;;  %1546 = vmatprep.mubr.bf16.mxu1 %v1643_v60 }
  0x54   :  { %1514 = vmatprep.mubr.bf16.mxu0 %v1642_v61 }
  0x5a   :  { %1547 = vmatmul.mubr.bf16.gmra.mrb[28].mxu1 %v1645_v62 }
  0x5b   :  { %1515 = vmatmul.mubr.bf16.gmra.mrb[12].mxu0 %v1644_v63 }
  0xf5   :  { %v1440_v0 = vpop.f32.mrb[0].mxu1 }
  0xf6   :  { %v223_v1 = vpop.f32.mrb[1].mxu1 }
  0xf7   :  { %v1441_v2 = vpop.f32.mrb[2].mxu1 }
  0xf8   :  { %v226_v3 = vpop.f32.mrb[3].mxu1 }
  0xfd   :  { %v1444_v4 = vpop.f32.mrb[4].mxu1 }
  0xfe   :  { %v239_v5 = vpop.f32.mrb[5].mxu1 }
  0xff   :  { %v1878_v6 = vpop.f32.mrb[6].mxu1 }
 0x100   :  { %v1880_v7 = vpop.f32.mrb[7].mxu1 }
 0x105   :  { %v1882_v8 = vpop.f32.mrb[8].mxu1 }
 0x106   :  { %v1884_v9 = vpop.f32.mrb[9].mxu1 }
 0x107   :  { %v1886_v10 = vpop.f32.mrb[10].mxu1 }
 0x108   :  { %v1888_v11 = vpop.f32.mrb[11].mxu1 }
 0x10d   :  { %v1890_v12 = vpop.f32.mrb[12].mxu1 }
 0x10e   :  { %v1892_v13 = vpop.f32.mrb[13].mxu1 }
 0x10f   :  { %v1894_v14 = vpop.f32.mrb[14].mxu1 }
 0x110   :  { %v1896_v15 = vpop.f32.mrb[15].mxu1 }
 0x115   :  { %v1536_v17 = vpop.f32.mrb[16].mxu1 }
 0x116   :  { %v1504_v18 = vpop.f32.mrb[0].mxu0  ;;  %v900_v19 = vadd.f32 %v1536_v17, %v1901_v16  ;;  %v891_v20 = vpop.f32.mrb[17].mxu1 }
 0x117   :  { %v1550_v21 = vadd.f32 %v1504_v18, %v1440_v0  ;;  %v643_v22 = vpop.f32.mrb[1].mxu0  ;;  %v892_v23 = vadd.f32 %v1901_v16, %v891_v20  ;;  %v1537_v24 = vpop.f32.mrb[18].mxu1 }
 0x118   :  { %v956_v25 = vmul.f32 0.01, %v900_v19  ;;  %v1551_v26 = vadd.f32 %v643_v22, %v223_v1  ;;  %v1505_v27 = vpop.f32.mrb[2].mxu0  ;;  %v903_v28 = vadd.f32 %v1537_v24, %v1901_v16  ;;  %v894_v29 = vpop.f32.mrb[19].mxu1 }
 0x119   :  { %v954_v30 = vmul.f32 0.01, %v892_v23  ;;  %v1552_v31 = vadd.f32 %v1505_v27, %v1441_v2  ;;  %v646_v32 = vpop.f32.mrb[3].mxu0  ;;  %v895_v33 = vadd.f32 %v1901_v16, %v894_v29 }
 0x11a   :  { %v972_v34 = vmax.f32 %v900_v19, %v956_v25  ;;  %v957_v35 = vmul.f32 0.01, %v903_v28  ;;  %v1553_v36 = vadd.f32 %v646_v32, %v226_v3 }
 0x11b   :  { %v970_v38 = vmax.f32 %v892_v23, %v954_v30  ;;  %v955_v39 = vmul.f32 0.01, %v895_v33 }
 0x11c   :  { %v988_v40 = vadd.f32 %v1550_v21, %v972_v34  ;;  %v973_v41 = vmax.f32 %v903_v28, %v957_v35 }
 0x11d   :  { %v986_v43 = vadd.f32 %v1551_v26, %v970_v38  ;;  %v971_v44 = vmax.f32 %v895_v33, %v955_v39  ;;  %v1540_v45 = vpop.f32.mrb[20].mxu1 }
 0x11e   :  { %v1011_v46 = vmul.f32 %v1910_v37, %v988_v40  ;;  %v989_v47 = vadd.f32 %v1552_v31, %v973_v41  ;;  %v1508_v48 = vpop.f32.mrb[4].mxu0  ;;  %v916_v49 = vadd.f32 %v1540_v45, %v1901_v16  ;;  %v907_v50 = vpop.f32.mrb[21].mxu1 }
 0x11f   :  { %v1009_v51 = vmul.f32 %v1910_v37, %v986_v43  ;;  %v987_v52 = vadd.f32 %v1553_v36, %v971_v44  ;;  %v1554_v53 = vadd.f32 %v1508_v48, %v1444_v4  ;;  %v659_v54 = vpop.f32.mrb[5].mxu0  ;;  %v908_v55 = vadd.f32 %v1901_v16, %v907_v50  ;;  %v1541_v56 = vpop.f32.mrb[22].mxu1 }
 0x120   :  { %v1034_v57 = vadd.f32 %v1915_v42, %v1011_v46  ;;  %v1012_v58 = vmul.f32 %v1910_v37, %v989_v47  ;;  %v960_v59 = vmul.f32 0.01, %v916_v49  ;;  %v1555_v60 = vadd.f32 %v659_v54, %v239_v5  ;;  %v1509_v61 = vpop.f32.mrb[6].mxu0  ;;  %v910_v62 = vpop.f32.mrb[23].mxu1 }
 0x121   :  { %v1032_v63 = vadd.f32 %v1915_v42, %v1009_v51  ;;  %v1010_v0 = vmul.f32 %v1910_v37, %v987_v52  ;;  %v958_v1 = vmul.f32 0.01, %v908_v55  ;;  %v1556_v2 = vadd.f32 %v1509_v61, %v1878_v6  ;;  %v662_v3 = vpop.f32.mrb[7].mxu0 }
 0x122   :  { %v1035_v4 = vadd.f32 %v1915_v42, %v1012_v58  ;;  %v976_v17 = vmax.f32 %v916_v49, %v960_v59  ;;  %v919_v18 = vadd.f32 %v1541_v56, %v1901_v16  ;;  %v1050_v19 = vmax.f32 %v1034_v57, 0.0 }
 0x123   :  { %v1033_v20 = vadd.f32 %v1915_v42, %v1010_v0  ;;  %v974_v21 = vmax.f32 %v908_v55, %v958_v1  ;;  %v1557_v5 = vadd.f32 %v662_v3, %v1880_v7  ;;  %v911_v25 = vadd.f32 %v1901_v16, %v910_v62 }
 0x124   :  { %v1051_v22 = vmax.f32 %v1035_v4, 0.0  ;;  %v992_v23 = vadd.f32 %v1554_v53, %v976_v17  ;;  %v961_v24 = vmul.f32 0.01, %v919_v18  ;;  %v1048_v26 = vmax.f32 %v1032_v63, 0.0 }
 0x125   :  { %v1049_v27 = vmax.f32 %v1033_v20, 0.0  ;;  %v990_v6 = vadd.f32 %v1555_v60, %v974_v21  ;;  %v1544_v28 = vpop.f32.mrb[24].mxu1  ;;  %v959_v32 = vmul.f32 0.01, %v911_v25 }
 0x126   :  { %v1319_v29 = vpack.c.bf16 %v1051_v22, %v1050_v19  ;;  %v1015_v30 = vmul.f32 %v1910_v37, %v992_v23  ;;  %v977_v31 = vmax.f32 %v919_v18, %v961_v24  ;;  %v1512_v33 = vpop.f32.mrb[8].mxu0  ;;  %v923_v34 = vpop.f32.mrb[25].mxu1  ;;  %v932_v38 = vadd.f32 %v1544_v28, %v1901_v16 }
 0x127   :  { %v1314_v35 = vpack.c.bf16 %v1049_v27, %v1048_v26  ;;  %v1013_v36 = vmul.f32 %v1910_v37, %v990_v6  ;;  %v1558_v7 = vadd.f32 %v1512_v33, %v1882_v8  ;;  %v675_v39 = vpop.f32.mrb[9].mxu0  ;;  %v1545_v40 = vpop.f32.mrb[26].mxu1  ;;  %v975_v44 = vmax.f32 %v911_v25, %v959_v32 }
 0x128   :  { %1351 = vst [vmem:[%s2002_s7 + $0x8] sm:$0xff] %v1319_v29   ;;  %v1038_v41 = vadd.f32 %v1915_v42, %v1015_v30  ;;  %v993_v43 = vadd.f32 %v1556_v2, %v977_v31  ;;  %v1559_v45 = vadd.f32 %v675_v39, %v1884_v9  ;;  %v1513_v46 = vpop.f32.mrb[10].mxu0  ;;  %v926_v47 = vpop.f32.mrb[27].mxu1  ;;  %v964_v48 = vmul.f32 0.01, %v932_v38 }
 0x129   :  { %1315 = vst [vmem:[%s2002_s7] sm:$0xff] %v1314_v35   ;;  %v1036_v8 = vadd.f32 %v1915_v42, %v1013_v36  ;;  %v924_v49 = vadd.f32 %v1901_v16, %v923_v34  ;;  %v1560_v50 = vadd.f32 %v1513_v46, %v1886_v10  ;;  %v678_v51 = vpop.f32.mrb[11].mxu0  ;;  %v991_v53 = vadd.f32 %v1557_v5, %v975_v44 }
 0x12a   :  { %v1016_v52 = vmul.f32 %v1910_v37, %v993_v43  ;;  %v935_v54 = vadd.f32 %v1545_v40, %v1901_v16  ;;  %v980_v9 = vmax.f32 %v932_v38, %v964_v48  ;;  %v1561_v56 = vadd.f32 %v678_v51, %v1888_v11 }
 0x12b   :  { %v962_v55 = vmul.f32 0.01, %v924_v49  ;;  %v1014_v58 = vmul.f32 %v1910_v37, %v991_v53  ;;  %v927_v60 = vadd.f32 %v1901_v16, %v926_v47  ;;  %v1054_v61 = vmax.f32 %v1038_v41, 0.0 }
 0x12c   :  { %v1039_v57 = vadd.f32 %v1915_v42, %v1016_v52  ;;  %v965_v59 = vmul.f32 0.01, %v935_v54  ;;  %v1052_v62 = vmax.f32 %v1036_v8, 0.0  ;;  %v996_v10 = vadd.f32 %v1558_v7, %v980_v9 }
 0x12d   :  { %v978_v63 = vmax.f32 %v924_v49, %v962_v55  ;;  %v1548_v0 = vpop.f32.mrb[28].mxu1  ;;  %v1037_v2 = vadd.f32 %v1915_v42, %v1014_v58  ;;  %v963_v4 = vmul.f32 0.01, %v927_v60 }
 0x12e   :  { %v1055_v1 = vmax.f32 %v1039_v57, 0.0  ;;  %v981_v3 = vmax.f32 %v935_v54, %v965_v59  ;;  %v1516_v17 = vpop.f32.mrb[12].mxu0  ;;  %v939_v18 = vpop.f32.mrb[29].mxu1  ;;  %v1019_v11 = vmul.f32 %v1910_v37, %v996_v10  ;;  %v948_v21 = vadd.f32 %v1548_v0, %v1901_v16 }
 0x12f   :  { %v994_v19 = vadd.f32 %v1559_v45, %v978_v63  ;;  %v1562_v20 = vadd.f32 %v1516_v17, %v1890_v12  ;;  %v691_v5 = vpop.f32.mrb[13].mxu0  ;;  %v1549_v22 = vpop.f32.mrb[30].mxu1  ;;  %v1053_v24 = vmax.f32 %v1037_v2, 0.0  ;;  %v979_v26 = vmax.f32 %v927_v60, %v963_v4 }
 0x130   :  { %v1329_v23 = vpack.c.bf16 %v1055_v1, %v1054_v61  ;;  %v997_v25 = vadd.f32 %v1560_v50, %v981_v3  ;;  %v1517_v27 = vpop.f32.mrb[14].mxu0  ;;  %v942_v6 = vpop.f32.mrb[31].mxu1  ;;  %v1042_v28 = vadd.f32 %v1915_v42, %v1019_v11  ;;  %v968_v30 = vmul.f32 0.01, %v948_v21 }
 0x131   :  { %v1017_v29 = vmul.f32 %v1910_v37, %v994_v19  ;;  %v1563_v31 = vadd.f32 %v691_v5, %v1892_v13  ;;  %v694_v32 = vpop.f32.mrb[15].mxu0  ;;  %v1324_v12 = vpack.c.bf16 %v1053_v24, %v1052_v62  ;;  %v995_v34 = vadd.f32 %v1561_v56, %v979_v26 }
 0x132   :  { %1353 = vst [vmem:[%s2002_s7 + $0x18] sm:$0xff] %v1329_v23   ;;  %v1020_v33 = vmul.f32 %v1910_v37, %v997_v25  ;;  %v940_v35 = vadd.f32 %v1901_v16, %v939_v18  ;;  %v984_v7 = vmax.f32 %v948_v21, %v968_v30  ;;  %v1564_v38 = vadd.f32 %v1517_v27, %v1894_v14 }
 0x133   :  { %v1040_v36 = vadd.f32 %v1915_v42, %v1017_v29  ;;  %1352 = vst [vmem:[%s2002_s7 + $0x10] sm:$0xff] %v1324_v12   ;;  %v1018_v39 = vmul.f32 %v1910_v37, %v995_v34  ;;  %v951_v41 = vadd.f32 %v1549_v22, %v1901_v16  ;;  %v1058_v43 = vmax.f32 %v1042_v28, 0.0 }
 0x134   :  { %v1043_v13 = vadd.f32 %v1915_v42, %v1020_v33  ;;  %v966_v40 = vmul.f32 0.01, %v940_v35  ;;  %v1000_v44 = vadd.f32 %v1562_v20, %v984_v7  ;;  %v1565_v45 = vadd.f32 %v694_v32, %v1896_v15 }
 0x135   :  { %v943_v46 = vadd.f32 %v1901_v16, %v942_v6  ;;  %v1041_v14 = vadd.f32 %v1915_v42, %v1018_v39  ;;  %v969_v48 = vmul.f32 0.01, %v951_v41  ;;  %v1056_v49 = vmax.f32 %v1040_v36, 0.0 }
 0x136   :  { %v1059_v47 = vmax.f32 %v1043_v13, 0.0  ;;  %v982_v8 = vmax.f32 %v940_v35, %v966_v40  ;;  %v1023_v50 = vmul.f32 %v1910_v37, %v1000_v44 }
 0x137   :  { %v967_v51 = vmul.f32 0.01, %v943_v46  ;;  %v1057_v53 = vmax.f32 %v1041_v14, 0.0  ;;  %v985_v9 = vmax.f32 %v951_v41, %v969_v48 }
 0x138   :  { %v1339_v52 = vpack.c.bf16 %v1059_v47, %v1058_v43  ;;  %v998_v54 = vadd.f32 %v1563_v31, %v982_v8  ;;  %v1046_v58 = vadd.f32 %v1915_v42, %v1023_v50 }
 0x139   :  { %v983_v55 = vmax.f32 %v943_v46, %v967_v51  ;;  %v1334_v15 = vpack.c.bf16 %v1057_v53, %v1056_v49  ;;  %v1001_v56 = vadd.f32 %v1564_v38, %v985_v9 }
 0x13a   :  { %1355 = vst [vmem:[%s2002_s7 + $0x28] sm:$0xff] %v1339_v52   ;;  %v1021_v16 = vmul.f32 %v1910_v37, %v998_v54  ;;  %v1062_v63 = vmax.f32 %v1046_v58, 0.0 }
 0x13b   :  { %v999_v57 = vadd.f32 %v1565_v45, %v983_v55  ;;  %1354 = vst [vmem:[%s2002_s7 + $0x20] sm:$0xff] %v1334_v15   ;;  %v1024_v59 = vmul.f32 %v1910_v37, %v1001_v56 }
 0x13c   :  { %v1044_v60 = vadd.f32 %v1915_v42, %v1021_v16 }
 0x13d   :  { %v1022_v61 = vmul.f32 %v1910_v37, %v999_v57  ;;  %v1047_v62 = vadd.f32 %v1915_v42, %v1024_v59 }
 0x13e   :  { %v1060_v1 = vmax.f32 %v1044_v60, 0.0 }
 0x13f   :  { %v1045_v10 = vadd.f32 %v1915_v42, %v1022_v61  ;;  %v1063_v0 = vmax.f32 %v1047_v62, 0.0 }
 0x141   :  { %v1061_v2 = vmax.f32 %v1045_v10, 0.0  ;;  %v1349_v3 = vpack.c.bf16 %v1063_v0, %v1062_v63 }
 0x143   :  { %v1344_v4 = vpack.c.bf16 %v1061_v2, %v1060_v1  ;;  %1357 = vst [vmem:[%s2002_s7 + $0x38] sm:$0xff] %v1349_v3  }
 0x145   :  { %1356 = vst [vmem:[%s2002_s7 + $0x30] sm:$0xff] %v1344_v4  }

// kernel: _lambda_.18
= control target key start
LH: loop header
LB: loop body
LE: loop exit
PB: predicated region body
PF: predicated region fallthrough
CT: control target
= control target key end

     0   :  { %s671_s12 = smov 0   ;;  %s673_s13 = smov 0   ;;  %s719_s0 = inlined_call_operand.vmem [shape: bf16[3,32,128], index: 0, kind: input, shape index: {}]   ;;  %s720_s1 = inlined_call_operand.vmem [shape: bf16[3,128,128], index: 1, kind: input, shape index: {}]   ;;  %s721_s2 = inlined_call_operand.vmem [shape: f32[3,1,128], index: 2, kind: input, shape index: {}]   ;;  %s722_s3 = inlined_call_operand.vmem [shape: bf16[3,32,128], index: 3, kind: output, shape index: {}]  }
   0x1   :  { %s675_s14 = smov 0  }
   0x2 LB: > { %s25_s15 = sadd.s32 1, %s645_s13  ;;  %p521_p0 = scmp.ge.s32.totalorder %s649_s14, 1  ;;  %s649_s14 = sphi %s675_s14, %s13_s14   ;;  %s645_s13 = sphi %s673_s13, %s724_s13   ;;  %s641_s12 = sphi %s671_s12, %s723_s12  }
   0x3   : > { %p27_p1 = scmp.ge.s32.totalorder %s25_s15, 3  ;;  %p176_p2 = scmp.lt.s32.totalorder %s649_s14, 4 }
   0x5   : > { %s726_s15 = smov (%p27_p1, %s25_s15), 0  ;;  %p177_p3 = pnand %p521_p0, %p176_p2 }
   0x6   : > { %p217_p4 = scmp.lt.s32.totalorder (!%p177_p3), %s641_s12, 2 }
   0x7   : > { %180 = sbr.rel (%p177_p3) target bundleno = 274 (0x112), region = 32 }
   0xe   : > { %s728_s12 = smov (!%p217_p4, %s641_s12), 2 }
   0xf   : > { %s546_s16 = sshll.u32 %s728_s12, 6  ;;  %s545_s20 = sshll.u32 %s728_s12, 4 }
  0x10   : > { %s230_s19 = scalar_lea.vmem %s720_s1, %s546_s16  ;;  %s224_s23 = scalar_lea.vmem %s719_s0, %s545_s20 }
  0x11   : > { %v617_v0 = vld [vmem:[%s230_s19] sm:$0xff]   ;;  %v618_v1 = vld [vmem:[%s230_s19 + $0x8] sm:$0xff]   ;;  %v619_v2 = vld [vmem:[%s230_s19 + $0x10] sm:$0xff]   ;;  %s233_s26 = scalar_lea.vmem %s721_s2, %s728_s12  ;;  %s242_s29 = scalar_lea.vmem %s722_s3, %s545_s20 }
  0x12   : > { %573 = vmatprep.subr.bf16.mxu0 %v617_v0  ;;  %v620_v3 = vld [vmem:[%s230_s19 + $0x18] sm:$0xff]   ;;  %v625_v4 = vld [vmem:[%s224_s23] sm:$0xff]   ;;  %v622_v6 = vld [vmem:[%s230_s19 + $0x28] sm:$0xff]  }
  0x13   : > { %574 = vmatpush3.bf16.msra.mxu0 %v617_v0  ;;  %589 = vmatprep.mubr.bf16.mxu0 %v625_v4  ;;  %v621_v5 = vld [vmem:[%s230_s19 + $0x20] sm:$0xff]   ;;  %v623_v7 = vld [vmem:[%s230_s19 + $0x30] sm:$0xff]   ;;  %v624_v8 = vld [vmem:[%s230_s19 + $0x38] sm:$0xff]  }
  0x14   : > { %575 = vmatprep.subr.bf16.mxu0 %v618_v1  ;;  %v626_v9 = vld [vmem:[%s224_s23 + $0x8] sm:$0xff]   ;;  %v528_v10 = vld [vmem:[%s233_s26] ss:$0 sm:$0xff] }
  0x17   : > { %576 = vmatpush3.bf16.msra.mxu0 %v618_v1 }
  0x18   : > { %577 = vmatprep.subr.bf16.mxu0 %v619_v2 }
  0x1b   : > { %578 = vmatpush3.bf16.msra.mxu0 %v619_v2 }
  0x1c   : > { %579 = vmatprep.subr.bf16.mxu0 %v620_v3 }
  0x1f   : > { %580 = vmatpush3.bf16.msra.mxu0 %v620_v3 }
  0x20   : > { %581 = vmatprep.subr.bf16.mxu0 %v621_v5 }
  0x23   : > { %582 = vmatpush3.bf16.msra.mxu0 %v621_v5 }
  0x24   : > { %583 = vmatprep.subr.bf16.mxu0 %v622_v6 }
  0x27   : > { %584 = vmatpush3.bf16.msra.mxu0 %v622_v6 }
  0x28   : > { %585 = vmatprep.subr.bf16.mxu0 %v623_v7 }
  0x2b   : > { %586 = vmatpush3.bf16.msra.mxu0 %v623_v7 }
  0x2c   : > { %587 = vmatprep.subr.bf16.mxu0 %v624_v8 }
  0x2f   : > { %588 = vmatpush3.bf16.msra.mxu0 %v624_v8 }
  0x32   : > { %590 = vmatmul.mubr.bf16.vlgmr.msra.gmra.mrb[0].mxu0 %v626_v9 }
 0x105   : > { %v591_v11 = vpop.f32.mrb[0].mxu0 }
 0x106   : > { %v375_v12 = vadd.f32 %v591_v11, %v528_v10  ;;  %v366_v13 = vpop.f32.mrb[1].mxu0 }
 0x107   : > { %v367_v14 = vadd.f32 %v528_v10, %v366_v13  ;;  %v592_v15 = vpop.f32.mrb[2].mxu0 }
 0x108   : > { %v383_v16 = vmul.f32 0.01, %v375_v12  ;;  %v378_v17 = vadd.f32 %v592_v15, %v528_v10  ;;  %v369_v18 = vpop.f32.mrb[3].mxu0 }
 0x109   : > { %v381_v19 = vmul.f32 0.01, %v367_v14  ;;  %v370_v20 = vadd.f32 %v528_v10, %v369_v18 }
 0x10a   : > { %v384_v21 = vmul.f32 0.01, %v378_v17  ;;  %v387_v23 = vmax.f32 %v375_v12, %v383_v16 }
 0x10b   : > { %v382_v22 = vmul.f32 0.01, %v370_v20  ;;  %v385_v25 = vmax.f32 %v367_v14, %v381_v19 }
 0x10c   : > { %v388_v24 = vmax.f32 %v378_v17, %v384_v21 }
 0x10d   : > { %v386_v26 = vmax.f32 %v370_v20, %v382_v22 }
 0x10e   : > { %v560_v27 = vpack.c.bf16 %v388_v24, %v387_v23 }
 0x10f   : > { %v555_v28 = vpack.c.bf16 %v386_v26, %v385_v25 }
 0x110   : > { %562 = vst [vmem:[%s242_s29 + $0x8] sm:$0xff] %v560_v27  }
 0x111   : > { %556 = vst [vmem:[%s242_s29] sm:$0xff] %v555_v28  }
 0x112 PF: > { %s13_s14 = sadd.s32 1, %s649_s14   ;;  %s723_s12 = smov %s645_s13 }
 0x113   : > { %p10_p5 = scmp.ge.s32.totalorder %s13_s14, 5   ;;  %s724_s13 = smov %s726_s15 }
 0x115   :  { %12 = sbr.rel (!%p10_p5) target bundleno = 2 (0x2), region = 68 }

// kernel: _lambda_.19
= control target key start
LH: loop header
LB: loop body
LE: loop exit
PB: predicated region body
PF: predicated region fallthrough
CT: control target
= control target key end

     0   :  { %s844_s1 = inlined_call_operand.vmem [shape: bf16[3,128,128], index: 1, kind: input, shape index: {}]   ;;  %s845_s0 = inlined_call_operand.vmem [shape: bf16[3,32,128], index: 0, kind: input, shape index: {}]   ;;  %s846_s2 = inlined_call_operand.vmem [shape: bf16[32,128], index: 2, kind: input, shape index: {}]   ;;  %s847_s3 = inlined_call_operand.vmem [shape: f32[1,128], index: 3, kind: input, shape index: {}]   ;;  %s848_s4 = inlined_call_operand.vmem [shape: f32[1,128], index: 4, kind: input, shape index: {}]   ;;  %s849_s5 = inlined_call_operand.vmem [shape: bf16[32,128], index: 5, kind: output, shape index: {}]  }
   0x1   :  { %v676_v0 = vld [vmem:[%s844_s1] sm:$0xff]   ;;  %v677_v1 = vld [vmem:[%s844_s1 + $0x8] sm:$0xff]   ;;  %v678_v2 = vld [vmem:[%s844_s1 + $0x10] sm:$0xff]  }
   0x2   :  { %628 = vmatprep.subr.bf16.mxu0 %v676_v0  ;;  %v679_v3 = vld [vmem:[%s844_s1 + $0x18] sm:$0xff]   ;;  %v684_v4 = vld [vmem:[%s844_s1 + $0x40] sm:$0xff]   ;;  %v687_v6 = vld [vmem:[%s844_s1 + $0x48] sm:$0xff]  }
   0x3   :  { %629 = vmatpush3.bf16.msra.mxu0 %v676_v0  ;;  %v685_v5 = vld [vmem:[%s845_s0] sm:$0xff]   ;;  %608 = vmatprep.subr.bf16.mxu1 %v684_v4  ;;  %v690_v8 = vld [vmem:[%s844_s1 + $0x50] sm:$0xff]   ;;  %v681_v9 = vld [vmem:[%s844_s1 + $0x28] sm:$0xff]  }
   0x4   :  { %630 = vmatprep.subr.bf16.mxu0 %v677_v1  ;;  %609 = vmatpush3.bf16.msra.mxu1 %v684_v4  ;;  %v680_v7 = vld [vmem:[%s844_s1 + $0x20] sm:$0xff]   ;;  %v692_v10 = vld [vmem:[%s844_s1 + $0x58] sm:$0xff]   ;;  %v682_v11 = vld [vmem:[%s844_s1 + $0x30] sm:$0xff]  }
   0x5   :  { %644 = vmatprep.mubr.bf16.mxu0 %v685_v5  ;;  %610 = vmatprep.subr.bf16.mxu1 %v687_v6  ;;  %v694_v12 = vld [vmem:[%s844_s1 + $0x60] sm:$0xff]   ;;  %v683_v13 = vld [vmem:[%s844_s1 + $0x38] sm:$0xff]   ;;  %v696_v14 = vld [vmem:[%s844_s1 + $0x68] sm:$0xff]  }
   0x6   :  { %v701_v15 = vld [vmem:[%s845_s0 + $0x10] sm:$0xff]   ;;  %v686_v16 = vld [vmem:[%s844_s1 + $0x80] sm:$0xff]   ;;  %v688_v18 = vld [vmem:[%s845_s0 + $0x8] sm:$0xff]  }
   0x7   :  { %631 = vmatpush3.bf16.msra.mxu0 %v677_v1  ;;  %v698_v17 = vld [vmem:[%s844_s1 + $0x70] sm:$0xff]   ;;  %624 = vmatprep.mubr.bf16.mxu1 %v701_v15  ;;  %v689_v19 = vld [vmem:[%s844_s1 + $0x88] sm:$0xff]   ;;  %v700_v20 = vld [vmem:[%s844_s1 + $0x78] sm:$0xff]  }
   0x8   :  { %632 = vmatprep.subr.bf16.mxu0 %v678_v2  ;;  %611 = vmatpush3.bf16.msra.mxu1 %v687_v6  ;;  %v704_v21 = vld [vmem:[%s845_s0 + $0x20] sm:$0xff]   ;;  %v691_v22 = vld [vmem:[%s844_s1 + $0x90] sm:$0xff]   ;;  %v703_v23 = vld [vmem:[%s845_s0 + $0x18] sm:$0xff]  }
   0x9   :  { %612 = vmatprep.subr.bf16.mxu1 %v690_v8  ;;  %v693_v24 = vld [vmem:[%s844_s1 + $0x98] sm:$0xff]   ;;  %v695_v25 = vld [vmem:[%s844_s1 + $0xa0] sm:$0xff]   ;;  %v697_v26 = vld [vmem:[%s844_s1 + $0xa8] sm:$0xff]  }
   0xa   :  { %v699_v27 = vld [vmem:[%s844_s1 + $0xb0] sm:$0xff]   ;;  %v702_v28 = vld [vmem:[%s844_s1 + $0xb8] sm:$0xff]   ;;  %v705_v29 = vld [vmem:[%s845_s0 + $0x28] sm:$0xff]  }
   0xb   :  { %633 = vmatpush3.bf16.msra.mxu0 %v678_v2  ;;  %v576_v34 = vld [vmem:[%s846_s2 + $0x8] sm:$0xff]   ;;  %v559_v35 = vld [vmem:[%s846_s2] sm:$0xff]  }
   0xc   :  { %634 = vmatprep.subr.bf16.mxu0 %v679_v3  ;;  %613 = vmatpush3.bf16.msra.mxu1 %v690_v8  ;;  %v564_v36 = vunpack.c.l.bf16 %v576_v34  ;;  %v560_v38 = vunpack.c.l.bf16 %v559_v35  ;;  %v565_v41 = vunpack.c.h.bf16 %v576_v34  ;;  %v548_v42 = vld [vmem:[%s847_s3] ss:$0 sm:$0xff]  ;;  %v561_v45 = vunpack.c.h.bf16 %v559_v35 }
   0xd   :  { %614 = vmatprep.subr.bf16.mxu1 %v692_v10  ;;  %v549_v49 = vld [vmem:[%s848_s4] ss:$0 sm:$0xff] }
   0xf   :  { %635 = vmatpush3.bf16.msra.mxu0 %v679_v3 }
  0x10   :  { %636 = vmatprep.subr.bf16.mxu0 %v680_v7  ;;  %615 = vmatpush3.bf16.msra.mxu1 %v692_v10 }
  0x11   :  { %616 = vmatprep.subr.bf16.mxu1 %v694_v12 }
  0x13   :  { %637 = vmatpush3.bf16.msra.mxu0 %v680_v7 }
  0x14   :  { %638 = vmatprep.subr.bf16.mxu0 %v681_v9  ;;  %617 = vmatpush3.bf16.msra.mxu1 %v694_v12 }
  0x15   :  { %618 = vmatprep.subr.bf16.mxu1 %v696_v14 }
  0x17   :  { %639 = vmatpush3.bf16.msra.mxu0 %v681_v9 }
  0x18   :  { %640 = vmatprep.subr.bf16.mxu0 %v682_v11  ;;  %619 = vmatpush3.bf16.msra.mxu1 %v696_v14 }
  0x19   :  { %620 = vmatprep.subr.bf16.mxu1 %v698_v17 }
  0x1b   :  { %641 = vmatpush3.bf16.msra.mxu0 %v682_v11 }
  0x1c   :  { %642 = vmatprep.subr.bf16.mxu0 %v683_v13  ;;  %621 = vmatpush3.bf16.msra.mxu1 %v698_v17 }
  0x1d   :  { %622 = vmatprep.subr.bf16.mxu1 %v700_v20 }
  0x1f   :  { %643 = vmatpush3.bf16.msra.mxu0 %v683_v13 }
  0x20   :  { %648 = vmatprep.subr.bf16.mxu0 %v686_v16  ;;  %623 = vmatpush3.bf16.msra.mxu1 %v700_v20 }
  0x22   :  { %645 = vmatmul.mubr.bf16.vlgmr.msra.gmra.mrb[0].mxu0 %v688_v18 }
  0x23   :  { %649 = vmatpush3.bf16.msra.mxu0 %v686_v16  ;;  %664 = vmatprep.mubr.bf16.mxu0 %v704_v21 }
  0x24   :  { %650 = vmatprep.subr.bf16.mxu0 %v689_v19  ;;  %625 = vmatmul.mubr.bf16.vlgmr.msra.gmra.mrb[0].mxu1 %v703_v23 }
  0x27   :  { %651 = vmatpush3.bf16.msra.mxu0 %v689_v19 }
  0x28   :  { %652 = vmatprep.subr.bf16.mxu0 %v691_v22 }
  0x2b   :  { %653 = vmatpush3.bf16.msra.mxu0 %v691_v22 }
  0x2c   :  { %654 = vmatprep.subr.bf16.mxu0 %v693_v24 }
  0x2f   :  { %655 = vmatpush3.bf16.msra.mxu0 %v693_v24 }
  0x30   :  { %656 = vmatprep.subr.bf16.mxu0 %v695_v25 }
  0x33   :  { %657 = vmatpush3.bf16.msra.mxu0 %v695_v25 }
  0x34   :  { %658 = vmatprep.subr.bf16.mxu0 %v697_v26 }
  0x37   :  { %659 = vmatpush3.bf16.msra.mxu0 %v697_v26 }
  0x38   :  { %660 = vmatprep.subr.bf16.mxu0 %v699_v27 }
  0x3b   :  { %661 = vmatpush3.bf16.msra.mxu0 %v699_v27 }
  0x3c   :  { %662 = vmatprep.subr.bf16.mxu0 %v702_v28 }
  0x3f   :  { %663 = vmatpush3.bf16.msra.mxu0 %v702_v28 }
  0x42   :  { %665 = vmatmul.mubr.bf16.vlgmr.msra.gmra.mrb[0].mxu0 %v705_v29 }
  0xf7   :  { %v626_v30 = vpop.f32.mrb[0].mxu1 }
  0xf8   :  { %v157_v31 = vpop.f32.mrb[1].mxu1 }
  0xf9   :  { %v627_v32 = vpop.f32.mrb[2].mxu1 }
  0xfa   :  { %v160_v33 = vpop.f32.mrb[3].mxu1 }
 0x115   :  { %v666_v37 = vpop.f32.mrb[0].mxu0 }
 0x116   :  { %v668_v39 = vadd.f32 %v666_v37, %v626_v30  ;;  %v397_v40 = vpop.f32.mrb[1].mxu0 }
 0x117   :  { %v669_v43 = vadd.f32 %v397_v40, %v157_v31  ;;  %v667_v44 = vpop.f32.mrb[2].mxu0 }
 0x118   :  { %v426_v46 = vadd.f32 %v668_v39, %v564_v36  ;;  %v670_v47 = vadd.f32 %v667_v44, %v627_v32  ;;  %v400_v48 = vpop.f32.mrb[3].mxu0 }
 0x119   :  { %v424_v50 = vadd.f32 %v669_v43, %v560_v38  ;;  %v671_v51 = vadd.f32 %v400_v48, %v160_v33 }
 0x11a   :  { %v437_v52 = vmul.f32 %v548_v42, %v426_v46  ;;  %v427_v53 = vadd.f32 %v670_v47, %v565_v41 }
 0x11b   :  { %v435_v54 = vmul.f32 %v548_v42, %v424_v50  ;;  %v425_v55 = vadd.f32 %v671_v51, %v561_v45 }
 0x11c   :  { %v448_v56 = vadd.f32 %v549_v49, %v437_v52  ;;  %v438_v57 = vmul.f32 %v548_v42, %v427_v53 }
 0x11d   :  { %v446_v58 = vadd.f32 %v549_v49, %v435_v54  ;;  %v436_v59 = vmul.f32 %v548_v42, %v425_v55 }
 0x11e   :  { %v449_v60 = vadd.f32 %v549_v49, %v438_v57  ;;  %v452_v62 = vmax.f32 %v448_v56, 0.0 }
 0x11f   :  { %v447_v61 = vadd.f32 %v549_v49, %v436_v59  ;;  %v450_v0 = vmax.f32 %v446_v58, 0.0 }
 0x120   :  { %v453_v63 = vmax.f32 %v449_v60, 0.0 }
 0x121   :  { %v451_v1 = vmax.f32 %v447_v61, 0.0 }
 0x122   :  { %v574_v2 = vpack.c.bf16 %v453_v63, %v452_v62 }
 0x123   :  { %v569_v3 = vpack.c.bf16 %v451_v1, %v450_v0 }
 0x124   :  { %577 = vst [vmem:[%s849_s5 + $0x8] sm:$0xff] %v574_v2  }
 0x125   :  { %570 = vst [vmem:[%s849_s5] sm:$0xff] %v569_v3  }

// kernel: _lambda_.20
= control target key start
LH: loop header
LB: loop body
LE: loop exit
PB: predicated region body
PF: predicated region fallthrough
CT: control target
= control target key end

     0   :  { %s312_s1 = inlined_call_operand.vmem [shape: bf16[1,128,128], index: 1, kind: input, shape index: {}]   ;;  %s313_s0 = inlined_call_operand.vmem [shape: bf16[1,32,128], index: 0, kind: input, shape index: {}]   ;;  %s314_s2 = inlined_call_operand.vmem [shape: f32[1,1,128], index: 2, kind: input, shape index: {}]   ;;  %s315_s3 = inlined_call_operand.vmem [shape: bf16[1,32,128], index: 3, kind: output, shape index: {}]  }
   0x1   :  { %v243_v0 = vld [vmem:[%s312_s1] sm:$0xff]   ;;  %v244_v1 = vld [vmem:[%s312_s1 + $0x8] sm:$0xff]   ;;  %v245_v2 = vld [vmem:[%s312_s1 + $0x10] sm:$0xff]  }
   0x2   :  { %223 = vmatprep.subr.bf16.mxu0 %v243_v0  ;;  %v246_v3 = vld [vmem:[%s312_s1 + $0x18] sm:$0xff]   ;;  %v251_v4 = vld [vmem:[%s313_s0] sm:$0xff]   ;;  %v248_v6 = vld [vmem:[%s312_s1 + $0x28] sm:$0xff]  }
   0x3   :  { %224 = vmatpush3.bf16.msra.mxu0 %v243_v0  ;;  %239 = vmatprep.mubr.bf16.mxu0 %v251_v4  ;;  %v247_v5 = vld [vmem:[%s312_s1 + $0x20] sm:$0xff]   ;;  %v249_v7 = vld [vmem:[%s312_s1 + $0x30] sm:$0xff]   ;;  %v250_v8 = vld [vmem:[%s312_s1 + $0x38] sm:$0xff]  }
   0x4   :  { %225 = vmatprep.subr.bf16.mxu0 %v244_v1  ;;  %v252_v9 = vld [vmem:[%s313_s0 + $0x8] sm:$0xff]   ;;  %v183_v10 = vld [vmem:[%s314_s2] ss:$0 sm:$0xff] }
   0x7   :  { %226 = vmatpush3.bf16.msra.mxu0 %v244_v1 }
   0x8   :  { %227 = vmatprep.subr.bf16.mxu0 %v245_v2 }
   0xb   :  { %228 = vmatpush3.bf16.msra.mxu0 %v245_v2 }
   0xc   :  { %229 = vmatprep.subr.bf16.mxu0 %v246_v3 }
   0xf   :  { %230 = vmatpush3.bf16.msra.mxu0 %v246_v3 }
  0x10   :  { %231 = vmatprep.subr.bf16.mxu0 %v247_v5 }
  0x13   :  { %232 = vmatpush3.bf16.msra.mxu0 %v247_v5 }
  0x14   :  { %233 = vmatprep.subr.bf16.mxu0 %v248_v6 }
  0x17   :  { %234 = vmatpush3.bf16.msra.mxu0 %v248_v6 }
  0x18   :  { %235 = vmatprep.subr.bf16.mxu0 %v249_v7 }
  0x1b   :  { %236 = vmatpush3.bf16.msra.mxu0 %v249_v7 }
  0x1c   :  { %237 = vmatprep.subr.bf16.mxu0 %v250_v8 }
  0x1f   :  { %238 = vmatpush3.bf16.msra.mxu0 %v250_v8 }
  0x22   :  { %240 = vmatmul.mubr.bf16.vlgmr.msra.gmra.mrb[0].mxu0 %v252_v9 }
  0xf5   :  { %v241_v11 = vpop.f32.mrb[0].mxu0 }
  0xf6   :  { %v145_v12 = vadd.f32 %v241_v11, %v183_v10  ;;  %v136_v13 = vpop.f32.mrb[1].mxu0 }
  0xf7   :  { %v137_v14 = vadd.f32 %v183_v10, %v136_v13  ;;  %v242_v15 = vpop.f32.mrb[2].mxu0 }
  0xf8   :  { %v153_v16 = vmul.f32 0.01, %v145_v12  ;;  %v148_v17 = vadd.f32 %v242_v15, %v183_v10  ;;  %v139_v18 = vpop.f32.mrb[3].mxu0 }
  0xf9   :  { %v151_v19 = vmul.f32 0.01, %v137_v14  ;;  %v140_v20 = vadd.f32 %v183_v10, %v139_v18 }
  0xfa   :  { %v154_v21 = vmul.f32 0.01, %v148_v17  ;;  %v157_v23 = vmax.f32 %v145_v12, %v153_v16 }
  0xfb   :  { %v152_v22 = vmul.f32 0.01, %v140_v20  ;;  %v155_v25 = vmax.f32 %v137_v14, %v151_v19 }
  0xfc   :  { %v158_v24 = vmax.f32 %v148_v17, %v154_v21 }
  0xfd   :  { %v156_v26 = vmax.f32 %v140_v20, %v152_v22 }
  0xfe   :  { %v210_v27 = vpack.c.bf16 %v158_v24, %v157_v23 }
  0xff   :  { %v205_v28 = vpack.c.bf16 %v156_v26, %v155_v25 }
 0x100   :  { %212 = vst [vmem:[%s315_s3 + $0x8] sm:$0xff] %v210_v27  }
 0x101   :  { %206 = vst [vmem:[%s315_s3] sm:$0xff] %v205_v28  }

// kernel: _lambda_.21
= control target key start
LH: loop header
LB: loop body
LE: loop exit
PB: predicated region body
PF: predicated region fallthrough
CT: control target
= control target key end

     0   :  { %s573_s12 = smov 0   ;;  %s575_s13 = smov 0   ;;  %s617_s0 = inlined_call_operand.vmem [shape: bf16[3,8,128], index: 0, kind: input, shape index: {}]   ;;  %s618_s1 = inlined_call_operand.vmem [shape: bf16[3,128,128], index: 1, kind: input, shape index: {}]   ;;  %s619_s2 = inlined_call_operand.vmem [shape: f32[3,1,128], index: 2, kind: input, shape index: {}]   ;;  %s620_s3 = inlined_call_operand.vmem [shape: bf16[3,8,128], index: 3, kind: output, shape index: {}]  }
   0x1   :  { %s577_s14 = smov 0  }
   0x2 LB: > { %s25_s15 = sadd.s32 1, %s545_s13  ;;  %p447_p0 = scmp.ge.s32.totalorder %s549_s14, 1  ;;  %s549_s14 = sphi %s577_s14, %s13_s14   ;;  %s545_s13 = sphi %s575_s13, %s622_s13   ;;  %s541_s12 = sphi %s573_s12, %s621_s12  }
   0x3   : > { %p27_p1 = scmp.ge.s32.totalorder %s25_s15, 3  ;;  %p173_p2 = scmp.lt.s32.totalorder %s549_s14, 4 }
   0x5   : > { %s624_s15 = smov (%p27_p1, %s25_s15), 0  ;;  %p174_p3 = pnand %p447_p0, %p173_p2 }
   0x6   : > { %p209_p4 = scmp.lt.s32.totalorder (!%p174_p3), %s541_s12, 2  ;;  %v551_v0 = vmov (!%p174_p3), 0.0   ;;  %vm552_vm0 = vmmov (!%p174_p3), 0  }
   0x7   : > { %177 = sbr.rel (%p174_p3) target bundleno = 270 (0x10e), region = 32  ;;  %473 = vmatprep.subr.bf16.mxu0 (!%p174_p3), %v551_v0  ;;  %489 = vmatprep.mubr.msk.bf16.mxu0 (!%p174_p3), %vm552_vm0, %v551_v0 }
   0xe   : > { %s626_s12 = smov (!%p209_p4, %s541_s12), 2 }
   0xf   : > { %s463_s16 = sshll.u32 %s626_s12, 6  ;;  %s448_s20 = sshll.u32 %s626_s12, 2 }
  0x10   : > { %s220_s19 = scalar_lea.vmem %s618_s1, %s463_s16  ;;  %s215_s23 = scalar_lea.vmem %s617_s0, %s448_s20 }
  0x11   : > { %v519_v1 = vld [vmem:[%s220_s19] sm:$0xff]   ;;  %v520_v2 = vld [vmem:[%s220_s19 + $0x8] sm:$0xff]   ;;  %v521_v3 = vld [vmem:[%s220_s19 + $0x10] sm:$0xff]   ;;  %s223_s26 = scalar_lea.vmem %s619_s2, %s626_s12  ;;  %s230_s29 = scalar_lea.vmem %s620_s3, %s448_s20 }
  0x12   : > { %474 = vmatpush3.bf16.msra.mxu0 %v519_v1  ;;  %v522_v4 = vld [vmem:[%s220_s19 + $0x18] sm:$0xff]   ;;  %v523_v5 = vld [vmem:[%s220_s19 + $0x20] sm:$0xff]   ;;  %v524_v6 = vld [vmem:[%s220_s19 + $0x28] sm:$0xff]  }
  0x13   : > { %475 = vmatprep.subr.bf16.mxu0 %v551_v0  ;;  %v525_v7 = vld [vmem:[%s220_s19 + $0x30] sm:$0xff]   ;;  %v526_v8 = vld [vmem:[%s220_s19 + $0x38] sm:$0xff]   ;;  %v232_v9 = vld [vmem:[%s215_s23] sm:$0xf] }
  0x14   : > { %v452_v10 = vld [vmem:[%s223_s26] ss:$0 sm:$0xff] }
  0x16   : > { %476 = vmatpush3.bf16.msra.mxu0 %v520_v2 }
  0x17   : > { %477 = vmatprep.subr.bf16.mxu0 %v551_v0 }
  0x1a   : > { %478 = vmatpush3.bf16.msra.mxu0 %v521_v3 }
  0x1b   : > { %479 = vmatprep.subr.bf16.mxu0 %v551_v0 }
  0x1e   : > { %480 = vmatpush3.bf16.msra.mxu0 %v522_v4 }
  0x1f   : > { %481 = vmatprep.subr.bf16.mxu0 %v551_v0 }
  0x22   : > { %482 = vmatpush3.bf16.msra.mxu0 %v523_v5 }
  0x23   : > { %483 = vmatprep.subr.bf16.mxu0 %v551_v0 }
  0x26   : > { %484 = vmatpush3.bf16.msra.mxu0 %v524_v6 }
  0x27   : > { %485 = vmatprep.subr.bf16.mxu0 %v551_v0 }
  0x2a   : > { %486 = vmatpush3.bf16.msra.mxu0 %v525_v7 }
  0x2b   : > { %487 = vmatprep.subr.bf16.mxu0 %v551_v0 }
  0x2e   : > { %488 = vmatpush3.bf16.msra.mxu0 %v526_v8 }
  0x31   : > { %490 = vmatmul.mubr.bf16.vlgmr.msra.gmra.mrb[0].mxu0 %v232_v9 }
 0x104   : > { %v338_v11 = vpop.f32.mrb[0].mxu0 }
 0x105   : > { %v339_v12 = vadd.f32 %v452_v10, %v338_v11  ;;  %v491_v13 = vpop.f32.mrb[1].mxu0 }
 0x106   : > { %v341_v14 = vpop.f32.mrb[2].mxu0 }
 0x107   : > { %v344_v15 = vmul.f32 0.01, %v339_v12  ;;  %v492_v16 = vpop.f32.mrb[3].mxu0 }
 0x109   : > { %v345_v17 = vmax.f32 %v339_v12, %v344_v15 }
 0x10b   : > { %v346_v18 = vpack.c.bf16 %v345_v17, %v345_v17 }
 0x10d   : > { %347 = vst [vmem:[%s230_s29] sm:$0xf] %v346_v18 }
 0x10e PF: > { %s13_s14 = sadd.s32 1, %s549_s14   ;;  %s621_s12 = smov %s545_s13 }
 0x10f   : > { %p10_p5 = scmp.ge.s32.totalorder %s13_s14, 5   ;;  %s622_s13 = smov %s624_s15 }
 0x111   :  { %12 = sbr.rel (!%p10_p5) target bundleno = 2 (0x2), region = 68 }

// kernel: _lambda_.23
= control target key start
LH: loop header
LB: loop body
LE: loop exit
PB: predicated region body
PF: predicated region fallthrough
CT: control target
= control target key end

     0   :  { %v183_v0 = vmov 0.0   ;;  %vm184_vm0 = vmmov 0   ;;  %s238_s1 = inlined_call_operand.vmem [shape: bf16[1,128,128], index: 1, kind: input, shape index: {}]   ;;  %s239_s0 = inlined_call_operand.vmem [shape: bf16[1,8,128], index: 0, kind: input, shape index: {}]   ;;  %s240_s2 = inlined_call_operand.vmem [shape: f32[1,1,128], index: 2, kind: input, shape index: {}]   ;;  %s241_s3 = inlined_call_operand.vmem [shape: bf16[1,8,128], index: 3, kind: output, shape index: {}]  }
   0x1   :  { %153 = vmatprep.subr.bf16.mxu0 %v183_v0  ;;  %v175_v1 = vld [vmem:[%s238_s1] sm:$0xff]   ;;  %169 = vmatprep.mubr.msk.bf16.mxu0 %vm184_vm0, %v183_v0  ;;  %v176_v2 = vld [vmem:[%s238_s1 + $0x8] sm:$0xff]   ;;  %v177_v3 = vld [vmem:[%s238_s1 + $0x10] sm:$0xff]  }
   0x2   :  { %154 = vmatpush3.bf16.msra.mxu0 %v175_v1  ;;  %v178_v4 = vld [vmem:[%s238_s1 + $0x18] sm:$0xff]   ;;  %v179_v5 = vld [vmem:[%s238_s1 + $0x20] sm:$0xff]   ;;  %v180_v6 = vld [vmem:[%s238_s1 + $0x28] sm:$0xff]  }
   0x3   :  { %155 = vmatprep.subr.bf16.mxu0 %v183_v0  ;;  %v181_v7 = vld [vmem:[%s238_s1 + $0x30] sm:$0xff]   ;;  %v182_v8 = vld [vmem:[%s238_s1 + $0x38] sm:$0xff]   ;;  %v15_v9 = vld [vmem:[%s239_s0] sm:$0xf] }
   0x4   :  { %v135_v10 = vld [vmem:[%s240_s2] ss:$0 sm:$0xff] }
   0x6   :  { %156 = vmatpush3.bf16.msra.mxu0 %v176_v2 }
   0x7   :  { %157 = vmatprep.subr.bf16.mxu0 %v183_v0 }
   0xa   :  { %158 = vmatpush3.bf16.msra.mxu0 %v177_v3 }
   0xb   :  { %159 = vmatprep.subr.bf16.mxu0 %v183_v0 }
   0xe   :  { %160 = vmatpush3.bf16.msra.mxu0 %v178_v4 }
   0xf   :  { %161 = vmatprep.subr.bf16.mxu0 %v183_v0 }
  0x12   :  { %162 = vmatpush3.bf16.msra.mxu0 %v179_v5 }
  0x13   :  { %163 = vmatprep.subr.bf16.mxu0 %v183_v0 }
  0x16   :  { %164 = vmatpush3.bf16.msra.mxu0 %v180_v6 }
  0x17   :  { %165 = vmatprep.subr.bf16.mxu0 %v183_v0 }
  0x1a   :  { %166 = vmatpush3.bf16.msra.mxu0 %v181_v7 }
  0x1b   :  { %167 = vmatprep.subr.bf16.mxu0 %v183_v0 }
  0x1e   :  { %168 = vmatpush3.bf16.msra.mxu0 %v182_v8 }
  0x21   :  { %170 = vmatmul.mubr.bf16.vlgmr.msra.gmra.mrb[0].mxu0 %v15_v9 }
  0xf4   :  { %v121_v11 = vpop.f32.mrb[0].mxu0 }
  0xf5   :  { %v122_v12 = vadd.f32 %v135_v10, %v121_v11  ;;  %v171_v13 = vpop.f32.mrb[1].mxu0 }
  0xf6   :  { %v124_v14 = vpop.f32.mrb[2].mxu0 }
  0xf7   :  { %v127_v15 = vmul.f32 0.01, %v122_v12  ;;  %v172_v16 = vpop.f32.mrb[3].mxu0 }
  0xf9   :  { %v128_v17 = vmax.f32 %v122_v12, %v127_v15 }
  0xfb   :  { %v129_v18 = vpack.c.bf16 %v128_v17, %v128_v17 }
  0xfd   :  { %130 = vst [vmem:[%s241_s3] sm:$0xf] %v129_v18 }

// kernel: _lambda_.22
= control target key start
LH: loop header
LB: loop body
LE: loop exit
PB: predicated region body
PF: predicated region fallthrough
CT: control target
= control target key end

     0   :  { %v540_v0 = vmov 0.0   ;;  %vm541_vm0 = vmmov 0   ;;  %s695_s1 = inlined_call_operand.vmem [shape: bf16[3,128,128], index: 1, kind: input, shape index: {}]   ;;  %s696_s0 = inlined_call_operand.vmem [shape: bf16[3,8,128], index: 0, kind: input, shape index: {}]   ;;  %s697_s2 = inlined_call_operand.vmem [shape: bf16[8,128], index: 2, kind: input, shape index: {}]   ;;  %s698_s3 = inlined_call_operand.vmem [shape: f32[1,128], index: 3, kind: input, shape index: {}]   ;;  %s699_s4 = inlined_call_operand.vmem [shape: f32[1,128], index: 4, kind: input, shape index: {}]   ;;  %s700_s5 = inlined_call_operand.vmem [shape: bf16[8,128], index: 5, kind: output, shape index: {}]  }
   0x1   :  { %454 = vmatprep.subr.bf16.mxu0 %v540_v0  ;;  %v516_v1 = vld [vmem:[%s695_s1 + $0x40] sm:$0xff]   ;;  %474 = vmatprep.subr.bf16.mxu1 %v540_v0  ;;  %v518_v3 = vld [vmem:[%s695_s1 + $0x48] sm:$0xff]   ;;  %v520_v5 = vld [vmem:[%s695_s1 + $0x50] sm:$0xff]  }
   0x2   :  { %v517_v2 = vld [vmem:[%s695_s1] sm:$0xff]   ;;  %470 = vmatprep.mubr.msk.bf16.mxu0 %vm541_vm0, %v540_v0  ;;  %490 = vmatprep.mubr.msk.bf16.mxu1 %vm541_vm0, %v540_v0  ;;  %v519_v4 = vld [vmem:[%s695_s1 + $0x8] sm:$0xff]   ;;  %v521_v6 = vld [vmem:[%s695_s1 + $0x10] sm:$0xff]  }
   0x3   :  { %455 = vmatpush3.bf16.msra.mxu0 %v516_v1  ;;  %475 = vmatpush3.bf16.msra.mxu1 %v517_v2  ;;  %v522_v7 = vld [vmem:[%s695_s1 + $0x58] sm:$0xff]   ;;  %v524_v9 = vld [vmem:[%s695_s1 + $0x60] sm:$0xff]   ;;  %v526_v11 = vld [vmem:[%s695_s1 + $0x68] sm:$0xff]  }
   0x4   :  { %456 = vmatprep.subr.bf16.mxu0 %v540_v0  ;;  %476 = vmatprep.subr.bf16.mxu1 %v540_v0  ;;  %v523_v8 = vld [vmem:[%s695_s1 + $0x18] sm:$0xff]   ;;  %v525_v10 = vld [vmem:[%s695_s1 + $0x20] sm:$0xff]   ;;  %v527_v12 = vld [vmem:[%s695_s1 + $0x28] sm:$0xff]  }
   0x5   :  { %v528_v13 = vld [vmem:[%s695_s1 + $0x70] sm:$0xff]   ;;  %v530_v15 = vld [vmem:[%s695_s1 + $0x78] sm:$0xff]   ;;  %v367_v17 = vld [vmem:[%s696_s0 + $0x4] sm:$0xf] }
   0x6   :  { %v529_v14 = vld [vmem:[%s695_s1 + $0x30] sm:$0xff]   ;;  %v531_v16 = vld [vmem:[%s695_s1 + $0x38] sm:$0xff]   ;;  %v532_v18 = vld [vmem:[%s695_s1 + $0x80] sm:$0xff]  }
   0x7   :  { %457 = vmatpush3.bf16.msra.mxu0 %v518_v3  ;;  %477 = vmatpush3.bf16.msra.mxu1 %v519_v4  ;;  %v21_v19 = vld [vmem:[%s696_s0] sm:$0xf]  ;;  %v533_v20 = vld [vmem:[%s695_s1 + $0x88] sm:$0xff]   ;;  %v534_v21 = vld [vmem:[%s695_s1 + $0x90] sm:$0xff]  }
   0x8   :  { %458 = vmatprep.subr.bf16.mxu0 %v540_v0  ;;  %478 = vmatprep.subr.bf16.mxu1 %v540_v0  ;;  %v535_v22 = vld [vmem:[%s695_s1 + $0x98] sm:$0xff]   ;;  %v536_v23 = vld [vmem:[%s695_s1 + $0xa0] sm:$0xff]   ;;  %v537_v24 = vld [vmem:[%s695_s1 + $0xa8] sm:$0xff]  }
   0x9   :  { %v538_v25 = vld [vmem:[%s695_s1 + $0xb0] sm:$0xff]   ;;  %v539_v26 = vld [vmem:[%s695_s1 + $0xb8] sm:$0xff]   ;;  %v400_v27 = vld [vmem:[%s696_s0 + $0x8] sm:$0xf] }
   0xa   :  { %v341_v37 = vld [vmem:[%s697_s2] sm:$0xf] }
   0xb   :  { %459 = vmatpush3.bf16.msra.mxu0 %v520_v5  ;;  %479 = vmatpush3.bf16.msra.mxu1 %v521_v6  ;;  %v342_v38 = vunpack.c.l.bf16 %v341_v37  ;;  %v425_v42 = vld [vmem:[%s698_s3] ss:$0 sm:$0xff] }
   0xc   :  { %460 = vmatprep.subr.bf16.mxu0 %v540_v0  ;;  %480 = vmatprep.subr.bf16.mxu1 %v540_v0  ;;  %v426_v46 = vld [vmem:[%s699_s4] ss:$0 sm:$0xff] }
   0xf   :  { %461 = vmatpush3.bf16.msra.mxu0 %v522_v7  ;;  %481 = vmatpush3.bf16.msra.mxu1 %v523_v8 }
  0x10   :  { %462 = vmatprep.subr.bf16.mxu0 %v540_v0  ;;  %482 = vmatprep.subr.bf16.mxu1 %v540_v0 }
  0x13   :  { %463 = vmatpush3.bf16.msra.mxu0 %v524_v9  ;;  %483 = vmatpush3.bf16.msra.mxu1 %v525_v10 }
  0x14   :  { %464 = vmatprep.subr.bf16.mxu0 %v540_v0  ;;  %484 = vmatprep.subr.bf16.mxu1 %v540_v0 }
  0x17   :  { %465 = vmatpush3.bf16.msra.mxu0 %v526_v11  ;;  %485 = vmatpush3.bf16.msra.mxu1 %v527_v12 }
  0x18   :  { %466 = vmatprep.subr.bf16.mxu0 %v540_v0  ;;  %486 = vmatprep.subr.bf16.mxu1 %v540_v0 }
  0x1b   :  { %467 = vmatpush3.bf16.msra.mxu0 %v528_v13  ;;  %487 = vmatpush3.bf16.msra.mxu1 %v529_v14 }
  0x1c   :  { %468 = vmatprep.subr.bf16.mxu0 %v540_v0  ;;  %488 = vmatprep.subr.bf16.mxu1 %v540_v0 }
  0x1f   :  { %469 = vmatpush3.bf16.msra.mxu0 %v530_v15  ;;  %489 = vmatpush3.bf16.msra.mxu1 %v531_v16 }
  0x20   :  { %494 = vmatprep.subr.bf16.mxu0 %v540_v0 }
  0x22   :  { %471 = vmatmul.mubr.bf16.vlgmr.msra.gmra.mrb[0].mxu0 %v367_v17  ;;  %491 = vmatmul.mubr.bf16.vlgmr.msra.gmra.mrb[0].mxu1 %v21_v19 }
  0x23   :  { %495 = vmatpush3.bf16.msra.mxu0 %v532_v18  ;;  %510 = vmatprep.mubr.msk.bf16.mxu0 %vm541_vm0, %v540_v0 }
  0x24   :  { %496 = vmatprep.subr.bf16.mxu0 %v540_v0 }
  0x27   :  { %497 = vmatpush3.bf16.msra.mxu0 %v533_v20 }
  0x28   :  { %498 = vmatprep.subr.bf16.mxu0 %v540_v0 }
  0x2b   :  { %499 = vmatpush3.bf16.msra.mxu0 %v534_v21 }
  0x2c   :  { %500 = vmatprep.subr.bf16.mxu0 %v540_v0 }
  0x2f   :  { %501 = vmatpush3.bf16.msra.mxu0 %v535_v22 }
  0x30   :  { %502 = vmatprep.subr.bf16.mxu0 %v540_v0 }
  0x33   :  { %503 = vmatpush3.bf16.msra.mxu0 %v536_v23 }
  0x34   :  { %504 = vmatprep.subr.bf16.mxu0 %v540_v0 }
  0x37   :  { %505 = vmatpush3.bf16.msra.mxu0 %v537_v24 }
  0x38   :  { %506 = vmatprep.subr.bf16.mxu0 %v540_v0 }
  0x3b   :  { %507 = vmatpush3.bf16.msra.mxu0 %v538_v25 }
  0x3c   :  { %508 = vmatprep.subr.bf16.mxu0 %v540_v0 }
  0x3f   :  { %509 = vmatpush3.bf16.msra.mxu0 %v539_v26 }
  0x42   :  { %511 = vmatmul.mubr.bf16.vlgmr.msra.gmra.mrb[4].mxu0 %v400_v27 }
  0xf5   :  { %v139_v28 = vpop.f32.mrb[0].mxu0  ;;  %v227_v30 = vpop.f32.mrb[0].mxu1 }
  0xf6   :  { %v472_v29 = vpop.f32.mrb[1].mxu0  ;;  %v228_v31 = vadd.f32 %v227_v30, %v139_v28  ;;  %v492_v33 = vpop.f32.mrb[1].mxu1 }
  0xf7   :  { %v142_v32 = vpop.f32.mrb[2].mxu0  ;;  %v230_v35 = vpop.f32.mrb[2].mxu1 }
  0xf8   :  { %v473_v34 = vpop.f32.mrb[3].mxu0  ;;  %v493_v36 = vpop.f32.mrb[3].mxu1 }
 0x115   :  { %v334_v39 = vpop.f32.mrb[4].mxu0 }
 0x116   :  { %v340_v40 = vadd.f32 %v334_v39, %v228_v31  ;;  %v512_v41 = vpop.f32.mrb[5].mxu0 }
 0x117   :  { %v337_v43 = vpop.f32.mrb[6].mxu0 }
 0x118   :  { %v343_v44 = vadd.f32 %v342_v38, %v340_v40  ;;  %v513_v45 = vpop.f32.mrb[7].mxu0 }
 0x11a   :  { %v351_v47 = vmul.f32 %v425_v42, %v343_v44 }
 0x11c   :  { %v359_v48 = vadd.f32 %v426_v46, %v351_v47 }
 0x11e   :  { %v360_v49 = vmax.f32 %v359_v48, 0.0 }
 0x120   :  { %v361_v50 = vpack.c.bf16 %v360_v49, %v360_v49 }
 0x122   :  { %362 = vst [vmem:[%s700_s5] sm:$0xf] %v361_v50 }

</bundles_post_ra>
